<compile_context>
chip_gen: v7x
topology: tpu7x:2x2x1
jax: 0.10.0
libtpu: 0.0.40
codegen_flags: <defaults>
</compile_context>

<pallas_src>
import jax
import jax.numpy as jnp
from jax.experimental import pallas as pl
from jax.experimental.pallas import tpu as pltpu


def ffnn_kernel(x_ref, w1_ref, b1_ref, w2_ref, b2_ref, w3_ref, b3_ref, o_ref):
    # --- h1 = ReLU(x @ W1 + b1) ---------------------------------------------
    h1 = jnp.dot(x_ref[...], w1_ref[...], preferred_element_type=jnp.float32)
    # add/ReLU in f32 (v5e has no bf16 VPU), store the intermediate as bf16.
    h1 = jnp.maximum(h1 + b1_ref[...], 0.0).astype(jnp.bfloat16)
    # drop1: identity (eval mode)

    # --- h2 = ReLU(h1 @ W2 + b2) --------------------------------------------
    h2 = jnp.dot(h1, w2_ref[...], preferred_element_type=jnp.float32)
    h2 = jnp.maximum(h2 + b2_ref[...], 0.0).astype(jnp.bfloat16)
    # drop2: identity (eval mode)

    # --- logits = h2 @ W3 + b3  (W3/b3 are lane-padded to a multiple of 128) -
    logits = jnp.dot(h2, w3_ref[...], preferred_element_type=jnp.float32)
    logits = logits + b3_ref[...]          # padded lanes carry a -1e30 bias

    # --- log_softmax over feature axis (dim=1) ------------------------------
    # Padded lanes sit at ~-1e30, so exp(shifted) underflows to exactly 0 and
    # they contribute nothing to the sum; real lanes are unaffected.
    m = jnp.max(logits, axis=-1, keepdims=True)
    shifted = logits - m
    lse = jnp.log(jnp.sum(jnp.exp(shifted), axis=-1, keepdims=True))
    o_ref[...] = (shifted - lse).astype(o_ref.dtype)


def _round_up(v, m):
    return ((v + m - 1) // m) * m


def ffnn_forward(x, params, *, tb=512):
    w1, b1, w2, b2, w3, b3 = params
    B, F = x.shape
    N = w3.shape[1]

    # Lane-dense output: pad last-layer width to a multiple of 128.
    Np = _round_up(N, 128)
    if Np != N:
        w3 = jnp.pad(w3, ((0, 0), (0, Np - N)))                      # zero cols
        b3 = jnp.pad(b3, ((0, 0), (0, Np - N)), constant_values=-1e30)

    # Cast once in the wrapper: bf16 weights/activations halve the dominant
    # weight DMA; f32 accumulation is preserved inside the kernel.
    xb = x.astype(jnp.bfloat16)
    w1b = w1.astype(jnp.bfloat16)
    w2b = w2.astype(jnp.bfloat16)
    w3b = w3.astype(jnp.bfloat16)

    # Batch tile: multiple of 8 sublanes, capped at `tb`, and also capped at
    # ceil(B/2) (rounded to 8) so moderate batches give >= 2 grid tiles and
    # the "parallel" axis can shard across both v7x TensorCores.
    half = _round_up(-(-B // 2), 8)
    tile_b = min(tb, max(B, 8), half)
    tile_b = max(8, (tile_b // 8) * 8)
    Bp = _round_up(B, tile_b)
    if Bp != B:
        xb = jnp.pad(xb, ((0, Bp - B), (0, 0)))

    x_spec = pl.BlockSpec((tile_b, F), lambda i: (i, 0))
    o_spec = pl.BlockSpec((tile_b, Np), lambda i: (i, 0))
    # Constant index_map -> weights/biases loaded once and stay VMEM-resident
    # across all batch tiles (no per-tile re-fetch).
    const = lambda shape: pl.BlockSpec(shape, lambda i: (0, 0))

    out = pl.pallas_call(
        ffnn_kernel,
        out_shape=jax.ShapeDtypeStruct((Bp, Np), jnp.float32),
        grid=(Bp // tile_b,),
        in_specs=[
            x_spec,
            const(w1b.shape), const(b1.shape),
            const(w2b.shape), const(b2.shape),
            const(w3b.shape), const(b3.shape),
        ],
        out_specs=o_spec,
        compiler_params=pltpu.CompilerParams(
            dimension_semantics=("parallel",),
            vmem_limit_bytes=40 << 20,
        ),
    )(xb, w1b, b1, w2b, b2, w3b, b3)

    # Strip batch padding and the padded output lanes.
    return out[:B, :N]


def init_params(key, input_features, output_features):
    """Deterministic init mimicking nn.Linear's U(-1/sqrt(fan_in), 1/sqrt(fan_in)).

    Weights are stored as [in, out] (transposed vs PyTorch's [out, in]) so the
    kernel computes y = x @ W + b directly on the MXU.
    """
    def linear_init(k, fan_in, fan_out):
        kw, kb = jax.random.split(k)
        bound = 1.0 / jnp.sqrt(fan_in)
        w = jax.random.uniform(kw, (fan_in, fan_out), jnp.float32, -bound, bound)
        b = jax.random.uniform(kb, (1, fan_out), jnp.float32, -bound, bound)
        return w, b

    k1, k2, k3 = jax.random.split(key, 3)
    w1, b1 = linear_init(k1, input_features, 2048)
    w2, b2 = linear_init(k2, 2048, 1024)
    w3, b3 = linear_init(k3, 1024, output_features)
    return (w1, b1, w2, b2, w3, b3)


def ffnn_reference(x, params):
    """Pure-JAX reference using the same bf16-input / f32-accumulate recipe."""
    w1, b1, w2, b2, w3, b3 = params
    xb = x.astype(jnp.bfloat16)
    h1 = jnp.dot(xb, w1.astype(jnp.bfloat16),
                 preferred_element_type=jnp.float32) + b1
    h1 = jnp.maximum(h1, 0.0)
    h2 = jnp.dot(h1.astype(jnp.bfloat16), w2.astype(jnp.bfloat16),
                 preferred_element_type=jnp.float32) + b2
    h2 = jnp.maximum(h2, 0.0)
    logits = jnp.dot(h2.astype(jnp.bfloat16), w3.astype(jnp.bfloat16),
                     preferred_element_type=jnp.float32) + b3
    return jax.nn.log_softmax(logits, axis=1)


if __name__ == "__main__":
    input_features = 32
    output_features = 16
    batch = 8

    key = jax.random.PRNGKey(0)
    kx, kp = jax.random.split(key)
    x = jax.random.normal(kx, (batch, input_features), dtype=jnp.float32)
    params = init_params(kp, input_features, output_features)

    out = ffnn_forward(x, params)
    out = jax.block_until_ready(out)

    ref = ffnn_reference(x, params)
    assert out.shape == (batch, output_features)
    assert jnp.allclose(out, ref, atol=1e-2, rtol=1e-2), "mismatch vs reference"

    print("KERNEL_OK")
</pallas_src>

<mosaic_0001>
module attributes {stable_mosaic.version = 11 : i64} {
  func.func @ffnn_kernel(%arg0: i32, %arg1: memref<8x32xbf16, #tpu.memory_space<vmem>>, %arg2: memref<32x2048xbf16, #tpu.memory_space<vmem>>, %arg3: memref<1x2048xf32, #tpu.memory_space<vmem>>, %arg4: memref<2048x1024xbf16, #tpu.memory_space<vmem>>, %arg5: memref<1x1024xf32, #tpu.memory_space<vmem>>, %arg6: memref<1024x128xbf16, #tpu.memory_space<vmem>>, %arg7: memref<1x128xf32, #tpu.memory_space<vmem>>, %arg8: memref<8x128xf32, #tpu.memory_space<vmem>>) attributes {dimension_semantics = [#tpu.dimension_semantics<parallel>], iteration_bounds = array<i64: 1>, scalar_prefetch = 0 : i64, scratch_operands = 0 : i64, tpu.core_type = #tpu.core_type<tc>, window_params = [{transform_indices = @transform_0, window_bounds = array<i64: 8, 32>}, {pipeline_mode = #tpu.pipeline_mode<synchronous>, transform_indices = @transform_1, window_bounds = array<i64: 32, 2048>}, {pipeline_mode = #tpu.pipeline_mode<synchronous>, transform_indices = @transform_2, window_bounds = array<i64: 1, 2048>}, {pipeline_mode = #tpu.pipeline_mode<synchronous>, transform_indices = @transform_3, window_bounds = array<i64: 2048, 1024>}, {pipeline_mode = #tpu.pipeline_mode<synchronous>, transform_indices = @transform_4, window_bounds = array<i64: 1, 1024>}, {pipeline_mode = #tpu.pipeline_mode<synchronous>, transform_indices = @transform_5, window_bounds = array<i64: 1024, 128>}, {pipeline_mode = #tpu.pipeline_mode<synchronous>, transform_indices = @transform_6, window_bounds = array<i64: 1, 128>}, {transform_indices = @transform_7, window_bounds = array<i64: 8, 128>}]} {
    %c0 = arith.constant 0 : index
    %c0_0 = arith.constant 0 : index
    %0 = vector.load %arg1[%c0, %c0_0] : memref<8x32xbf16, #tpu.memory_space<vmem>>, vector<8x32xbf16>
    %c0_1 = arith.constant 0 : index
    %c0_2 = arith.constant 0 : index
    %1 = vector.load %arg2[%c0_1, %c0_2] : memref<32x2048xbf16, #tpu.memory_space<vmem>>, vector<32x2048xbf16>
    %cst = arith.constant dense<0.000000e+00> : vector<8x2048xf32>
    %2 = tpu.matmul %0, %1, %cst {dimension_numbers = #tpu.dot_dimension_numbers<[1], [0], [0], [1], [0, 0, 1, 1], [], []>} : vector<8x32xbf16>, vector<32x2048xbf16>, vector<8x2048xf32> -> vector<8x2048xf32>
    %c0_3 = arith.constant 0 : index
    %c0_4 = arith.constant 0 : index
    %3 = vector.load %arg3[%c0_3, %c0_4] : memref<1x2048xf32, #tpu.memory_space<vmem>>, vector<1x2048xf32>
    %4 = vector.broadcast %3 : vector<1x2048xf32> to vector<8x2048xf32>
    %5 = arith.addf %2, %4 : vector<8x2048xf32>
    %cst_5 = arith.constant 0.000000e+00 : f32
    %6 = vector.broadcast %cst_5 : f32 to vector<8x2048xf32>
    %7 = arith.maximumf %5, %6 : vector<8x2048xf32>
    %8 = arith.truncf %7 : vector<8x2048xf32> to vector<8x2048xbf16>
    %c0_6 = arith.constant 0 : index
    %c0_7 = arith.constant 0 : index
    %9 = vector.load %arg4[%c0_6, %c0_7] : memref<2048x1024xbf16, #tpu.memory_space<vmem>>, vector<2048x1024xbf16>
    %cst_8 = arith.constant dense<0.000000e+00> : vector<8x1024xf32>
    %10 = tpu.matmul %8, %9, %cst_8 {dimension_numbers = #tpu.dot_dimension_numbers<[1], [0], [0], [1], [0, 0, 1, 1], [], []>} : vector<8x2048xbf16>, vector<2048x1024xbf16>, vector<8x1024xf32> -> vector<8x1024xf32>
    %c0_9 = arith.constant 0 : index
    %c0_10 = arith.constant 0 : index
    %11 = vector.load %arg5[%c0_9, %c0_10] : memref<1x1024xf32, #tpu.memory_space<vmem>>, vector<1x1024xf32>
    %12 = vector.broadcast %11 : vector<1x1024xf32> to vector<8x1024xf32>
    %13 = arith.addf %10, %12 : vector<8x1024xf32>
    %cst_11 = arith.constant 0.000000e+00 : f32
    %14 = vector.broadcast %cst_11 : f32 to vector<8x1024xf32>
    %15 = arith.maximumf %13, %14 : vector<8x1024xf32>
    %16 = arith.truncf %15 : vector<8x1024xf32> to vector<8x1024xbf16>
    %c0_12 = arith.constant 0 : index
    %c0_13 = arith.constant 0 : index
    %17 = vector.load %arg6[%c0_12, %c0_13] : memref<1024x128xbf16, #tpu.memory_space<vmem>>, vector<1024x128xbf16>
    %cst_14 = arith.constant dense<0.000000e+00> : vector<8x128xf32>
    %18 = tpu.matmul %16, %17, %cst_14 {dimension_numbers = #tpu.dot_dimension_numbers<[1], [0], [0], [1], [0, 0, 1, 1], [], []>} : vector<8x1024xbf16>, vector<1024x128xbf16>, vector<8x128xf32> -> vector<8x128xf32>
    %c0_15 = arith.constant 0 : index
    %c0_16 = arith.constant 0 : index
    %19 = vector.load %arg7[%c0_15, %c0_16] : memref<1x128xf32, #tpu.memory_space<vmem>>, vector<1x128xf32>
    %20 = vector.broadcast %19 : vector<1x128xf32> to vector<8x128xf32>
    %21 = arith.addf %18, %20 : vector<8x128xf32>
    %cst_17 = arith.constant dense<0xFF800000> : vector<8xf32>
    %22 = vector.multi_reduction <maximumf>, %21, %cst_17 [1] : vector<8x128xf32> to vector<8xf32>
    %23 = vector.shape_cast %22 : vector<8xf32> to vector<8x1xf32>
    %24 = vector.broadcast %23 : vector<8x1xf32> to vector<8x128xf32>
    %25 = arith.subf %21, %24 : vector<8x128xf32>
    %26 = math.exp %25 : vector<8x128xf32>
    %cst_18 = arith.constant dense<0.000000e+00> : vector<8xf32>
    %27 = vector.multi_reduction <add>, %26, %cst_18 [1] : vector<8x128xf32> to vector<8xf32>
    %28 = vector.shape_cast %27 : vector<8xf32> to vector<8x1xf32>
    %29 = math.log %28 : vector<8x1xf32>
    %30 = vector.broadcast %29 : vector<8x1xf32> to vector<8x128xf32>
    %31 = arith.subf %25, %30 : vector<8x128xf32>
    %c0_19 = arith.constant 0 : index
    %c0_20 = arith.constant 0 : index
    %32 = vector.load %arg8[%c0_19, %c0_20] : memref<8x128xf32, #tpu.memory_space<vmem>>, vector<8x128xf32>
    tpu.vector_store %arg8[%c0_19, %c0_20], %31 {strides = array<i32>} : memref<8x128xf32, #tpu.memory_space<vmem>>, vector<8x128xf32>,
    return
  }
  func.func @transform_0(%arg0: i32) -> (i32, i32) {
    %c0_i32 = arith.constant 0 : i32
    %c0_i32_0 = arith.constant 0 : i32
    return %arg0, %c0_i32 : i32, i32
  }
  func.func @transform_1(%arg0: i32) -> (i32, i32) {
    %c0_i32 = arith.constant 0 : i32
    %c0_i32_0 = arith.constant 0 : i32
    %c0_i32_1 = arith.constant 0 : i32
    return %c0_i32, %c0_i32_0 : i32, i32
  }
  func.func @transform_2(%arg0: i32) -> (i32, i32) {
    %c0_i32 = arith.constant 0 : i32
    %c0_i32_0 = arith.constant 0 : i32
    %c0_i32_1 = arith.constant 0 : i32
    return %c0_i32, %c0_i32_0 : i32, i32
  }
  func.func @transform_3(%arg0: i32) -> (i32, i32) {
    %c0_i32 = arith.constant 0 : i32
    %c0_i32_0 = arith.constant 0 : i32
    %c0_i32_1 = arith.constant 0 : i32
    return %c0_i32, %c0_i32_0 : i32, i32
  }
  func.func @transform_4(%arg0: i32) -> (i32, i32) {
    %c0_i32 = arith.constant 0 : i32
    %c0_i32_0 = arith.constant 0 : i32
    %c0_i32_1 = arith.constant 0 : i32
    return %c0_i32, %c0_i32_0 : i32, i32
  }
  func.func @transform_5(%arg0: i32) -> (i32, i32) {
    %c0_i32 = arith.constant 0 : i32
    %c0_i32_0 = arith.constant 0 : i32
    %c0_i32_1 = arith.constant 0 : i32
    return %c0_i32, %c0_i32_0 : i32, i32
  }
  func.func @transform_6(%arg0: i32) -> (i32, i32) {
    %c0_i32 = arith.constant 0 : i32
    %c0_i32_0 = arith.constant 0 : i32
    %c0_i32_1 = arith.constant 0 : i32
    return %c0_i32, %c0_i32_0 : i32, i32
  }
  func.func @transform_7(%arg0: i32) -> (i32, i32) {
    %c0_i32 = arith.constant 0 : i32
    %c0_i32_0 = arith.constant 0 : i32
    return %arg0, %c0_i32 : i32, i32
  }
}

</mosaic_0001>

<bundles_post_ra>
// kernel: tpu_custom_call.1
= control target key start
LH: loop header
LB: loop body
LE: loop exit
PB: predicated region body
PF: predicated region fallthrough
CT: control target
= control target key end

     0   :  { %12 = vsyncpa [#allocation3], 0  ;;  %s10984_s0 = inlined_call_operand.hbm [shape: bf16[8,32], index: 0, kind: input, shape index: {}]   ;;  %s10985_s1 = inlined_call_operand.hbm [shape: bf16[32,2048], index: 1, kind: input, shape index: {}]   ;;  %s10986_s2 = inlined_call_operand.hbm [shape: f32[1,2048], index: 2, kind: input, shape index: {}]   ;;  %s10987_s3 = inlined_call_operand.hbm [shape: bf16[2048,1024], index: 3, kind: input, shape index: {}]   ;;  %s10988_s4 = inlined_call_operand.hbm [shape: f32[1,1024], index: 4, kind: input, shape index: {}]   ;;  %s10989_s5 = inlined_call_operand.hbm [shape: bf16[1024,128], index: 5, kind: input, shape index: {}]   ;;  %s10990_s6 = inlined_call_operand.hbm [shape: f32[1,128], index: 6, kind: input, shape index: {}]   ;;  %s10991_s7 = inlined_call_operand.hbm [shape: f32[8,128], index: 7, kind: output, shape index: {}]  }
   0x1   :  { %13 = vsyncpa [#allocation6], 0 }
   0x2   :  { %14 = vsyncpa [#allocation9], 0 }
   0x3   :  { %15 = vsyncpa [#allocation12], 0 }
   0x4   :  { %16 = vsyncpa [#allocation4], 0  ;;  %s10585_s24 = smov [#allocation5]   ;;  %s10399_s28 = scalar_lea.hbm %s10985_s1, 4096 }
   0x5   :  { %s32_s25 = sshll.u32 %s10585_s24, 4  ;;  %p10400_p0 = scmp.ne.s32.totalorder %s10985_s1, %s10399_s28  ;;  %s33_s25 = int_to_ptr.vmem [resolvable:$true] %s32_s25 }
   0x6   :  { %p10403_p1 = scmp.lt.u32.totalorder %s10399_s28, %s10985_s1 }
   0x8   :  { %p10405_p2 = pnand %p10403_p1, %p10400_p0 }
   0xa   :  { %10408 = shalt.err (!%p10405_p2)
}
   0xb   :  { %s10409_s10 = scalar_lea.vmem %s33_s25, 4096  ;;  %p10414_p4 = scmp.lt.s32.totalorder %s33_s25, %s33_s25 }
   0xc   :  { %p10410_p3 = scmp.ne.s32.totalorder %s33_s25, %s10409_s10  ;;  %p10415_p5 = scmp.lt.s32.totalorder %s10409_s10, %s10409_s10 }
   0xe   :  { %p10416_p6 = por %p10415_p5, %p10414_p4 }
  0x10   :  { %p10417_p7 = pnand %p10416_p6, %p10410_p3 }
  0x12   :  { %10420 = shalt.err (!%p10417_p7)
}
  0x13   :  { %s10586_s11 = smov 1024   ;;  %s10587_s12 = smov 64  }
  0x14   :  { %38 = dma.hbm_to_vmem [thread:$0]  %s10985_s1, 4096, %s33_s25, [#allocation6], %s10586_s11, %s10586_s11, %s10587_s12  }
  0x15   :  { %s10588_s15 = smov [#allocation8]   ;;  %s10421_s19 = scalar_lea.hbm %s10987_s3, 131072 }
  0x16   :  { %s54_s16 = sshll.u32 %s10588_s15, 4  ;;  %p10422_p8 = scmp.ne.s32.totalorder %s10987_s3, %s10421_s19  ;;  %s55_s16 = int_to_ptr.vmem [resolvable:$true] %s54_s16 }
  0x17   :  { %p10425_p9 = scmp.lt.u32.totalorder %s10421_s19, %s10987_s3 }
  0x19   :  { %p10427_p10 = pnand %p10425_p9, %p10422_p8 }
  0x1b   :  { %10430 = shalt.err (!%p10427_p10)
}
  0x1c   :  { %s10431_s24 = scalar_lea.vmem %s55_s16, 131072  ;;  %p10436_p12 = scmp.lt.s32.totalorder %s55_s16, %s55_s16 }
  0x1d   :  { %p10432_p11 = scmp.ne.s32.totalorder %s55_s16, %s10431_s24  ;;  %p10437_p13 = scmp.lt.s32.totalorder %s10431_s24, %s10431_s24 }
  0x1f   :  { %p10438_p0 = por %p10437_p13, %p10436_p12 }
  0x21   :  { %p10439_p1 = pnand %p10438_p0, %p10432_p11 }
  0x23   :  { %10442 = shalt.err (!%p10439_p1)
}
  0x24   :  { %s10589_s1 = smov 512   ;;  %s10590_s25 = smov 32  }
  0x25   :  { %60 = dma.hbm_to_vmem [thread:$0]  %s10987_s3, 131072, %s55_s16, [#allocation9], %s10589_s1, %s10589_s1, %s10590_s25  }
  0x26   :  { %s10591_s28 = smov [#allocation11]   ;;  %s10592_s30 = smov [#allocation2]  }
  0x27   :  { %s76_s29 = sshll.u32 %s10591_s28, 4  ;;  %s23_s8 = sshll.u32 %s10592_s30, 4  ;;  %s77_s29 = int_to_ptr.vmem [resolvable:$true] %s76_s29  ;;  %s24_s8 = int_to_ptr.vmem [resolvable:$true] %s23_s8 }
  0x28   :  { %s10443_s11 = scalar_lea.hbm %s10989_s5, 8192 }
  0x29   :  { %p10444_p2 = scmp.ne.s32.totalorder %s10989_s5, %s10443_s11  ;;  %p10447_p3 = scmp.lt.u32.totalorder %s10443_s11, %s10989_s5 }
  0x2b   :  { %p10449_p4 = pnand %p10447_p3, %p10444_p2 }
  0x2d   :  { %10452 = shalt.err (!%p10449_p4)
}
  0x2e   :  { %s10453_s3 = scalar_lea.vmem %s77_s29, 8192  ;;  %p10458_p6 = scmp.lt.s32.totalorder %s77_s29, %s77_s29 }
  0x2f   :  { %p10454_p5 = scmp.ne.s32.totalorder %s77_s29, %s10453_s3  ;;  %p10459_p7 = scmp.lt.s32.totalorder %s10453_s3, %s10453_s3 }
  0x31   :  { %p10460_p8 = por %p10459_p7, %p10458_p6 }
  0x33   :  { %p10461_p9 = pnand %p10460_p8, %p10454_p5 }
  0x35   :  { %10464 = shalt.err (!%p10461_p9)
}
  0x36   :  { %s10593_s16 = smov 4   ;;  %s10465_s22 = scalar_lea.hbm %s10984_s0, 64 }
  0x37   :  { %82 = dma.hbm_to_vmem [thread:$0]  %s10989_s5, 8192, %s77_s29, [#allocation12], %s10587_s12, %s10587_s12, %s10593_s16  }
  0x38   :  { %p10466_p10 = scmp.ne.s32.totalorder %s10984_s0, %s10465_s22  ;;  %p10469_p11 = scmp.lt.u32.totalorder %s10465_s22, %s10984_s0 }
  0x3a   :  { %p10471_p12 = pnand %p10469_p11, %p10466_p10 }
  0x3c   :  { %10474 = shalt.err (!%p10471_p12)
}
  0x3d   :  { %s10475_s26 = scalar_lea.vmem %s24_s8, 64  ;;  %p10480_p0 = scmp.lt.s32.totalorder %s24_s8, %s24_s8 }
  0x3e   :  { %p10476_p13 = scmp.ne.s32.totalorder %s24_s8, %s10475_s26  ;;  %p10481_p1 = scmp.lt.s32.totalorder %s10475_s26, %s10475_s26 }
  0x40   :  { %p10482_p2 = por %p10481_p1, %p10480_p0 }
  0x42   :  { %p10483_p3 = pnand %p10482_p2, %p10476_p13 }
  0x44   :  { %10486 = shalt.err (!%p10483_p3)
}
  0x45   :  { %26 = dma.hbm_to_vmem [thread:$0]  %s10984_s0, 64, %s24_s8, [#allocation3]  }
  0x46   :  { %s10594_s27 = smov [#allocation7]   ;;  %s10595_s29 = smov [#allocation10]  }
  0x47   :  { %s45_s28 = sshll.u32 %s10594_s27, 4  ;;  %s67_s30 = sshll.u32 %s10595_s29, 4  ;;  %s46_s28 = int_to_ptr.vmem [resolvable:$true] %s45_s28  ;;  %s68_s30 = int_to_ptr.vmem [resolvable:$true] %s67_s30 }
  0x48   :  { %s10487_s11 = scalar_lea.hbm %s10986_s2, 256 }
  0x49   :  { %p10488_p4 = scmp.ne.s32.totalorder %s10986_s2, %s10487_s11  ;;  %p10491_p5 = scmp.lt.u32.totalorder %s10487_s11, %s10986_s2 }
  0x4b   :  { %p10493_p6 = pnand %p10491_p5, %p10488_p4 }
  0x4d   :  { %10496 = shalt.err (!%p10493_p6)
}
  0x4e   :  { %s10497_s0 = scalar_lea.vmem %s46_s28, 256  ;;  %p10502_p8 = scmp.lt.s32.totalorder %s46_s28, %s46_s28 }
  0x4f   :  { %p10498_p7 = scmp.ne.s32.totalorder %s46_s28, %s10497_s0  ;;  %p10503_p9 = scmp.lt.s32.totalorder %s10497_s0, %s10497_s0 }
  0x51   :  { %p10504_p10 = por %p10503_p9, %p10502_p8 }
  0x53   :  { %p10505_p11 = pnand %p10504_p10, %p10498_p7 }
  0x55   :  { %10508 = shalt.err (!%p10505_p11)
}
  0x56   :  { %48 = dma.hbm_to_vmem [thread:$0]  %s10986_s2, 256, %s46_s28, [#allocation6]  }
  0x57   :  { %s10509_s19 = scalar_lea.hbm %s10988_s4, 128 }
  0x58   :  { %p10510_p12 = scmp.ne.s32.totalorder %s10988_s4, %s10509_s19  ;;  %p10513_p13 = scmp.lt.u32.totalorder %s10509_s19, %s10988_s4 }
  0x5a   :  { %p10515_p0 = pnand %p10513_p13, %p10510_p12 }
  0x5c   :  { %10518 = shalt.err (!%p10515_p0)
}
  0x5d   :  { %s10519_s24 = scalar_lea.vmem %s68_s30, 128  ;;  %p10524_p2 = scmp.lt.s32.totalorder %s68_s30, %s68_s30 }
  0x5e   :  { %p10520_p1 = scmp.ne.s32.totalorder %s68_s30, %s10519_s24  ;;  %p10525_p3 = scmp.lt.s32.totalorder %s10519_s24, %s10519_s24 }
  0x60   :  { %p10526_p4 = por %p10525_p3, %p10524_p2 }
  0x62   :  { %p10527_p5 = pnand %p10526_p4, %p10520_p1 }
  0x64   :  { %10530 = shalt.err (!%p10527_p5)
}
  0x65   :  { %70 = dma.hbm_to_vmem [thread:$0]  %s10988_s4, 128, %s68_s30, [#allocation9]  }
  0x66   :  { %s10596_s25 = smov [#allocation13]   ;;  %s10531_s27 = scalar_lea.hbm %s10990_s6, 16 }
  0x67   :  { %s89_s26 = sshll.u32 %s10596_s25, 4  ;;  %p10532_p6 = scmp.ne.s32.totalorder %s10990_s6, %s10531_s27  ;;  %s90_s26 = int_to_ptr.vmem [resolvable:$true] %s89_s26 }
  0x68   :  { %p10535_p7 = scmp.lt.u32.totalorder %s10531_s27, %s10990_s6 }
  0x6a   :  { %p10537_p8 = pnand %p10535_p7, %p10532_p6 }
  0x6c   :  { %10540 = shalt.err (!%p10537_p8)
}
  0x6d   :  { %s10541_s11 = scalar_lea.vmem %s90_s26, 16  ;;  %s10545_s4 = scalar_lea.vmem %s90_s26, 32 }
  0x6e   :  { %p10542_p9 = scmp.ne.s32.totalorder %s90_s26, %s10541_s11  ;;  %p10546_p10 = scmp.lt.s32.totalorder %s90_s26, %s90_s26 }
  0x6f   :  { %p10547_p11 = scmp.lt.s32.totalorder %s10545_s4, %s10541_s11 }
  0x71   :  { %p10548_p12 = por %p10547_p11, %p10546_p10 }
  0x73   :  { %p10549_p13 = pnand %p10548_p12, %p10542_p9 }
  0x75   :  { %10552 = shalt.err (!%p10549_p13)
}
  0x76   :  { %92 = dma.hbm_to_vmem [thread:$0]  %s10990_s6, 16, %s90_s26, [#allocation12]  }
  0x77   :  { %10575 = dma.done.wait [#allocation3], 64  }
  0x78   :  { %10576 = vsyncadd [#allocation3], 4294967232 }
  0x79   :  { %10577 = dma.done.wait [#allocation6], 4352  }
  0x7a   :  { %10578 = vsyncadd [#allocation6], 4294962944 }
  0x7b   :  { %10579 = dma.done.wait [#allocation9], 131200  }
  0x7c   :  { %10580 = vsyncadd [#allocation9], 4294836096 }
  0x7d   :  { %10581 = dma.done.wait [#allocation12], 8208  }
  0x7e   :  { %10582 = vsyncadd [#allocation12], 4294959088  ;;  %v10597_v0 = vmov 0   ;;  %v116_v1 = vld [vmem:[#allocation5] sm:$0xff]  ;;  %v117_v7 = vld [vmem:[#allocation5 + $0x8] sm:$0xff]  ;;  %vm392_vm0 = vcmask 261120  }
  0x7f   :  { %428 = vmatprep.mubr.bf16.mxu0 %v10597_v0  ;;  %469 = vmatprep.mubr.bf16.mxu1 %v10597_v0  ;;  %v124_v2 = vld [vmem:[#allocation5 + $0x40] sm:$0xff]  ;;  %v125_v9 = vld [vmem:[#allocation5 + $0x48] sm:$0xff]  ;;  %v118_v15 = vld [vmem:[#allocation5 + $0x10] sm:$0xff]  ;;  %s10598_s6 = smov [#allocation14]  }
  0x80   :  { %v132_v3 = vld [vmem:[#allocation5 + $0x80] sm:$0xff]  ;;  %v8979_v4 = vcombine.high %v116_v1, %v124_v2  ;;  %v8978_v5 = vcombine.low %v116_v1, %v124_v2  ;;  %v133_v10 = vld [vmem:[#allocation5 + $0x88] sm:$0xff]  ;;  %v8981_v12 = vcombine.high %v117_v7, %v125_v9  ;;  %v8980_v13 = vcombine.low %v117_v7, %v125_v9  ;;  %v126_v16 = vld [vmem:[#allocation5 + $0x50] sm:$0xff]  ;;  %s8966_s14 = sshll.u32 %s10598_s6, 4  ;;  %s8967_s14 = int_to_ptr.vmem [resolvable:$true] %s8966_s14 }
  0x81   :  { %v140_v6 = vld [vmem:[#allocation5 + $0xc0] sm:$0xff]  ;;  %v141_v11 = vld [vmem:[#allocation5 + $0xc8] sm:$0xff]  ;;  %v119_v18 = vld [vmem:[#allocation5 + $0x18] sm:$0xff]  ;;  %v8983_v20 = vcombine.high %v118_v15, %v126_v16  ;;  %v8982_v26 = vcombine.low %v118_v15, %v126_v16  ;;  %s10553_s15 = scalar_lea.vmem %s8967_s14, 128  ;;  %p10558_p1 = scmp.lt.s32.totalorder %s8967_s14, %s8967_s14 }
  0x82   :  { %v8995_v8 = vcombine.high %v132_v3, %v140_v6  ;;  %396 = vmatprep.subr.bf16.mxu0 %v8979_v4  ;;  %v8997_v14 = vcombine.high %v133_v10, %v141_v11  ;;  %v8994_v17 = vcombine.low %v132_v3, %v140_v6  ;;  %v127_v19 = vld [vmem:[#allocation5 + $0x58] sm:$0xff]  ;;  %437 = vmatprep.subr.bf16.mxu1 %v8981_v12  ;;  %v134_v22 = vld [vmem:[#allocation5 + $0x90] sm:$0xff]  ;;  %v120_v31 = vld [vmem:[#allocation5 + $0x20] sm:$0xff]  ;;  %p10554_p0 = scmp.ne.s32.totalorder %s8967_s14, %s10553_s15  ;;  %p10559_p2 = scmp.lt.s32.totalorder %s10553_s15, %s10553_s15 }
  0x83   :  { %397 = vmatpush1.bf16.msra.mxu0 %v8978_v5  ;;  %438 = vmatpush1.bf16.msra.mxu1 %v8980_v13  ;;  %v8996_v21 = vcombine.low %v133_v10, %v141_v11  ;;  %v142_v23 = vld [vmem:[#allocation5 + $0xd0] sm:$0xff]  ;;  %v8985_v24 = vcombine.high %v119_v18, %v127_v19  ;;  %v10728_v25 = vld [vmem:[#allocation2] sm:$0xf]  ;;  %v8984_v30 = vcombine.low %v119_v18, %v127_v19  ;;  %v128_v32 = vld [vmem:[#allocation5 + $0x60] sm:$0xff] }
  0x84   :  { %398 = vmatprep.subr.bf16.mxu0 %v8995_v8  ;;  %439 = vmatprep.subr.bf16.mxu1 %v8997_v14  ;;  %v135_v27 = vld [vmem:[#allocation5 + $0x98] sm:$0xff]  ;;  %v8999_v29 = vcombine.high %v134_v22, %v142_v23  ;;  %v8998_v34 = vcombine.low %v134_v22, %v142_v23  ;;  %v121_v35 = vld [vmem:[#allocation5 + $0x28] sm:$0xff]  ;;  %v8987_v37 = vcombine.high %v120_v31, %v128_v32  ;;  %v136_v39 = vld [vmem:[#allocation5 + $0xa0] sm:$0xff]  ;;  %p10560_p3 = por %p10559_p2, %p10558_p1 }
  0x85   :  { %v143_v28 = vld [vmem:[#allocation5 + $0xd8] sm:$0xff]  ;;  %v129_v36 = vld [vmem:[#allocation5 + $0x68] sm:$0xff]  ;;  %v144_v40 = vld [vmem:[#allocation5 + $0xe0] sm:$0xff]  ;;  %v8986_v42 = vcombine.low %v120_v31, %v128_v32 }
  0x86   :  { %v9001_v33 = vcombine.high %v135_v27, %v143_v28  ;;  %v9000_v38 = vcombine.low %v135_v27, %v143_v28  ;;  %v8989_v41 = vcombine.high %v121_v35, %v129_v36  ;;  %v137_v43 = vld [vmem:[#allocation5 + $0xa8] sm:$0xff]  ;;  %v9003_v45 = vcombine.high %v136_v39, %v144_v40  ;;  %v122_v47 = vld [vmem:[#allocation5 + $0x30] sm:$0xff]  ;;  %v123_v51 = vld [vmem:[#allocation5 + $0x38] sm:$0xff]  ;;  %p10561_p4 = pnand %p10560_p3, %p10554_p0 }
  0x87   :  { %399 = vmatpush1.bf16.msra.mxu0 %v8994_v17  ;;  %440 = vmatpush1.bf16.msra.mxu1 %v8996_v21  ;;  %v145_v44 = vld [vmem:[#allocation5 + $0xe8] sm:$0xff]  ;;  %v8988_v46 = vcombine.low %v121_v35, %v129_v36  ;;  %v130_v48 = vld [vmem:[#allocation5 + $0x70] sm:$0xff]  ;;  %v9002_v50 = vcombine.low %v136_v39, %v144_v40  ;;  %v131_v52 = vld [vmem:[#allocation5 + $0x78] sm:$0xff] }
  0x88   :  { %478 = vmatprep.subr.bf16.mxu0 %v8983_v20  ;;  %519 = vmatprep.subr.bf16.mxu1 %v8985_v24  ;;  %v9005_v49 = vcombine.high %v137_v43, %v145_v44  ;;  %v8991_v53 = vcombine.high %v122_v47, %v130_v48  ;;  %v9004_v54 = vcombine.low %v137_v43, %v145_v44  ;;  %v138_v55 = vld [vmem:[#allocation5 + $0xb0] sm:$0xff]  ;;  %v139_v59 = vld [vmem:[#allocation5 + $0xb8] sm:$0xff] }
  0x89   :  { %v146_v56 = vld [vmem:[#allocation5 + $0xf0] sm:$0xff]  ;;  %v8993_v57 = vcombine.high %v123_v51, %v131_v52  ;;  %v8990_v58 = vcombine.low %v122_v47, %v130_v48  ;;  %v147_v60 = vld [vmem:[#allocation5 + $0xf8] sm:$0xff]  ;;  %v8992_v62 = vcombine.low %v123_v51, %v131_v52 }
  0x8a   :  { %9010 = vmatmul.mubr.msk.bf16.vlgmr.msra.gmra.mrb[0].mxu0 %vm392_vm0, %v10728_v25  ;;  %9011 = vmatmul.mubr.msk.bf16.vlgmr.msra.gmra.mrb[0].mxu1 %vm392_vm0, %v10728_v25  ;;  %v9007_v61 = vcombine.high %v138_v55, %v146_v56  ;;  %v756_v63 = vld [vmem:[#allocation8] sm:$0xff]  ;;  %v9009_v2 = vcombine.high %v139_v59, %v147_v60  ;;  %v9006_v3 = vcombine.low %v138_v55, %v146_v56  ;;  %v757_v4 = vld [vmem:[#allocation8 + $0x8] sm:$0xff] }
  0x8b   :  { %479 = vmatpush1.bf16.msra.mxu0 %v8982_v26  ;;  %510 = vmatprep.mubr.bf16.mxu0 %v10597_v0  ;;  %v760_v1 = vld [vmem:[#allocation8 + $0x20] sm:$0xff]  ;;  %v761_v5 = vld [vmem:[#allocation8 + $0x28] sm:$0xff]  ;;  %v9008_v9 = vcombine.low %v139_v59, %v147_v60 }
  0x8c   :  { %480 = vmatprep.subr.bf16.mxu0 %v8999_v29  ;;  %520 = vmatpush1.bf16.msra.mxu1 %v8984_v30  ;;  %v9019_v6 = vcombine.high %v756_v63, %v760_v1  ;;  %v764_v7 = vld [vmem:[#allocation8 + $0x40] sm:$0xff]  ;;  %v765_v10 = vld [vmem:[#allocation8 + $0x48] sm:$0xff]  ;;  %v9021_v12 = vcombine.high %v757_v4, %v761_v5  ;;  %v9018_v13 = vcombine.low %v756_v63, %v760_v1 }
  0x8d   :  { %551 = vmatprep.mubr.bf16.mxu1 %v10597_v0  ;;  %521 = vmatprep.subr.bf16.mxu1 %v9001_v33  ;;  %v768_v8 = vld [vmem:[#allocation8 + $0x60] sm:$0xff]  ;;  %v769_v11 = vld [vmem:[#allocation8 + $0x68] sm:$0xff]  ;;  %v9020_v17 = vcombine.low %v757_v4, %v761_v5 }
  0x8e   :  { %v772_v14 = vld [vmem:[#allocation8 + $0x80] sm:$0xff]  ;;  %v9027_v16 = vcombine.high %v764_v7, %v768_v8  ;;  %v773_v18 = vld [vmem:[#allocation8 + $0x88] sm:$0xff]  ;;  %v9029_v20 = vcombine.high %v765_v10, %v769_v11  ;;  %v9028_v24 = vcombine.low %v765_v10, %v769_v11 }
  0x8f   :  { %481 = vmatpush1.bf16.msra.mxu0 %v8998_v34  ;;  %v776_v15 = vld [vmem:[#allocation8 + $0xa0] sm:$0xff]  ;;  %v777_v19 = vld [vmem:[#allocation8 + $0xa8] sm:$0xff] }
  0x90   :  { %560 = vmatprep.subr.bf16.mxu0 %v8987_v37  ;;  %522 = vmatpush1.bf16.msra.mxu1 %v9000_v38  ;;  %v780_v21 = vld [vmem:[#allocation8 + $0xc0] sm:$0xff]  ;;  %v9035_v23 = vcombine.high %v772_v14, %v776_v15  ;;  %v781_v26 = vld [vmem:[#allocation8 + $0xc8] sm:$0xff]  ;;  %v9037_v28 = vcombine.high %v773_v18, %v777_v19  ;;  %v9034_v29 = vcombine.low %v772_v14, %v776_v15 }
  0x91   :  { %601 = vmatprep.subr.bf16.mxu1 %v8989_v41  ;;  %v784_v22 = vld [vmem:[#allocation8 + $0xe0] sm:$0xff]  ;;  %v785_v27 = vld [vmem:[#allocation8 + $0xe8] sm:$0xff]  ;;  %v9036_v33 = vcombine.low %v773_v18, %v777_v19 }
  0x92   :  { %9012 = vmatmul.mubr.msk.bf16.vlgmr.msra.gmra.mrb[4].mxu0 %vm392_vm0, %v10728_v25  ;;  %v788_v30 = vld [vmem:[#allocation8 + $0x100] sm:$0xff]  ;;  %v9043_v32 = vcombine.high %v780_v21, %v784_v22  ;;  %v789_v34 = vld [vmem:[#allocation8 + $0x108] sm:$0xff]  ;;  %v9042_v36 = vcombine.low %v780_v21, %v784_v22  ;;  %v9044_v40 = vcombine.low %v781_v26, %v785_v27 }
  0x93   :  { %561 = vmatpush1.bf16.msra.mxu0 %v8986_v42  ;;  %592 = vmatprep.mubr.bf16.mxu0 %v10597_v0  ;;  %v792_v31 = vld [vmem:[#allocation8 + $0x120] sm:$0xff]  ;;  %v793_v35 = vld [vmem:[#allocation8 + $0x128] sm:$0xff] }
  0x94   :  { %9013 = vmatmul.mubr.msk.bf16.vlgmr.msra.gmra.mrb[4].mxu1 %vm392_vm0, %v10728_v25  ;;  %562 = vmatprep.subr.bf16.mxu0 %v9003_v45  ;;  %v796_v37 = vld [vmem:[#allocation8 + $0x140] sm:$0xff]  ;;  %v9051_v39 = vcombine.high %v788_v30, %v792_v31  ;;  %v797_v41 = vld [vmem:[#allocation8 + $0x148] sm:$0xff]  ;;  %v9053_v43 = vcombine.high %v789_v34, %v793_v35  ;;  %v9050_v44 = vcombine.low %v788_v30, %v792_v31 }
  0x95   :  { %602 = vmatpush1.bf16.msra.mxu1 %v8988_v46  ;;  %633 = vmatprep.mubr.bf16.mxu1 %v10597_v0  ;;  %v800_v38 = vld [vmem:[#allocation8 + $0x160] sm:$0xff]  ;;  %v801_v42 = vld [vmem:[#allocation8 + $0x168] sm:$0xff]  ;;  %v9052_v48 = vcombine.low %v789_v34, %v793_v35 }
  0x96   :  { %603 = vmatprep.subr.bf16.mxu1 %v9005_v49  ;;  %v804_v45 = vld [vmem:[#allocation8 + $0x180] sm:$0xff]  ;;  %v9059_v47 = vcombine.high %v796_v37, %v800_v38  ;;  %v805_v49 = vld [vmem:[#allocation8 + $0x188] sm:$0xff]  ;;  %v9061_v51 = vcombine.high %v797_v41, %v801_v42  ;;  %v9058_v52 = vcombine.low %v796_v37, %v800_v38  ;;  %v9060_v56 = vcombine.low %v797_v41, %v801_v42 }
  0x97   :  { %563 = vmatpush1.bf16.msra.mxu0 %v9002_v50  ;;  %v808_v46 = vld [vmem:[#allocation8 + $0x1a0] sm:$0xff]  ;;  %v809_v50 = vld [vmem:[#allocation8 + $0x1a8] sm:$0xff] }
  0x98   :  { %642 = vmatprep.subr.bf16.mxu0 %v8991_v53  ;;  %v812_v53 = vld [vmem:[#allocation8 + $0x1c0] sm:$0xff]  ;;  %v9067_v55 = vcombine.high %v804_v45, %v808_v46  ;;  %v9069_v59 = vcombine.high %v805_v49, %v809_v50  ;;  %v9066_v60 = vcombine.low %v804_v45, %v808_v46  ;;  %v9068_v1 = vcombine.low %v805_v49, %v809_v50  ;;  %v829_v10 = vld [vmem:[#allocation8 + $0x248] sm:$0xff] }
  0x99   :  { %604 = vmatpush1.bf16.msra.mxu1 %v9004_v54  ;;  %v816_v54 = vld [vmem:[#allocation8 + $0x1e0] sm:$0xff]  ;;  %v833_v11 = vld [vmem:[#allocation8 + $0x268] sm:$0xff] }
  0x9a   :  { %9014 = vmatmul.mubr.msk.bf16.vlgmr.msra.gmra.mrb[8].mxu0 %vm392_vm0, %v10728_v25  ;;  %683 = vmatprep.subr.bf16.mxu1 %v8993_v57  ;;  %v813_v57 = vld [vmem:[#allocation8 + $0x1c8] sm:$0xff]  ;;  %v9075_v63 = vcombine.high %v812_v53, %v816_v54  ;;  %v9074_v5 = vcombine.low %v812_v53, %v816_v54  ;;  %v836_v14 = vld [vmem:[#allocation8 + $0x280] sm:$0xff] }
  0x9b   :  { %643 = vmatpush1.bf16.msra.mxu0 %v8990_v58  ;;  %674 = vmatprep.mubr.bf16.mxu0 %v10597_v0  ;;  %v817_v58 = vld [vmem:[#allocation8 + $0x1e8] sm:$0xff]  ;;  %v840_v15 = vld [vmem:[#allocation8 + $0x2a0] sm:$0xff] }
  0x9c   :  { %9015 = vmatmul.mubr.msk.bf16.vlgmr.msra.gmra.mrb[8].mxu1 %vm392_vm0, %v10728_v25  ;;  %644 = vmatprep.subr.bf16.mxu0 %v9007_v61  ;;  %v820_v61 = vld [vmem:[#allocation8 + $0x200] sm:$0xff]  ;;  %v9077_v4 = vcombine.high %v813_v57, %v817_v58  ;;  %v837_v18 = vld [vmem:[#allocation8 + $0x288] sm:$0xff] }
  0x9d   :  { %684 = vmatpush1.bf16.msra.mxu1 %v8992_v62  ;;  %715 = vmatprep.mubr.bf16.mxu1 %v10597_v0  ;;  %v9026_v0 = vcombine.low %v764_v7, %v768_v8  ;;  %v824_v62 = vld [vmem:[#allocation8 + $0x220] sm:$0xff]  ;;  %v841_v19 = vld [vmem:[#allocation8 + $0x2a8] sm:$0xff] }
  0x9e   :  { %685 = vmatprep.subr.bf16.mxu1 %v9009_v2  ;;  %v821_v2 = vld [vmem:[#allocation8 + $0x208] sm:$0xff]  ;;  %v832_v7 = vld [vmem:[#allocation8 + $0x260] sm:$0xff]  ;;  %v9083_v8 = vcombine.high %v820_v61, %v824_v62  ;;  %v9100_v31 = vcombine.low %v837_v18, %v841_v19 }
  0x9f   :  { %645 = vmatpush1.bf16.msra.mxu0 %v9006_v3  ;;  %v825_v3 = vld [vmem:[#allocation8 + $0x228] sm:$0xff]  ;;  %v844_v21 = vld [vmem:[#allocation8 + $0x2c0] sm:$0xff] }
  0xa0   :  { %6942 = vmatprep.subr.bf16.mxu0 %v9019_v6  ;;  %v828_v6 = vld [vmem:[#allocation8 + $0x240] sm:$0xff]  ;;  %v873_v54 = vld [vmem:[#allocation8 + $0x3a8] sm:$0xff] }
  0xa1   :  { %686 = vmatpush1.bf16.msra.mxu1 %v9008_v9  ;;  %v9076_v9 = vcombine.low %v813_v57, %v817_v58  ;;  %v848_v22 = vld [vmem:[#allocation8 + $0x2e0] sm:$0xff] }
  0xa2   :  { %9016 = vmatmul.mubr.msk.bf16.vlgmr.msra.gmra.mrb[12].mxu0 %vm392_vm0, %v10728_v25  ;;  %7270 = vmatprep.subr.bf16.mxu1 %v9021_v12  ;;  %v9085_v12 = vcombine.high %v821_v2, %v825_v3  ;;  %v9107_v30 = vcombine.high %v844_v21, %v848_v22  ;;  %v9106_v35 = vcombine.low %v844_v21, %v848_v22  ;;  %v868_v50 = vld [vmem:[#allocation8 + $0x380] sm:$0xff] }
  0xa3   :  { %6943 = vmatpush1.bf16.msra.mxu0 %v9018_v13  ;;  %v9082_v13 = vcombine.low %v820_v61, %v824_v62  ;;  %v876_v58 = vld [vmem:[#allocation8 + $0x3c0] sm:$0xff]  ;;  %v881_v62 = vld [vmem:[#allocation8 + $0x3e8] sm:$0xff] }
  0xa4   :  { %9017 = vmatmul.mubr.msk.bf16.vlgmr.msra.gmra.mrb[12].mxu1 %vm392_vm0, %v10728_v25  ;;  %6944 = vmatprep.subr.bf16.mxu0 %v9027_v16  ;;  %v9045_v25 = vcombine.high %v781_v26, %v785_v27  ;;  %v9091_v16 = vcombine.high %v828_v6, %v832_v7  ;;  %v845_v26 = vld [vmem:[#allocation8 + $0x2c8] sm:$0xff]  ;;  %v9101_v27 = vcombine.high %v837_v18, %v841_v19 }
  0xa5   :  { %7271 = vmatpush1.bf16.msra.mxu1 %v9020_v17  ;;  %v9084_v17 = vcombine.low %v821_v2, %v825_v3  ;;  %v884_v3 = vld [vmem:[#allocation8 + $0x400] sm:$0xff] }
  0xa6   :  { %7272 = vmatprep.subr.bf16.mxu1 %v9029_v20  ;;  %v9093_v20 = vcombine.high %v829_v10, %v833_v11 }
  0xa7   :  { %6945 = vmatpush1.bf16.msra.mxu0 %v9026_v0  ;;  %v9090_v0 = vcombine.low %v828_v6, %v832_v7  ;;  %v889_v7 = vld [vmem:[#allocation8 + $0x428] sm:$0xff] }
  0xa8   :  { %6946 = vmatprep.subr.bf16.mxu0 %v9035_v23  ;;  %v9099_v23 = vcombine.high %v836_v14, %v840_v15 }
  0xa9   :  { %7273 = vmatpush1.bf16.msra.mxu1 %v9028_v24  ;;  %v9092_v24 = vcombine.low %v829_v10, %v833_v11  ;;  %v152_v11 = vlaneseq }
  0xaa   :  { %7274 = vmatprep.subr.bf16.mxu1 %v9037_v28  ;;  %v9098_v28 = vcombine.low %v836_v14, %v840_v15  ;;  %v10757_v14 = vld [vmem:[#allocation7] sm:$0xff] }
  0xab   :  { %6947 = vmatpush1.bf16.msra.mxu0 %v9034_v29  ;;  %v849_v29 = vld [vmem:[#allocation8 + $0x2e8] sm:$0xff] }
  0xac   :  { %6948 = vmatprep.subr.bf16.mxu0 %v9043_v32  ;;  %v852_v32 = vld [vmem:[#allocation8 + $0x300] sm:$0xff]  ;;  %v9109_v34 = vcombine.high %v845_v26, %v849_v29  ;;  %v9108_v38 = vcombine.low %v845_v26, %v849_v29 }
  0xad   :  { %7275 = vmatpush1.bf16.msra.mxu1 %v9036_v33  ;;  %v856_v33 = vld [vmem:[#allocation8 + $0x320] sm:$0xff] }
  0xae   :  { %7276 = vmatprep.subr.bf16.mxu1 %v9045_v25  ;;  %v853_v25 = vld [vmem:[#allocation8 + $0x308] sm:$0xff]  ;;  %v9115_v37 = vcombine.high %v852_v32, %v856_v33  ;;  %v9114_v42 = vcombine.low %v852_v32, %v856_v33 }
  0xaf   :  { %6949 = vmatpush1.bf16.msra.mxu0 %v9042_v36  ;;  %v857_v36 = vld [vmem:[#allocation8 + $0x328] sm:$0xff] }
  0xb0   :  { %6950 = vmatprep.subr.bf16.mxu0 %v9051_v39  ;;  %v860_v39 = vld [vmem:[#allocation8 + $0x340] sm:$0xff]  ;;  %v9117_v41 = vcombine.high %v853_v25, %v857_v36  ;;  %v9116_v46 = vcombine.low %v853_v25, %v857_v36  ;;  %v893_v32 = vld [vmem:[#allocation8 + $0x448] sm:$0xff] }
  0xb1   :  { %7277 = vmatpush1.bf16.msra.mxu1 %v9044_v40  ;;  %v864_v40 = vld [vmem:[#allocation8 + $0x360] sm:$0xff]  ;;  %v897_v33 = vld [vmem:[#allocation8 + $0x468] sm:$0xff] }
  0xb2   :  { %7278 = vmatprep.subr.bf16.mxu1 %v9053_v43  ;;  %v861_v43 = vld [vmem:[#allocation8 + $0x348] sm:$0xff]  ;;  %v9123_v45 = vcombine.high %v860_v39, %v864_v40 }
  0xb3   :  { %6951 = vmatpush1.bf16.msra.mxu0 %v9050_v44  ;;  %v865_v44 = vld [vmem:[#allocation8 + $0x368] sm:$0xff] }
  0xb4   :  { %6952 = vmatprep.subr.bf16.mxu0 %v9059_v47  ;;  %v9125_v47 = vcombine.high %v861_v43, %v865_v44  ;;  %v9124_v49 = vcombine.low %v861_v43, %v865_v44  ;;  %v901_v43 = vld [vmem:[#allocation8 + $0x488] sm:$0xff] }
  0xb5   :  { %7279 = vmatpush1.bf16.msra.mxu1 %v9052_v48  ;;  %v9122_v48 = vcombine.low %v860_v39, %v864_v40  ;;  %v9157_v40 = vcombine.high %v893_v32, %v897_v33  ;;  %v905_v44 = vld [vmem:[#allocation8 + $0x4a8] sm:$0xff] }
  0xb6   :  { %7280 = vmatprep.subr.bf16.mxu1 %v9061_v51  ;;  %v872_v51 = vld [vmem:[#allocation8 + $0x3a0] sm:$0xff] }
  0xb7   :  { %6953 = vmatpush1.bf16.msra.mxu0 %v9058_v52  ;;  %v869_v52 = vld [vmem:[#allocation8 + $0x388] sm:$0xff]  ;;  %v9131_v53 = vcombine.high %v868_v50, %v872_v51 }
  0xb8   :  { %6954 = vmatprep.subr.bf16.mxu0 %v9067_v55  ;;  %v9130_v55 = vcombine.low %v868_v50, %v872_v51  ;;  %v9133_v57 = vcombine.high %v869_v52, %v873_v54 }
  0xb9   :  { %7281 = vmatpush1.bf16.msra.mxu1 %v9060_v56  ;;  %v9132_v56 = vcombine.low %v869_v52, %v873_v54  ;;  %v908_v54 = vld [vmem:[#allocation8 + $0x4c0] sm:$0xff] }
  0xba   :  { %7282 = vmatprep.subr.bf16.mxu1 %v9069_v59  ;;  %v880_v59 = vld [vmem:[#allocation8 + $0x3e0] sm:$0xff] }
  0xbb   :  { %6955 = vmatpush1.bf16.msra.mxu0 %v9066_v60  ;;  %v877_v60 = vld [vmem:[#allocation8 + $0x3c8] sm:$0xff]  ;;  %v9139_v61 = vcombine.high %v876_v58, %v880_v59 }
  0xbc   :  { %6956 = vmatprep.subr.bf16.mxu0 %v9075_v63  ;;  %v9138_v63 = vcombine.low %v876_v58, %v880_v59  ;;  %v9141_v2 = vcombine.high %v877_v60, %v881_v62  ;;  %v909_v58 = vld [vmem:[#allocation8 + $0x4c8] sm:$0xff] }
  0xbd   :  { %7283 = vmatpush1.bf16.msra.mxu1 %v9068_v1  ;;  %v9140_v1 = vcombine.low %v877_v60, %v881_v62  ;;  %v913_v59 = vld [vmem:[#allocation8 + $0x4e8] sm:$0xff] }
  0xbe   :  { %7284 = vmatprep.subr.bf16.mxu1 %v9077_v4  ;;  %v888_v4 = vld [vmem:[#allocation8 + $0x420] sm:$0xff] }
  0xbf   :  { %6957 = vmatpush1.bf16.msra.mxu0 %v9074_v5  ;;  %v885_v5 = vld [vmem:[#allocation8 + $0x408] sm:$0xff]  ;;  %v9147_v6 = vcombine.high %v884_v3, %v888_v4 }
  0xc0   :  { %6958 = vmatprep.subr.bf16.mxu0 %v9083_v8  ;;  %v9146_v8 = vcombine.low %v884_v3, %v888_v4  ;;  %v9149_v10 = vcombine.high %v885_v5, %v889_v7  ;;  %v916_v3 = vld [vmem:[#allocation8 + $0x500] sm:$0xff] }
  0xc1   :  { %7285 = vmatpush1.bf16.msra.mxu1 %v9076_v9  ;;  %v9148_v9 = vcombine.low %v885_v5, %v889_v7  ;;  %v920_v4 = vld [vmem:[#allocation8 + $0x520] sm:$0xff]  ;;  %v917_v5 = vld [vmem:[#allocation8 + $0x508] sm:$0xff] }
  0xc2   :  { %7286 = vmatprep.subr.bf16.mxu1 %v9085_v12  ;;  %v10752_v12 = vshrl.u32 %v152_v11, 7  ;;  %v9179_v11 = vcombine.high %v916_v3, %v920_v4 }
  0xc3   :  { %6959 = vmatpush1.bf16.msra.mxu0 %v9082_v13 }
  0xc4   :  { %6960 = vmatprep.subr.bf16.mxu0 %v9091_v16  ;;  %v10755_v13 = vsub.s32 0, %v10752_v12  ;;  %v10760_v15 = vsub.s32 1, %v10752_v12  ;;  %v10763_v16 = vsub.s32 3, %v10752_v12 }
  0xc5   :  { %7287 = vmatpush1.bf16.msra.mxu1 %v9084_v17 }
  0xc6   :  { %7288 = vmatprep.subr.bf16.mxu1 %v9093_v20  ;;  %v155_v17 = vrot.slane %v10757_v14, %v10755_v13  ;;  %v159_v18 = vrot.slane %v10757_v14, %v10760_v15  ;;  %v167_v20 = vrot.slane %v10757_v14, %v10763_v16 }
  0xc7   :  { %6961 = vmatpush1.bf16.msra.mxu0 %v9090_v0 }
  0xc8   :  { %6962 = vmatprep.subr.bf16.mxu0 %v9099_v23 }
  0xc9   :  { %7289 = vmatpush1.bf16.msra.mxu1 %v9092_v24 }
  0xca   :  { %7290 = vmatprep.subr.bf16.mxu1 %v9101_v27 }
  0xcb   :  { %6963 = vmatpush1.bf16.msra.mxu0 %v9098_v28  ;;  %v892_v28 = vld [vmem:[#allocation8 + $0x440] sm:$0xff] }
  0xcc   :  { %6964 = vmatprep.subr.bf16.mxu0 %v9107_v30 }
  0xcd   :  { %7291 = vmatpush1.bf16.msra.mxu1 %v9100_v31  ;;  %v896_v31 = vld [vmem:[#allocation8 + $0x460] sm:$0xff] }
  0xce   :  { %7292 = vmatprep.subr.bf16.mxu1 %v9109_v34  ;;  %v9155_v39 = vcombine.high %v892_v28, %v896_v31 }
  0xcf   :  { %6965 = vmatpush1.bf16.msra.mxu0 %v9106_v35 }
  0xd0   :  { %6966 = vmatprep.subr.bf16.mxu0 %v9115_v37 }
  0xd1   :  { %7293 = vmatpush1.bf16.msra.mxu1 %v9108_v38 }
  0xd2   :  { %7294 = vmatprep.subr.bf16.mxu1 %v9117_v41  ;;  %v900_v41 = vld [vmem:[#allocation8 + $0x480] sm:$0xff] }
  0xd3   :  { %6967 = vmatpush1.bf16.msra.mxu0 %v9114_v42  ;;  %v904_v42 = vld [vmem:[#allocation8 + $0x4a0] sm:$0xff] }
  0xd4   :  { %6968 = vmatprep.subr.bf16.mxu0 %v9123_v45  ;;  %v9163_v52 = vcombine.high %v900_v41, %v904_v42  ;;  %v9162_v62 = vcombine.low %v900_v41, %v904_v42  ;;  %v936_v41 = vld [vmem:[#allocation8 + $0x5a0] sm:$0xff]  ;;  %v10807_v42 = vsub.s32 4, %v10752_v12 }
  0xd5   :  { %7295 = vmatpush1.bf16.msra.mxu1 %v9116_v46 }
  0xd6   :  { %7296 = vmatprep.subr.bf16.mxu1 %v9125_v47 }
  0xd7   :  { %6969 = vmatpush1.bf16.msra.mxu0 %v9122_v48  ;;  %v9154_v48 = vcombine.low %v892_v28, %v896_v31  ;;  %v925_v28 = vld [vmem:[#allocation8 + $0x548] sm:$0xff] }
  0xd8   :  { %6970 = vmatprep.subr.bf16.mxu0 %v9131_v53  ;;  %v9165_v53 = vcombine.high %v901_v43, %v905_v44 }
  0xd9   :  { %7297 = vmatpush1.bf16.msra.mxu1 %v9124_v49  ;;  %v9156_v49 = vcombine.low %v893_v32, %v897_v33 }
  0xda   :  { %7298 = vmatprep.subr.bf16.mxu1 %v9133_v57  ;;  %v912_v57 = vld [vmem:[#allocation8 + $0x4e0] sm:$0xff] }
  0xdb   :  { %6971 = vmatpush1.bf16.msra.mxu0 %v9130_v55 }
  0xdc   :  { %6972 = vmatprep.subr.bf16.mxu0 %v9139_v61 }
  0xdd   :  { %7299 = vmatpush1.bf16.msra.mxu1 %v9132_v56 }
  0xde   :  { %7300 = vmatprep.subr.bf16.mxu1 %v9141_v2  ;;  %v9173_v2 = vcombine.high %v909_v58, %v913_v59 }
  0xdf   :  { %6973 = vmatpush1.bf16.msra.mxu0 %v9138_v63  ;;  %v9164_v63 = vcombine.low %v901_v43, %v905_v44  ;;  %v933_v43 = vld [vmem:[#allocation8 + $0x588] sm:$0xff] }
  0xe0   :  { %6983 = vmatprep.subr.bf16.mxu0 %v9147_v6  ;;  %v921_v6 = vld [vmem:[#allocation8 + $0x528] sm:$0xff] }
  0xe1   :  { %7301 = vmatpush1.bf16.msra.mxu1 %v9140_v1  ;;  %v9171_v1 = vcombine.high %v908_v54, %v912_v57  ;;  %v937_v44 = vld [vmem:[#allocation8 + $0x5a8] sm:$0xff] }
  0xe2   :  { %7311 = vmatprep.subr.bf16.mxu1 %v9149_v10  ;;  %v9172_v10 = vcombine.low %v909_v58, %v913_v59 }
 0x15d   :  { %v430_v19 = vpop.f32.mrb[0].mxu0  ;;  %v10771_v24 = vpop.f32.mrb[0].mxu1 }
 0x15e   :  { %v431_v0 = vadd.f32 %v430_v19, %v155_v17  ;;  %v432_v21 = vpop.f32.mrb[1].mxu0  ;;  %v473_v29 = vpop.f32.mrb[1].mxu1  ;;  %v149_v17 = vld [vmem:[#allocation7 + $0x8] sm:$0xff] }
 0x15f   :  { %v433_v22 = vadd.f32 %v432_v21, %v159_v18  ;;  %v434_v23 = vpop.f32.mrb[2].mxu0  ;;  %v474_v34 = vadd.f32 %v473_v29, %v167_v20  ;;  %v475_v35 = vpop.f32.mrb[2].mxu1  ;;  %v9181_v20 = vcombine.high %v917_v5, %v921_v6  ;;  %v929_v29 = vld [vmem:[#allocation8 + $0x568] sm:$0xff] }
 0x160   :  { %v724_v26 = vmax.f32 %v431_v0, 0.0  ;;  %v435_v27 = vpop.f32.mrb[3].mxu0  ;;  %v476_v25 = vpop.f32.mrb[3].mxu1  ;;  %v924_v0 = vld [vmem:[#allocation8 + $0x540] sm:$0xff]  ;;  %v199_v23 = vrot.slane %v149_v17, %v10763_v16  ;;  %v9178_v35 = vcombine.low %v916_v3, %v920_v4 }
 0x161   :  { %v725_v30 = vmax.f32 %v433_v22, 0.0  ;;  %v727_v37 = vmax.f32 %v474_v34, 0.0  ;;  %v928_v27 = vld [vmem:[#allocation8 + $0x560] sm:$0xff]  ;;  %v9180_v25 = vcombine.low %v917_v5, %v921_v6  ;;  %v941_v5 = vld [vmem:[#allocation8 + $0x5c8] sm:$0xff] }
 0x162   :  { %v10775_v38 = vpack.c.bf16 %v724_v26, %v724_v26  ;;  %v944_v4 = vld [vmem:[#allocation8 + $0x5e0] sm:$0xff]  ;;  %v945_v6 = vld [vmem:[#allocation8 + $0x5e8] sm:$0xff] }
 0x163   :  { %v10773_v36 = vpack.c.bf16 %v725_v30, %v725_v30  ;;  %v10779_v45 = vpack.c.bf16 %v727_v37, %v727_v37  ;;  %v9187_v37 = vcombine.high %v924_v0, %v928_v27 }
 0x165   :  { %6974 = vmatprep.mubr.bf16.mxu0 %v10773_v36  ;;  %7302 = vmatprep.mubr.bf16.mxu1 %v10773_v36  ;;  %v10781_v46 = vpop.f32.mrb[4].mxu0 }
 0x166   :  { %6975 = vmatmul.mubr.bf16.vlgmr.msra.gmra.mrb[16].mxu0 %v10775_v38  ;;  %7303 = vmatmul.mubr.bf16.vlgmr.msra.gmra.mrb[16].mxu1 %v10775_v38  ;;  %v10785_v47 = vpop.f32.mrb[5].mxu0 }
 0x167   :  { %6984 = vmatpush1.bf16.msra.mxu0 %v9146_v8  ;;  %7312 = vmatpush1.bf16.msra.mxu1 %v9148_v9  ;;  %v516_v50 = vpop.f32.mrb[6].mxu0  ;;  %v10787_v51 = vpop.f32.mrb[4].mxu1  ;;  %v10796_v8 = vsub.s32 2, %v10752_v12  ;;  %v9170_v9 = vcombine.low %v908_v54, %v912_v57  ;;  %v9188_v54 = vcombine.low %v925_v28, %v929_v29 }
 0x168   :  { %6985 = vmatprep.subr.bf16.mxu0 %v9155_v39  ;;  %7313 = vmatprep.subr.bf16.mxu1 %v9157_v40  ;;  %v517_v55 = vpop.f32.mrb[7].mxu0  ;;  %v10789_v56 = vpop.f32.mrb[5].mxu1  ;;  %v9189_v39 = vcombine.high %v925_v28, %v929_v29  ;;  %v932_v40 = vld [vmem:[#allocation8 + $0x580] sm:$0xff]  ;;  %v10816_v50 = vsub.s32 7, %v10752_v12  ;;  %v949_v28 = vld [vmem:[#allocation8 + $0x608] sm:$0xff] }
 0x169   :  { %7015 = vmatprep.mubr.bf16.mxu0 %v10779_v45  ;;  %7343 = vmatprep.mubr.bf16.mxu1 %v10779_v45  ;;  %v557_v60 = vpop.f32.mrb[6].mxu1  ;;  %v195_v22 = vrot.slane %v149_v17, %v10796_v8  ;;  %v203_v55 = vrot.slane %v149_v17, %v10807_v42  ;;  %v953_v29 = vld [vmem:[#allocation8 + $0x628] sm:$0xff] }
 0x16a   :  { %v558_v61 = vpop.f32.mrb[7].mxu1 }
 0x16b   :  { %6986 = vmatpush1.bf16.msra.mxu0 %v9154_v48  ;;  %7314 = vmatpush1.bf16.msra.mxu1 %v9156_v49  ;;  %v10810_v48 = vsub.s32 5, %v10752_v12  ;;  %v10813_v49 = vsub.s32 6, %v10752_v12  ;;  %v215_v61 = vrot.slane %v149_v17, %v10816_v50  ;;  %v9197_v12 = vcombine.high %v933_v43, %v937_v44 }
 0x16c   :  { %6987 = vmatprep.subr.bf16.mxu0 %v9163_v52  ;;  %7315 = vmatprep.subr.bf16.mxu1 %v9165_v53  ;;  %v9186_v53 = vcombine.low %v924_v0, %v928_v27  ;;  %v9194_v0 = vcombine.low %v932_v40, %v936_v41  ;;  %v952_v27 = vld [vmem:[#allocation8 + $0x620] sm:$0xff] }
 0x16d   :  { %v10793_v7 = vpop.f32.mrb[8].mxu0  ;;  %v207_v57 = vrot.slane %v149_v17, %v10810_v48  ;;  %v211_v59 = vrot.slane %v149_v17, %v10813_v49 }
 0x16e   :  { %v10798_v18 = vpop.f32.mrb[9].mxu0 }
 0x16f   :  { %6988 = vmatpush1.bf16.msra.mxu0 %v9162_v62  ;;  %7316 = vmatpush1.bf16.msra.mxu1 %v9164_v63  ;;  %v635_v19 = vpop.f32.mrb[8].mxu1  ;;  %v598_v21 = vpop.f32.mrb[10].mxu0  ;;  %v9195_v62 = vcombine.high %v932_v40, %v936_v41  ;;  %v940_v63 = vld [vmem:[#allocation8 + $0x5c0] sm:$0xff]  ;;  %v961_v40 = vld [vmem:[#allocation8 + $0x668] sm:$0xff] }
 0x170   :  { %6989 = vmatprep.subr.bf16.mxu0 %v9171_v1  ;;  %7317 = vmatprep.subr.bf16.mxu1 %v9173_v2  ;;  %v637_v26 = vpop.f32.mrb[9].mxu1  ;;  %v599_v30 = vpop.f32.mrb[11].mxu0  ;;  %v10802_v32 = vadd.f32 %v635_v19, %v195_v22  ;;  %v9196_v21 = vcombine.low %v933_v43, %v937_v44  ;;  %v9203_v22 = vcombine.high %v940_v63, %v944_v4 }
 0x171   :  { %v639_v31 = vpop.f32.mrb[10].mxu1  ;;  %v10804_v33 = vadd.f32 %v637_v26, %v199_v23  ;;  %v9205_v23 = vcombine.high %v941_v5, %v945_v6  ;;  %v948_v26 = vld [vmem:[#allocation8 + $0x600] sm:$0xff]  ;;  %v9202_v30 = vcombine.low %v940_v63, %v944_v4  ;;  %v9212_v43 = vcombine.low %v949_v28, %v953_v29  ;;  %v973_v63 = vld [vmem:[#allocation8 + $0x6c8] sm:$0xff] }
 0x172   :  { %v640_v34 = vpop.f32.mrb[11].mxu1  ;;  %v9204_v31 = vcombine.low %v941_v5, %v945_v6  ;;  %v9210_v41 = vcombine.low %v948_v26, %v952_v27 }
 0x173   :  { %6990 = vmatpush1.bf16.msra.mxu0 %v9170_v9  ;;  %7318 = vmatpush1.bf16.msra.mxu1 %v9172_v10  ;;  %v9211_v34 = vcombine.high %v948_v26, %v952_v27  ;;  %v988_v27 = vld [vmem:[#allocation8 + $0x740] sm:$0xff] }
 0x174   :  { %6991 = vmatprep.subr.bf16.mxu0 %v9179_v11  ;;  %7319 = vmatprep.subr.bf16.mxu1 %v9181_v20 }
 0x175   :  { %v676_v52 = vpop.f32.mrb[12].mxu0 }
 0x176   :  { %v678_v58 = vpop.f32.mrb[13].mxu0  ;;  %v10822_v1 = vadd.f32 %v676_v52, %v203_v55  ;;  %v965_v55 = vld [vmem:[#allocation8 + $0x688] sm:$0xff] }
 0x177   :  { %6992 = vmatpush1.bf16.msra.mxu0 %v9178_v35  ;;  %7320 = vmatpush1.bf16.msra.mxu1 %v9180_v25  ;;  %v717_v60 = vpop.f32.mrb[12].mxu1  ;;  %v680_v2 = vpop.f32.mrb[14].mxu0  ;;  %v10824_v9 = vadd.f32 %v678_v58, %v207_v57  ;;  %v9213_v35 = vcombine.high %v949_v28, %v953_v29  ;;  %v956_v25 = vld [vmem:[#allocation8 + $0x640] sm:$0xff]  ;;  %v969_v57 = vld [vmem:[#allocation8 + $0x6a8] sm:$0xff] }
 0x178   :  { %6993 = vmatprep.subr.bf16.mxu0 %v9187_v37  ;;  %7321 = vmatprep.subr.bf16.mxu1 %v9189_v39  ;;  %v719_v3 = vpop.f32.mrb[13].mxu1  ;;  %v10826_v10 = vadd.f32 %v717_v60, %v211_v59  ;;  %v681_v11 = vpop.f32.mrb[15].mxu0  ;;  %v960_v37 = vld [vmem:[#allocation8 + $0x660] sm:$0xff]  ;;  %v957_v39 = vld [vmem:[#allocation8 + $0x648] sm:$0xff]  ;;  %v9228_v4 = vcombine.low %v965_v55, %v969_v57 }
 0x179   :  { %v10828_v19 = vadd.f32 %v719_v3, %v215_v61  ;;  %v721_v17 = vpop.f32.mrb[14].mxu1  ;;  %v9219_v44 = vcombine.high %v956_v25, %v960_v37  ;;  %v9221_v52 = vcombine.high %v957_v39, %v961_v40  ;;  %v9218_v58 = vcombine.low %v956_v25, %v960_v37  ;;  %v977_v2 = vld [vmem:[#allocation8 + $0x6e8] sm:$0xff]  ;;  %v980_v11 = vld [vmem:[#allocation8 + $0x700] sm:$0xff] }
 0x17a   :  { %v722_v20 = vpop.f32.mrb[15].mxu1  ;;  %v9220_v59 = vcombine.low %v957_v39, %v961_v40  ;;  %v9229_v61 = vcombine.high %v965_v55, %v969_v57  ;;  %v9237_v6 = vcombine.high %v973_v63, %v977_v2  ;;  %v984_v17 = vld [vmem:[#allocation8 + $0x720] sm:$0xff]  ;;  %v989_v29 = vld [vmem:[#allocation8 + $0x748] sm:$0xff] }
 0x17b   :  { %6994 = vmatpush1.bf16.msra.mxu0 %v9186_v53  ;;  %7322 = vmatpush1.bf16.msra.mxu1 %v9188_v54  ;;  %v964_v53 = vld [vmem:[#allocation8 + $0x680] sm:$0xff]  ;;  %v981_v20 = vld [vmem:[#allocation8 + $0x708] sm:$0xff] }
 0x17c   :  { %6995 = vmatprep.subr.bf16.mxu0 %v9195_v62  ;;  %7323 = vmatprep.subr.bf16.mxu1 %v9197_v12  ;;  %v968_v54 = vld [vmem:[#allocation8 + $0x6a0] sm:$0xff]  ;;  %v997_v40 = vld [vmem:[#allocation8 + $0x788] sm:$0xff] }
 0x17d   :  { %v9227_v60 = vcombine.high %v964_v53, %v968_v54  ;;  %v972_v62 = vld [vmem:[#allocation8 + $0x6c0] sm:$0xff]  ;;  %v9226_v3 = vcombine.low %v964_v53, %v968_v54 }
 0x17e   :  { %v976_v12 = vld [vmem:[#allocation8 + $0x6e0] sm:$0xff] }
 0x17f   :  { %6996 = vmatpush1.bf16.msra.mxu0 %v9194_v0  ;;  %7324 = vmatpush1.bf16.msra.mxu1 %v9196_v21  ;;  %v9235_v5 = vcombine.high %v972_v62, %v976_v12  ;;  %v985_v0 = vld [vmem:[#allocation8 + $0x728] sm:$0xff]  ;;  %v9234_v21 = vcombine.low %v972_v62, %v976_v12  ;;  %v992_v28 = vld [vmem:[#allocation8 + $0x760] sm:$0xff] }
 0x180   :  { %6997 = vmatprep.subr.bf16.mxu0 %v9203_v22  ;;  %7325 = vmatprep.subr.bf16.mxu1 %v9205_v23  ;;  %v9236_v22 = vcombine.low %v973_v63, %v977_v2  ;;  %v9243_v23 = vcombine.high %v980_v11, %v984_v17  ;;  %v9245_v26 = vcombine.high %v981_v20, %v985_v0  ;;  %v996_v37 = vld [vmem:[#allocation8 + $0x780] sm:$0xff] }
 0x181   :  { %v1000_v39 = vld [vmem:[#allocation8 + $0x7a0] sm:$0xff] }
 0x182   :  { %v9259_v53 = vcombine.high %v996_v37, %v1000_v39  ;;  %v1004_v55 = vld [vmem:[#allocation8 + $0x7c0] sm:$0xff]  ;;  %v9258_v62 = vcombine.low %v996_v37, %v1000_v39  ;;  %v1029_v37 = vld [vmem:[#allocation8 + $0x888] sm:$0xff] }
 0x183   :  { %6998 = vmatpush1.bf16.msra.mxu0 %v9202_v30  ;;  %7326 = vmatpush1.bf16.msra.mxu1 %v9204_v31  ;;  %v993_v30 = vld [vmem:[#allocation8 + $0x768] sm:$0xff]  ;;  %v9242_v31 = vcombine.low %v980_v11, %v984_v17  ;;  %v1008_v57 = vld [vmem:[#allocation8 + $0x7e0] sm:$0xff] }
 0x184   :  { %6999 = vmatprep.subr.bf16.mxu0 %v9211_v34  ;;  %7327 = vmatprep.subr.bf16.mxu1 %v9213_v35  ;;  %v9244_v34 = vcombine.low %v981_v20, %v985_v0  ;;  %v9251_v35 = vcombine.high %v988_v27, %v992_v28  ;;  %v9253_v25 = vcombine.high %v989_v29, %v993_v30  ;;  %v1033_v39 = vld [vmem:[#allocation8 + $0x8a8] sm:$0xff] }
 0x185   :  { %v9267_v63 = vcombine.high %v1004_v55, %v1008_v57  ;;  %v9266_v20 = vcombine.low %v1004_v55, %v1008_v57  ;;  %v1037_v55 = vld [vmem:[#allocation8 + $0x8c8] sm:$0xff] }
 0x186   :  { %v1041_v57 = vld [vmem:[#allocation8 + $0x8e8] sm:$0xff] }
 0x187   :  { %7000 = vmatpush1.bf16.msra.mxu0 %v9210_v41  ;;  %7328 = vmatpush1.bf16.msra.mxu1 %v9212_v43  ;;  %v1001_v41 = vld [vmem:[#allocation8 + $0x7a8] sm:$0xff]  ;;  %v163_v43 = vrot.slane %v10757_v14, %v10796_v8 }
 0x188   :  { %7001 = vmatprep.subr.bf16.mxu0 %v9219_v44  ;;  %7329 = vmatprep.subr.bf16.mxu1 %v9221_v52  ;;  %v9250_v44 = vcombine.low %v988_v27, %v992_v28  ;;  %v9252_v52 = vcombine.low %v989_v29, %v993_v30  ;;  %v9261_v54 = vcombine.high %v997_v40, %v1001_v41  ;;  %v1025_v27 = vld [vmem:[#allocation8 + $0x868] sm:$0xff] }
 0x189   :  { %v9260_v12 = vcombine.low %v997_v40, %v1001_v41 }
 0x18b   :  { %7002 = vmatpush1.bf16.msra.mxu0 %v9218_v58  ;;  %7330 = vmatpush1.bf16.msra.mxu1 %v9220_v59  ;;  %v1005_v58 = vld [vmem:[#allocation8 + $0x7c8] sm:$0xff] }
 0x18c   :  { %7003 = vmatprep.subr.bf16.mxu0 %v9227_v60  ;;  %7331 = vmatprep.subr.bf16.mxu1 %v9229_v61  ;;  %v1009_v59 = vld [vmem:[#allocation8 + $0x7e8] sm:$0xff]  ;;  %v175_v60 = vrot.slane %v10757_v14, %v10810_v48  ;;  %v472_v61 = vadd.f32 %v10771_v24, %v163_v43 }
 0x18d   :  { %v9269_v2 = vcombine.high %v1005_v58, %v1009_v59  ;;  %v9268_v0 = vcombine.low %v1005_v58, %v1009_v59  ;;  %v9292_v59 = vcombine.low %v1029_v37, %v1033_v39 }
 0x18e   :  { %v515_v11 = vadd.f32 %v10785_v47, %v175_v60  ;;  %v726_v17 = vmax.f32 %v472_v61, 0.0  ;;  %v9301_v61 = vcombine.high %v1037_v55, %v1041_v57 }
 0x18f   :  { %7004 = vmatpush1.bf16.msra.mxu0 %v9226_v3  ;;  %7332 = vmatpush1.bf16.msra.mxu1 %v9228_v4  ;;  %v1012_v3 = vld [vmem:[#allocation8 + $0x800] sm:$0xff] }
 0x190   :  { %7005 = vmatprep.subr.bf16.mxu0 %v9235_v5  ;;  %7333 = vmatprep.subr.bf16.mxu1 %v9237_v6  ;;  %v1016_v4 = vld [vmem:[#allocation8 + $0x820] sm:$0xff]  ;;  %v1013_v5 = vld [vmem:[#allocation8 + $0x808] sm:$0xff]  ;;  %v729_v28 = vmax.f32 %v515_v11, 0.0  ;;  %v10836_v29 = vpack.c.bf16 %v726_v17, %v726_v17 }
 0x191   :  { %v1017_v6 = vld [vmem:[#allocation8 + $0x828] sm:$0xff]  ;;  %v9275_v24 = vcombine.high %v1012_v3, %v1016_v4  ;;  %v9274_v30 = vcombine.low %v1012_v3, %v1016_v4  ;;  %v9300_v4 = vcombine.low %v1037_v55, %v1041_v57  ;;  %v1052_v11 = vld [vmem:[#allocation8 + $0x940] sm:$0xff] }
 0x192   :  { %v9276_v47 = vcombine.low %v1013_v5, %v1017_v6  ;;  %v10838_v40 = vpack.c.bf16 %v729_v28, %v729_v28  ;;  %v1056_v17 = vld [vmem:[#allocation8 + $0x960] sm:$0xff]  ;;  %v1061_v28 = vld [vmem:[#allocation8 + $0x988] sm:$0xff] }
 0x193   :  { %7006 = vmatpush1.bf16.msra.mxu0 %v9234_v21  ;;  %7334 = vmatpush1.bf16.msra.mxu1 %v9236_v22  ;;  %v9277_v21 = vcombine.high %v1013_v5, %v1017_v6  ;;  %v1020_v22 = vld [vmem:[#allocation8 + $0x840] sm:$0xff]  ;;  %v1077_v57 = vld [vmem:[#allocation8 + $0xa08] sm:$0xff] }
 0x194   :  { %7007 = vmatprep.subr.bf16.mxu0 %v9243_v23  ;;  %7335 = vmatprep.subr.bf16.mxu1 %v9245_v26  ;;  %v1024_v23 = vld [vmem:[#allocation8 + $0x860] sm:$0xff]  ;;  %v1021_v26 = vld [vmem:[#allocation8 + $0x848] sm:$0xff] }
 0x195   :  { %v9282_v41 = vcombine.low %v1020_v22, %v1024_v23  ;;  %v9284_v43 = vcombine.low %v1021_v26, %v1025_v27  ;;  %v1080_v55 = vld [vmem:[#allocation8 + $0xa20] sm:$0xff] }
 0x197   :  { %7008 = vmatpush1.bf16.msra.mxu0 %v9242_v31  ;;  %7336 = vmatpush1.bf16.msra.mxu1 %v9244_v34  ;;  %v9283_v31 = vcombine.high %v1020_v22, %v1024_v23  ;;  %v9285_v34 = vcombine.high %v1021_v26, %v1025_v27  ;;  %v9315_v22 = vcombine.high %v1052_v11, %v1056_v17  ;;  %v1060_v26 = vld [vmem:[#allocation8 + $0x980] sm:$0xff] }
 0x198   :  { %7009 = vmatprep.subr.bf16.mxu0 %v9251_v35  ;;  %7337 = vmatprep.subr.bf16.mxu1 %v9253_v25  ;;  %v1028_v35 = vld [vmem:[#allocation8 + $0x880] sm:$0xff] }
 0x199   :  { %v1032_v25 = vld [vmem:[#allocation8 + $0x8a0] sm:$0xff] }
 0x19a   :  { %v9290_v58 = vcombine.low %v1028_v35, %v1032_v25  ;;  %v1064_v27 = vld [vmem:[#allocation8 + $0x9a0] sm:$0xff] }
 0x19b   :  { %7010 = vmatpush1.bf16.msra.mxu0 %v9250_v44  ;;  %7338 = vmatpush1.bf16.msra.mxu1 %v9252_v52  ;;  %v9291_v44 = vcombine.high %v1028_v35, %v1032_v25  ;;  %v9293_v52 = vcombine.high %v1029_v37, %v1033_v39  ;;  %v1068_v25 = vld [vmem:[#allocation8 + $0x9c0] sm:$0xff]  ;;  %v1069_v39 = vld [vmem:[#allocation8 + $0x9c8] sm:$0xff] }
 0x19c   :  { %7011 = vmatprep.subr.bf16.mxu0 %v9259_v53  ;;  %7339 = vmatprep.subr.bf16.mxu1 %v9261_v54  ;;  %v1036_v53 = vld [vmem:[#allocation8 + $0x8c0] sm:$0xff] }
 0x19d   :  { %v1040_v54 = vld [vmem:[#allocation8 + $0x8e0] sm:$0xff] }
 0x19e   :  { %v9299_v60 = vcombine.high %v1036_v53, %v1040_v54  ;;  %v9298_v3 = vcombine.low %v1036_v53, %v1040_v54  ;;  %v1072_v37 = vld [vmem:[#allocation8 + $0x9e0] sm:$0xff] }
 0x19f   :  { %7012 = vmatpush1.bf16.msra.mxu0 %v9258_v62  ;;  %7340 = vmatpush1.bf16.msra.mxu1 %v9260_v12  ;;  %v1044_v62 = vld [vmem:[#allocation8 + $0x900] sm:$0xff] }
 0x1a0   :  { %7013 = vmatprep.subr.bf16.mxu0 %v9267_v63  ;;  %7341 = vmatprep.subr.bf16.mxu1 %v9269_v2  ;;  %v1048_v12 = vld [vmem:[#allocation8 + $0x920] sm:$0xff]  ;;  %v1045_v63 = vld [vmem:[#allocation8 + $0x908] sm:$0xff] }
 0x1a1   :  { %v1049_v2 = vld [vmem:[#allocation8 + $0x928] sm:$0xff]  ;;  %v9307_v5 = vcombine.high %v1044_v62, %v1048_v12  ;;  %v1076_v54 = vld [vmem:[#allocation8 + $0xa00] sm:$0xff] }
 0x1a2   :  { %v9309_v6 = vcombine.high %v1045_v63, %v1049_v2 }
 0x1a3   :  { %7014 = vmatpush1.bf16.msra.mxu0 %v9266_v20  ;;  %7342 = vmatpush1.bf16.msra.mxu1 %v9268_v0  ;;  %v1053_v20 = vld [vmem:[#allocation8 + $0x948] sm:$0xff] }
 0x1a4   :  { %7024 = vmatprep.subr.bf16.mxu0 %v9275_v24  ;;  %7352 = vmatprep.subr.bf16.mxu1 %v9277_v21  ;;  %v1057_v0 = vld [vmem:[#allocation8 + $0x968] sm:$0xff]  ;;  %v9306_v24 = vcombine.low %v1044_v62, %v1048_v12  ;;  %v9308_v21 = vcombine.low %v1045_v63, %v1049_v2  ;;  %v1084_v12 = vld [vmem:[#allocation8 + $0xa40] sm:$0xff] }
 0x1a5   :  { %v9317_v23 = vcombine.high %v1053_v20, %v1057_v0  ;;  %v1088_v63 = vld [vmem:[#allocation8 + $0xa60] sm:$0xff]  ;;  %v1085_v2 = vld [vmem:[#allocation8 + $0xa48] sm:$0xff] }
 0x1a6   :  { %7016 = vmatmul.mubr.bf16.vlgmr.msra.gmra.mrb[16].mxu0 %v10836_v29  ;;  %7344 = vmatmul.mubr.bf16.vlgmr.msra.gmra.mrb[16].mxu1 %v10836_v29 }
 0x1a7   :  { %7025 = vmatpush1.bf16.msra.mxu0 %v9274_v30  ;;  %7353 = vmatpush1.bf16.msra.mxu1 %v9276_v47  ;;  %v1065_v30 = vld [vmem:[#allocation8 + $0x9a8] sm:$0xff]  ;;  %v9314_v47 = vcombine.low %v1052_v11, %v1056_v17  ;;  %v1092_v17 = vld [vmem:[#allocation8 + $0xa80] sm:$0xff] }
 0x1a8   :  { %7026 = vmatprep.subr.bf16.mxu0 %v9283_v31  ;;  %7354 = vmatprep.subr.bf16.mxu1 %v9285_v34  ;;  %v9316_v31 = vcombine.low %v1053_v20, %v1057_v0  ;;  %v9323_v34 = vcombine.high %v1060_v26, %v1064_v27  ;;  %v9325_v35 = vcombine.high %v1061_v28, %v1065_v30  ;;  %v1096_v20 = vld [vmem:[#allocation8 + $0xaa0] sm:$0xff]  ;;  %v1093_v0 = vld [vmem:[#allocation8 + $0xa88] sm:$0xff] }
 0x1a9   :  { %7056 = vmatprep.mubr.bf16.mxu0 %v10838_v40  ;;  %7384 = vmatprep.mubr.bf16.mxu1 %v10838_v40 }
 0x1ab   :  { %7027 = vmatpush1.bf16.msra.mxu0 %v9282_v41  ;;  %7355 = vmatpush1.bf16.msra.mxu1 %v9284_v43  ;;  %v1073_v41 = vld [vmem:[#allocation8 + $0x9e8] sm:$0xff]  ;;  %v9322_v43 = vcombine.low %v1060_v26, %v1064_v27  ;;  %v1100_v27 = vld [vmem:[#allocation8 + $0xac0] sm:$0xff] }
 0x1ac   :  { %7028 = vmatprep.subr.bf16.mxu0 %v9291_v44  ;;  %7356 = vmatprep.subr.bf16.mxu1 %v9293_v52  ;;  %v9324_v44 = vcombine.low %v1061_v28, %v1065_v30  ;;  %v9331_v52 = vcombine.high %v1068_v25, %v1072_v37  ;;  %v9333_v53 = vcombine.high %v1069_v39, %v1073_v41  ;;  %v1104_v28 = vld [vmem:[#allocation8 + $0xae0] sm:$0xff]  ;;  %v1101_v30 = vld [vmem:[#allocation8 + $0xac8] sm:$0xff] }
 0x1af   :  { %7029 = vmatpush1.bf16.msra.mxu0 %v9290_v58  ;;  %7357 = vmatpush1.bf16.msra.mxu1 %v9292_v59  ;;  %v1081_v58 = vld [vmem:[#allocation8 + $0xa28] sm:$0xff]  ;;  %v9330_v59 = vcombine.low %v1068_v25, %v1072_v37  ;;  %v1108_v37 = vld [vmem:[#allocation8 + $0xb00] sm:$0xff] }
 0x1b0   :  { %7030 = vmatprep.subr.bf16.mxu0 %v9299_v60  ;;  %7358 = vmatprep.subr.bf16.mxu1 %v9301_v61  ;;  %v9332_v60 = vcombine.low %v1069_v39, %v1073_v41  ;;  %v9339_v61 = vcombine.high %v1076_v54, %v1080_v55  ;;  %v9341_v62 = vcombine.high %v1077_v57, %v1081_v58  ;;  %v1112_v39 = vld [vmem:[#allocation8 + $0xb20] sm:$0xff]  ;;  %v1109_v41 = vld [vmem:[#allocation8 + $0xb08] sm:$0xff] }
 0x1b3   :  { %7031 = vmatpush1.bf16.msra.mxu0 %v9298_v3  ;;  %7359 = vmatpush1.bf16.msra.mxu1 %v9300_v4  ;;  %v1089_v3 = vld [vmem:[#allocation8 + $0xa68] sm:$0xff]  ;;  %v9338_v4 = vcombine.low %v1076_v54, %v1080_v55  ;;  %v1116_v55 = vld [vmem:[#allocation8 + $0xb40] sm:$0xff] }
 0x1b4   :  { %7032 = vmatprep.subr.bf16.mxu0 %v9307_v5  ;;  %7360 = vmatprep.subr.bf16.mxu1 %v9309_v6  ;;  %v9340_v5 = vcombine.low %v1077_v57, %v1081_v58  ;;  %v9347_v6 = vcombine.high %v1084_v12, %v1088_v63  ;;  %v9349_v11 = vcombine.high %v1085_v2, %v1089_v3  ;;  %v1120_v57 = vld [vmem:[#allocation8 + $0xb60] sm:$0xff]  ;;  %v1117_v58 = vld [vmem:[#allocation8 + $0xb48] sm:$0xff] }
 0x1b7   :  { %7033 = vmatpush1.bf16.msra.mxu0 %v9306_v24  ;;  %7361 = vmatpush1.bf16.msra.mxu1 %v9308_v21  ;;  %v1097_v24 = vld [vmem:[#allocation8 + $0xaa8] sm:$0xff]  ;;  %v9346_v21 = vcombine.low %v1084_v12, %v1088_v63  ;;  %v1124_v63 = vld [vmem:[#allocation8 + $0xb80] sm:$0xff] }
 0x1b8   :  { %7034 = vmatprep.subr.bf16.mxu0 %v9315_v22  ;;  %7362 = vmatprep.subr.bf16.mxu1 %v9317_v23  ;;  %v9348_v22 = vcombine.low %v1085_v2, %v1089_v3  ;;  %v9355_v23 = vcombine.high %v1092_v17, %v1096_v20  ;;  %v9357_v26 = vcombine.high %v1093_v0, %v1097_v24  ;;  %v1128_v2 = vld [vmem:[#allocation8 + $0xba0] sm:$0xff]  ;;  %v1125_v3 = vld [vmem:[#allocation8 + $0xb88] sm:$0xff] }
 0x1bb   :  { %7035 = vmatpush1.bf16.msra.mxu0 %v9314_v47  ;;  %7363 = vmatpush1.bf16.msra.mxu1 %v9316_v31  ;;  %v1105_v47 = vld [vmem:[#allocation8 + $0xae8] sm:$0xff]  ;;  %v9354_v31 = vcombine.low %v1092_v17, %v1096_v20  ;;  %v9387_v17 = vcombine.high %v1124_v63, %v1128_v2 }
 0x1bc   :  { %7036 = vmatprep.subr.bf16.mxu0 %v9323_v34  ;;  %7364 = vmatprep.subr.bf16.mxu1 %v9325_v35  ;;  %v9356_v34 = vcombine.low %v1093_v0, %v1097_v24  ;;  %v9363_v35 = vcombine.high %v1100_v27, %v1104_v28  ;;  %v9365_v25 = vcombine.high %v1101_v30, %v1105_v47  ;;  %v1132_v0 = vld [vmem:[#allocation8 + $0xbc0] sm:$0xff] }
 0x1bd   :  { %v1136_v24 = vld [vmem:[#allocation8 + $0xbe0] sm:$0xff] }
 0x1bf   :  { %7037 = vmatpush1.bf16.msra.mxu0 %v9322_v43  ;;  %7365 = vmatpush1.bf16.msra.mxu1 %v9324_v44  ;;  %v1113_v43 = vld [vmem:[#allocation8 + $0xb28] sm:$0xff]  ;;  %v9362_v44 = vcombine.low %v1100_v27, %v1104_v28  ;;  %v9386_v27 = vcombine.low %v1124_v63, %v1128_v2 }
 0x1c0   :  { %7038 = vmatprep.subr.bf16.mxu0 %v9331_v52  ;;  %7366 = vmatprep.subr.bf16.mxu1 %v9333_v53  ;;  %v9364_v52 = vcombine.low %v1101_v30, %v1105_v47  ;;  %v9371_v53 = vcombine.high %v1108_v37, %v1112_v39  ;;  %v9373_v54 = vcombine.high %v1109_v41, %v1113_v43  ;;  %v1157_v63 = vld [vmem:[#allocation8 + $0xc88] sm:$0xff] }
 0x1c1   :  { %v9395_v30 = vcombine.high %v1132_v0, %v1136_v24  ;;  %v1161_v2 = vld [vmem:[#allocation8 + $0xca8] sm:$0xff] }
 0x1c3   :  { %7039 = vmatpush1.bf16.msra.mxu0 %v9330_v59  ;;  %7367 = vmatpush1.bf16.msra.mxu1 %v9332_v60  ;;  %v1121_v59 = vld [vmem:[#allocation8 + $0xb68] sm:$0xff]  ;;  %v9370_v60 = vcombine.low %v1108_v37, %v1112_v39 }
 0x1c4   :  { %7040 = vmatprep.subr.bf16.mxu0 %v9339_v61  ;;  %7368 = vmatprep.subr.bf16.mxu1 %v9341_v62  ;;  %v9372_v61 = vcombine.low %v1109_v41, %v1113_v43  ;;  %v9379_v62 = vcombine.high %v1116_v55, %v1120_v57  ;;  %v9381_v12 = vcombine.high %v1117_v58, %v1121_v59 }
 0x1c7   :  { %7041 = vmatpush1.bf16.msra.mxu0 %v9338_v4  ;;  %7369 = vmatpush1.bf16.msra.mxu1 %v9340_v5  ;;  %v1129_v4 = vld [vmem:[#allocation8 + $0xba8] sm:$0xff]  ;;  %v171_v5 = vrot.slane %v10757_v14, %v10807_v42 }
 0x1c8   :  { %7042 = vmatprep.subr.bf16.mxu0 %v9347_v6  ;;  %7370 = vmatprep.subr.bf16.mxu1 %v9349_v11  ;;  %v9378_v6 = vcombine.low %v1116_v55, %v1120_v57  ;;  %v9380_v11 = vcombine.low %v1117_v58, %v1121_v59  ;;  %v9389_v20 = vcombine.high %v1125_v3, %v1129_v4  ;;  %v1153_v55 = vld [vmem:[#allocation8 + $0xc68] sm:$0xff] }
 0x1c9   :  { %v9388_v28 = vcombine.low %v1125_v3, %v1129_v4 }
 0x1cb   :  { %7043 = vmatpush1.bf16.msra.mxu0 %v9346_v21  ;;  %7371 = vmatpush1.bf16.msra.mxu1 %v9348_v22  ;;  %v1133_v21 = vld [vmem:[#allocation8 + $0xbc8] sm:$0xff] }
 0x1cc   :  { %7044 = vmatprep.subr.bf16.mxu0 %v9355_v23  ;;  %7372 = vmatprep.subr.bf16.mxu1 %v9357_v26  ;;  %v1137_v22 = vld [vmem:[#allocation8 + $0xbe8] sm:$0xff]  ;;  %v183_v23 = vrot.slane %v10757_v14, %v10816_v50  ;;  %v513_v26 = vadd.f32 %v10781_v46, %v171_v5  ;;  %v9394_v14 = vcombine.low %v1132_v0, %v1136_v24 }
 0x1cd   :  { %v9397_v47 = vcombine.high %v1133_v21, %v1137_v22  ;;  %v9396_v41 = vcombine.low %v1133_v21, %v1137_v22  ;;  %v1169_v0 = vld [vmem:[#allocation8 + $0xce8] sm:$0xff]  ;;  %v9420_v21 = vcombine.low %v1157_v63, %v1161_v2 }
 0x1ce   :  { %v556_v37 = vadd.f32 %v10789_v56, %v183_v23  ;;  %v728_v39 = vmax.f32 %v513_v26, 0.0  ;;  %v1172_v26 = vld [vmem:[#allocation8 + $0xd00] sm:$0xff] }
 0x1cf   :  { %7045 = vmatpush1.bf16.msra.mxu0 %v9354_v31  ;;  %7373 = vmatpush1.bf16.msra.mxu1 %v9356_v34  ;;  %v1140_v31 = vld [vmem:[#allocation8 + $0xc00] sm:$0xff] }
 0x1d0   :  { %7046 = vmatprep.subr.bf16.mxu0 %v9363_v35  ;;  %7374 = vmatprep.subr.bf16.mxu1 %v9365_v25  ;;  %v1144_v34 = vld [vmem:[#allocation8 + $0xc20] sm:$0xff]  ;;  %v1141_v35 = vld [vmem:[#allocation8 + $0xc08] sm:$0xff]  ;;  %v10850_v57 = vpack.c.bf16 %v728_v39, %v728_v39 }
 0x1d1   :  { %v1145_v25 = vld [vmem:[#allocation8 + $0xc28] sm:$0xff]  ;;  %v9403_v46 = vcombine.high %v1140_v31, %v1144_v34  ;;  %v9402_v58 = vcombine.low %v1140_v31, %v1144_v34 }
 0x1d2   :  { %v9405_v43 = vcombine.high %v1141_v35, %v1145_v25  ;;  %v9404_v56 = vcombine.low %v1141_v35, %v1145_v25  ;;  %v1180_v25 = vld [vmem:[#allocation8 + $0xd40] sm:$0xff]  ;;  %v1181_v39 = vld [vmem:[#allocation8 + $0xd48] sm:$0xff] }
 0x1d3   :  { %7047 = vmatpush1.bf16.msra.mxu0 %v9362_v44  ;;  %7375 = vmatpush1.bf16.msra.mxu1 %v9364_v52  ;;  %v1148_v44 = vld [vmem:[#allocation8 + $0xc40] sm:$0xff]  ;;  %v731_v52 = vmax.f32 %v556_v37, 0.0 }
 0x1d4   :  { %7048 = vmatprep.subr.bf16.mxu0 %v9371_v53  ;;  %7376 = vmatprep.subr.bf16.mxu1 %v9373_v54  ;;  %v1152_v53 = vld [vmem:[#allocation8 + $0xc60] sm:$0xff]  ;;  %v1149_v54 = vld [vmem:[#allocation8 + $0xc48] sm:$0xff] }
 0x1d5   :  { %v9411_v59 = vcombine.high %v1148_v44, %v1152_v53  ;;  %v9410_v3 = vcombine.low %v1148_v44, %v1152_v53  ;;  %v9412_v4 = vcombine.low %v1149_v54, %v1153_v55  ;;  %v1184_v37 = vld [vmem:[#allocation8 + $0xd60] sm:$0xff] }
 0x1d6   :  { %v1192_v53 = vld [vmem:[#allocation8 + $0xda0] sm:$0xff] }
 0x1d7   :  { %7049 = vmatpush1.bf16.msra.mxu0 %v9370_v60  ;;  %7377 = vmatpush1.bf16.msra.mxu1 %v9372_v61  ;;  %v9413_v60 = vcombine.high %v1149_v54, %v1153_v55  ;;  %v1156_v61 = vld [vmem:[#allocation8 + $0xc80] sm:$0xff]  ;;  %v1189_v54 = vld [vmem:[#allocation8 + $0xd88] sm:$0xff] }
 0x1d8   :  { %7050 = vmatprep.subr.bf16.mxu0 %v9379_v62  ;;  %7378 = vmatprep.subr.bf16.mxu1 %v9381_v12  ;;  %v10852_v62 = vpack.c.bf16 %v731_v52, %v731_v52  ;;  %v1160_v12 = vld [vmem:[#allocation8 + $0xca0] sm:$0xff]  ;;  %v1193_v55 = vld [vmem:[#allocation8 + $0xda8] sm:$0xff] }
 0x1d9   :  { %v9419_v5 = vcombine.high %v1156_v61, %v1160_v12  ;;  %v9418_v24 = vcombine.low %v1156_v61, %v1160_v12  ;;  %v1188_v52 = vld [vmem:[#allocation8 + $0xd80] sm:$0xff] }
 0x1da   :  { %v1196_v61 = vld [vmem:[#allocation8 + $0xdc0] sm:$0xff] }
 0x1db   :  { %7051 = vmatpush1.bf16.msra.mxu0 %v9378_v6  ;;  %7379 = vmatpush1.bf16.msra.mxu1 %v9380_v11  ;;  %v9421_v6 = vcombine.high %v1157_v63, %v1161_v2  ;;  %v1164_v11 = vld [vmem:[#allocation8 + $0xcc0] sm:$0xff]  ;;  %v1197_v63 = vld [vmem:[#allocation8 + $0xdc8] sm:$0xff] }
 0x1dc   :  { %7052 = vmatprep.subr.bf16.mxu0 %v9387_v17  ;;  %7380 = vmatprep.subr.bf16.mxu1 %v9389_v20  ;;  %v1168_v17 = vld [vmem:[#allocation8 + $0xce0] sm:$0xff]  ;;  %v1165_v20 = vld [vmem:[#allocation8 + $0xcc8] sm:$0xff] }
 0x1dd   :  { %v9427_v22 = vcombine.high %v1164_v11, %v1168_v17  ;;  %v9429_v23 = vcombine.high %v1165_v20, %v1169_v0  ;;  %v9428_v31 = vcombine.low %v1165_v20, %v1169_v0  ;;  %v1200_v12 = vld [vmem:[#allocation8 + $0xde0] sm:$0xff]  ;;  %v1201_v2 = vld [vmem:[#allocation8 + $0xde8] sm:$0xff] }
 0x1de   :  { %v1205_v20 = vld [vmem:[#allocation8 + $0xe08] sm:$0xff] }
 0x1df   :  { %7053 = vmatpush1.bf16.msra.mxu0 %v9386_v27  ;;  %7381 = vmatpush1.bf16.msra.mxu1 %v9388_v28  ;;  %v1176_v27 = vld [vmem:[#allocation8 + $0xd20] sm:$0xff]  ;;  %v1173_v28 = vld [vmem:[#allocation8 + $0xd08] sm:$0xff] }
 0x1e0   :  { %7054 = vmatprep.subr.bf16.mxu0 %v9395_v30  ;;  %7382 = vmatprep.subr.bf16.mxu1 %v9397_v47  ;;  %v1177_v30 = vld [vmem:[#allocation8 + $0xd28] sm:$0xff]  ;;  %v9426_v47 = vcombine.low %v1164_v11, %v1168_v17  ;;  %v9435_v34 = vcombine.high %v1172_v26, %v1176_v27  ;;  %v1204_v11 = vld [vmem:[#allocation8 + $0xe00] sm:$0xff] }
 0x1e1   :  { %v9437_v35 = vcombine.high %v1173_v28, %v1177_v30  ;;  %v1208_v17 = vld [vmem:[#allocation8 + $0xe20] sm:$0xff]  ;;  %v1209_v0 = vld [vmem:[#allocation8 + $0xe28] sm:$0xff] }
 0x1e3   :  { %7055 = vmatpush1.bf16.msra.mxu0 %v9394_v14  ;;  %7383 = vmatpush1.bf16.msra.mxu1 %v9396_v41  ;;  %v1185_v14 = vld [vmem:[#allocation8 + $0xd68] sm:$0xff]  ;;  %v9434_v41 = vcombine.low %v1172_v26, %v1176_v27  ;;  %v1212_v26 = vld [vmem:[#allocation8 + $0xe40] sm:$0xff] }
 0x1e4   :  { %7065 = vmatprep.subr.bf16.mxu0 %v9403_v46  ;;  %7393 = vmatprep.subr.bf16.mxu1 %v9405_v43  ;;  %v9436_v46 = vcombine.low %v1173_v28, %v1177_v30  ;;  %v9443_v43 = vcombine.high %v1180_v25, %v1184_v37  ;;  %v9445_v44 = vcombine.high %v1181_v39, %v1185_v14  ;;  %v1216_v27 = vld [vmem:[#allocation8 + $0xe60] sm:$0xff]  ;;  %v1213_v28 = vld [vmem:[#allocation8 + $0xe48] sm:$0xff] }
 0x1e5   :  { %v1217_v30 = vld [vmem:[#allocation8 + $0xe68] sm:$0xff] }
 0x1e6   :  { %7057 = vmatmul.mubr.bf16.vlgmr.msra.gmra.mrb[16].mxu0 %v10850_v57  ;;  %7385 = vmatmul.mubr.bf16.vlgmr.msra.gmra.mrb[16].mxu1 %v10850_v57 }
 0x1e7   :  { %7066 = vmatpush1.bf16.msra.mxu0 %v9402_v58  ;;  %7394 = vmatpush1.bf16.msra.mxu1 %v9404_v56  ;;  %v9442_v58 = vcombine.low %v1180_v25, %v1184_v37  ;;  %v9444_v56 = vcombine.low %v1181_v39, %v1185_v14  ;;  %v1220_v25 = vld [vmem:[#allocation8 + $0xe80] sm:$0xff]  ;;  %v1221_v39 = vld [vmem:[#allocation8 + $0xe88] sm:$0xff] }
 0x1e8   :  { %7067 = vmatprep.subr.bf16.mxu0 %v9411_v59  ;;  %7395 = vmatprep.subr.bf16.mxu1 %v9413_v60  ;;  %v9451_v59 = vcombine.high %v1188_v52, %v1192_v53  ;;  %v9453_v60 = vcombine.high %v1189_v54, %v1193_v55  ;;  %v1224_v37 = vld [vmem:[#allocation8 + $0xea0] sm:$0xff]  ;;  %v1225_v14 = vld [vmem:[#allocation8 + $0xea8] sm:$0xff] }
 0x1e9   :  { %7097 = vmatprep.mubr.bf16.mxu0 %v10852_v62  ;;  %7425 = vmatprep.mubr.bf16.mxu1 %v10852_v62 }
 0x1eb   :  { %7068 = vmatpush1.bf16.msra.mxu0 %v9410_v3  ;;  %7396 = vmatpush1.bf16.msra.mxu1 %v9412_v4  ;;  %v9450_v3 = vcombine.low %v1188_v52, %v1192_v53  ;;  %v9452_v4 = vcombine.low %v1189_v54, %v1193_v55  ;;  %v1228_v52 = vld [vmem:[#allocation8 + $0xec0] sm:$0xff]  ;;  %v1229_v54 = vld [vmem:[#allocation8 + $0xec8] sm:$0xff] }
 0x1ec   :  { %7069 = vmatprep.subr.bf16.mxu0 %v9419_v5  ;;  %7397 = vmatprep.subr.bf16.mxu1 %v9421_v6  ;;  %v9459_v5 = vcombine.high %v1196_v61, %v1200_v12  ;;  %v9461_v6 = vcombine.high %v1197_v63, %v1201_v2  ;;  %v1232_v53 = vld [vmem:[#allocation8 + $0xee0] sm:$0xff]  ;;  %v1233_v55 = vld [vmem:[#allocation8 + $0xee8] sm:$0xff] }
 0x1ef   :  { %7070 = vmatpush1.bf16.msra.mxu0 %v9418_v24  ;;  %7398 = vmatpush1.bf16.msra.mxu1 %v9420_v21  ;;  %v9458_v24 = vcombine.low %v1196_v61, %v1200_v12  ;;  %v9460_v21 = vcombine.low %v1197_v63, %v1201_v2  ;;  %v1236_v61 = vld [vmem:[#allocation8 + $0xf00] sm:$0xff]  ;;  %v1237_v63 = vld [vmem:[#allocation8 + $0xf08] sm:$0xff] }
 0x1f0   :  { %7071 = vmatprep.subr.bf16.mxu0 %v9427_v22  ;;  %7399 = vmatprep.subr.bf16.mxu1 %v9429_v23  ;;  %v9467_v22 = vcombine.high %v1204_v11, %v1208_v17  ;;  %v9469_v23 = vcombine.high %v1205_v20, %v1209_v0  ;;  %v1240_v12 = vld [vmem:[#allocation8 + $0xf20] sm:$0xff]  ;;  %v1241_v2 = vld [vmem:[#allocation8 + $0xf28] sm:$0xff] }
 0x1f3   :  { %7072 = vmatpush1.bf16.msra.mxu0 %v9426_v47  ;;  %7400 = vmatpush1.bf16.msra.mxu1 %v9428_v31  ;;  %v9466_v47 = vcombine.low %v1204_v11, %v1208_v17  ;;  %v9468_v31 = vcombine.low %v1205_v20, %v1209_v0  ;;  %v1244_v11 = vld [vmem:[#allocation8 + $0xf40] sm:$0xff]  ;;  %v1245_v20 = vld [vmem:[#allocation8 + $0xf48] sm:$0xff] }
 0x1f4   :  { %7073 = vmatprep.subr.bf16.mxu0 %v9435_v34  ;;  %7401 = vmatprep.subr.bf16.mxu1 %v9437_v35  ;;  %v9475_v34 = vcombine.high %v1212_v26, %v1216_v27  ;;  %v9477_v35 = vcombine.high %v1213_v28, %v1217_v30  ;;  %v1248_v17 = vld [vmem:[#allocation8 + $0xf60] sm:$0xff]  ;;  %v1249_v0 = vld [vmem:[#allocation8 + $0xf68] sm:$0xff] }
 0x1f7   :  { %7074 = vmatpush1.bf16.msra.mxu0 %v9434_v41  ;;  %7402 = vmatpush1.bf16.msra.mxu1 %v9436_v46  ;;  %v9474_v41 = vcombine.low %v1212_v26, %v1216_v27  ;;  %v9476_v46 = vcombine.low %v1213_v28, %v1217_v30  ;;  %v1252_v26 = vld [vmem:[#allocation8 + $0xf80] sm:$0xff]  ;;  %v1253_v28 = vld [vmem:[#allocation8 + $0xf88] sm:$0xff] }
 0x1f8   :  { %7075 = vmatprep.subr.bf16.mxu0 %v9443_v43  ;;  %7403 = vmatprep.subr.bf16.mxu1 %v9445_v44  ;;  %v9483_v43 = vcombine.high %v1220_v25, %v1224_v37  ;;  %v9485_v44 = vcombine.high %v1221_v39, %v1225_v14  ;;  %v1256_v27 = vld [vmem:[#allocation8 + $0xfa0] sm:$0xff]  ;;  %v1257_v30 = vld [vmem:[#allocation8 + $0xfa8] sm:$0xff] }
 0x1fb   :  { %7076 = vmatpush1.bf16.msra.mxu0 %v9442_v58  ;;  %7404 = vmatpush1.bf16.msra.mxu1 %v9444_v56  ;;  %v9482_v58 = vcombine.low %v1220_v25, %v1224_v37  ;;  %v9484_v56 = vcombine.low %v1221_v39, %v1225_v14  ;;  %v9515_v25 = vcombine.high %v1252_v26, %v1256_v27  ;;  %v1260_v39 = vld [vmem:[#allocation8 + $0xfc0] sm:$0xff]  ;;  %v10859_v14 = vld [vmem:[#allocation7 + $0x8] sm:$0xff] }
 0x1fc   :  { %7077 = vmatprep.subr.bf16.mxu0 %v9451_v59  ;;  %7405 = vmatprep.subr.bf16.mxu1 %v9453_v60  ;;  %v9491_v59 = vcombine.high %v1228_v52, %v1232_v53  ;;  %v9493_v60 = vcombine.high %v1229_v54, %v1233_v55  ;;  %v9517_v37 = vcombine.high %v1253_v28, %v1257_v30 }
 0x1ff   :  { %7078 = vmatpush1.bf16.msra.mxu0 %v9450_v3  ;;  %7406 = vmatpush1.bf16.msra.mxu1 %v9452_v4  ;;  %v9490_v3 = vcombine.low %v1228_v52, %v1232_v53  ;;  %v9492_v4 = vcombine.low %v1229_v54, %v1233_v55  ;;  %v9514_v52 = vcombine.low %v1252_v26, %v1256_v27  ;;  %v1284_v26 = vld [vmem:[#allocation8 + $0x1080] sm:$0xff] }
 0x200   :  { %7079 = vmatprep.subr.bf16.mxu0 %v9459_v5  ;;  %7407 = vmatprep.subr.bf16.mxu1 %v9461_v6  ;;  %v9499_v5 = vcombine.high %v1236_v61, %v1240_v12  ;;  %v9501_v6 = vcombine.high %v1237_v63, %v1241_v2  ;;  %v9516_v53 = vcombine.low %v1253_v28, %v1257_v30  ;;  %v1288_v27 = vld [vmem:[#allocation8 + $0x10a0] sm:$0xff]  ;;  %v1285_v28 = vld [vmem:[#allocation8 + $0x1088] sm:$0xff] }
 0x201   :  { %v1289_v30 = vld [vmem:[#allocation8 + $0x10a8] sm:$0xff] }
 0x203   :  { %7080 = vmatpush1.bf16.msra.mxu0 %v9458_v24  ;;  %7408 = vmatpush1.bf16.msra.mxu1 %v9460_v21  ;;  %v9498_v24 = vcombine.low %v1236_v61, %v1240_v12  ;;  %v9500_v21 = vcombine.low %v1237_v63, %v1241_v2  ;;  %v1269_v61 = vld [vmem:[#allocation8 + $0x1008] sm:$0xff] }
 0x204   :  { %7081 = vmatprep.subr.bf16.mxu0 %v9467_v22  ;;  %7409 = vmatprep.subr.bf16.mxu1 %v9469_v23  ;;  %v9507_v22 = vcombine.high %v1244_v11, %v1248_v17  ;;  %v9509_v23 = vcombine.high %v1245_v20, %v1249_v0  ;;  %v1273_v12 = vld [vmem:[#allocation8 + $0x1028] sm:$0xff] }
 0x207   :  { %7082 = vmatpush1.bf16.msra.mxu0 %v9466_v47  ;;  %7410 = vmatpush1.bf16.msra.mxu1 %v9468_v31  ;;  %v9506_v47 = vcombine.low %v1244_v11, %v1248_v17  ;;  %v9508_v31 = vcombine.low %v1245_v20, %v1249_v0  ;;  %v1280_v11 = vld [vmem:[#allocation8 + $0x1060] sm:$0xff]  ;;  %v1277_v17 = vld [vmem:[#allocation8 + $0x1048] sm:$0xff] }
 0x208   :  { %7083 = vmatprep.subr.bf16.mxu0 %v9475_v34  ;;  %7411 = vmatprep.subr.bf16.mxu1 %v9477_v35  ;;  %v10397_v34 = vld [vmem:[#allocation7] sm:$0xff]  ;;  %v1281_v20 = vld [vmem:[#allocation8 + $0x1068] sm:$0xff] }
 0x209   :  { %v179_v35 = vrot.slane %v10397_v34, %v10813_v49  ;;  %v9547_v34 = vcombine.high %v1284_v26, %v1288_v27 }
 0x20b   :  { %7084 = vmatpush1.bf16.msra.mxu0 %v9474_v41  ;;  %7412 = vmatpush1.bf16.msra.mxu1 %v9476_v46  ;;  %v191_v41 = vrot.slane %v10859_v14, %v10760_v15  ;;  %v1264_v46 = vld [vmem:[#allocation8 + $0xfe0] sm:$0xff]  ;;  %v554_v54 = vadd.f32 %v10787_v51, %v179_v35  ;;  %v9549_v35 = vcombine.high %v1285_v28, %v1289_v30 }
 0x20c   :  { %7085 = vmatprep.subr.bf16.mxu0 %v9483_v43  ;;  %7413 = vmatprep.subr.bf16.mxu1 %v9485_v44  ;;  %v1261_v43 = vld [vmem:[#allocation8 + $0xfc8] sm:$0xff]  ;;  %v9523_v55 = vcombine.high %v1260_v39, %v1264_v46  ;;  %v9522_v63 = vcombine.low %v1260_v39, %v1264_v46  ;;  %v9546_v46 = vcombine.low %v1284_v26, %v1288_v27  ;;  %v1324_v27 = vld [vmem:[#allocation8 + $0x11c0] sm:$0xff] }
 0x20d   :  { %v1265_v44 = vld [vmem:[#allocation8 + $0xfe8] sm:$0xff] }
 0x20e   :  { %v9524_v2 = vcombine.low %v1261_v43, %v1265_v44  ;;  %v1293_v39 = vld [vmem:[#allocation8 + $0x10c8] sm:$0xff] }
 0x20f   :  { %7086 = vmatpush1.bf16.msra.mxu0 %v9482_v58  ;;  %7414 = vmatpush1.bf16.msra.mxu1 %v9484_v56  ;;  %v9525_v58 = vcombine.high %v1261_v43, %v1265_v44  ;;  %v1268_v56 = vld [vmem:[#allocation8 + $0x1000] sm:$0xff]  ;;  %v9548_v43 = vcombine.low %v1285_v28, %v1289_v30  ;;  %v1325_v30 = vld [vmem:[#allocation8 + $0x11c8] sm:$0xff] }
 0x210   :  { %7087 = vmatprep.subr.bf16.mxu0 %v9491_v59  ;;  %7415 = vmatprep.subr.bf16.mxu1 %v9493_v60  ;;  %v597_v59 = vadd.f32 %v10798_v18, %v191_v41  ;;  %v1272_v60 = vld [vmem:[#allocation8 + $0x1020] sm:$0xff]  ;;  %v1297_v41 = vld [vmem:[#allocation8 + $0x10e8] sm:$0xff] }
 0x211   :  { %v9530_v18 = vcombine.low %v1268_v56, %v1272_v60  ;;  %v1328_v28 = vld [vmem:[#allocation8 + $0x11e0] sm:$0xff] }
 0x212   :  { %v733_v51 = vmax.f32 %v597_v59, 0.0  ;;  %v9556_v59 = vcombine.low %v1293_v39, %v1297_v41 }
 0x213   :  { %7088 = vmatpush1.bf16.msra.mxu0 %v9490_v3  ;;  %7416 = vmatpush1.bf16.msra.mxu1 %v9492_v4  ;;  %v730_v3 = vmax.f32 %v554_v54, 0.0  ;;  %v9531_v4 = vcombine.high %v1268_v56, %v1272_v60  ;;  %v1304_v54 = vld [vmem:[#allocation8 + $0x1120] sm:$0xff] }
 0x214   :  { %7089 = vmatprep.subr.bf16.mxu0 %v9499_v5  ;;  %7417 = vmatprep.subr.bf16.mxu1 %v9501_v6  ;;  %v9533_v5 = vcombine.high %v1269_v61, %v1273_v12  ;;  %v1276_v6 = vld [vmem:[#allocation8 + $0x1040] sm:$0xff] }
 0x215   :  { %v10865_v0 = vpack.c.bf16 %v730_v3, %v730_v3  ;;  %v1313_v3 = vld [vmem:[#allocation8 + $0x1168] sm:$0xff] }
 0x217   :  { %7090 = vmatpush1.bf16.msra.mxu0 %v9498_v24  ;;  %7418 = vmatpush1.bf16.msra.mxu1 %v9500_v21  ;;  %v9532_v24 = vcombine.low %v1269_v61, %v1273_v12  ;;  %v10867_v21 = vpack.c.bf16 %v733_v51, %v733_v51  ;;  %v1308_v12 = vld [vmem:[#allocation8 + $0x1140] sm:$0xff] }
 0x218   :  { %7091 = vmatprep.subr.bf16.mxu0 %v9507_v22  ;;  %7419 = vmatprep.subr.bf16.mxu1 %v9509_v23  ;;  %v9539_v22 = vcombine.high %v1276_v6, %v1280_v11  ;;  %v9541_v23 = vcombine.high %v1277_v17, %v1281_v20 }
 0x21b   :  { %7092 = vmatpush1.bf16.msra.mxu0 %v9506_v47  ;;  %7420 = vmatpush1.bf16.msra.mxu1 %v9508_v31  ;;  %v9538_v47 = vcombine.low %v1276_v6, %v1280_v11  ;;  %v9540_v31 = vcombine.low %v1277_v17, %v1281_v20  ;;  %v1316_v11 = vld [vmem:[#allocation8 + $0x1180] sm:$0xff]  ;;  %v1317_v20 = vld [vmem:[#allocation8 + $0x1188] sm:$0xff] }
 0x21c   :  { %7093 = vmatprep.subr.bf16.mxu0 %v9515_v25  ;;  %7421 = vmatprep.subr.bf16.mxu1 %v9517_v37  ;;  %v1292_v25 = vld [vmem:[#allocation8 + $0x10c0] sm:$0xff] }
 0x21d   :  { %v1296_v37 = vld [vmem:[#allocation8 + $0x10e0] sm:$0xff] }
 0x21e   :  { %v9555_v44 = vcombine.high %v1292_v25, %v1296_v37  ;;  %v9554_v56 = vcombine.low %v1292_v25, %v1296_v37  ;;  %v1320_v17 = vld [vmem:[#allocation8 + $0x11a0] sm:$0xff] }
 0x21f   :  { %7094 = vmatpush1.bf16.msra.mxu0 %v9514_v52  ;;  %7422 = vmatpush1.bf16.msra.mxu1 %v9516_v53  ;;  %v9557_v52 = vcombine.high %v1293_v39, %v1297_v41  ;;  %v1300_v53 = vld [vmem:[#allocation8 + $0x1100] sm:$0xff]  ;;  %v1333_v41 = vld [vmem:[#allocation8 + $0x1208] sm:$0xff] }
 0x220   :  { %7095 = vmatprep.subr.bf16.mxu0 %v9523_v55  ;;  %7423 = vmatprep.subr.bf16.mxu1 %v9525_v58  ;;  %v1301_v55 = vld [vmem:[#allocation8 + $0x1108] sm:$0xff]  ;;  %v9563_v60 = vcombine.high %v1300_v53, %v1304_v54  ;;  %v1332_v37 = vld [vmem:[#allocation8 + $0x1200] sm:$0xff] }
 0x221   :  { %v1305_v58 = vld [vmem:[#allocation8 + $0x1128] sm:$0xff]  ;;  %v1336_v39 = vld [vmem:[#allocation8 + $0x1220] sm:$0xff] }
 0x222   :  { %v9565_v61 = vcombine.high %v1301_v55, %v1305_v58 }
 0x223   :  { %7096 = vmatpush1.bf16.msra.mxu0 %v9522_v63  ;;  %7424 = vmatpush1.bf16.msra.mxu1 %v9524_v2  ;;  %v1312_v63 = vld [vmem:[#allocation8 + $0x1160] sm:$0xff]  ;;  %v1309_v2 = vld [vmem:[#allocation8 + $0x1148] sm:$0xff] }
 0x224   :  { %7106 = vmatprep.subr.bf16.mxu0 %v9531_v4  ;;  %7434 = vmatprep.subr.bf16.mxu1 %v9533_v5  ;;  %v9562_v4 = vcombine.low %v1300_v53, %v1304_v54  ;;  %v9564_v5 = vcombine.low %v1301_v55, %v1305_v58  ;;  %v9571_v51 = vcombine.high %v1308_v12, %v1312_v63  ;;  %v1340_v54 = vld [vmem:[#allocation8 + $0x1240] sm:$0xff]  ;;  %v1341_v58 = vld [vmem:[#allocation8 + $0x1248] sm:$0xff] }
 0x225   :  { %v9573_v6 = vcombine.high %v1309_v2, %v1313_v3  ;;  %v1344_v55 = vld [vmem:[#allocation8 + $0x1260] sm:$0xff] }
 0x226   :  { %7098 = vmatmul.mubr.bf16.vlgmr.msra.gmra.mrb[16].mxu0 %v10865_v0  ;;  %7426 = vmatmul.mubr.bf16.vlgmr.msra.gmra.mrb[16].mxu1 %v10865_v0 }
 0x227   :  { %7107 = vmatpush1.bf16.msra.mxu0 %v9530_v18  ;;  %7138 = vmatprep.mubr.bf16.mxu0 %v10867_v21  ;;  %v1321_v18 = vld [vmem:[#allocation8 + $0x11a8] sm:$0xff] }
 0x228   :  { %7435 = vmatpush1.bf16.msra.mxu1 %v9532_v24  ;;  %7466 = vmatprep.mubr.bf16.mxu1 %v10867_v21  ;;  %v9570_v24 = vcombine.low %v1308_v12, %v1312_v63  ;;  %v9581_v26 = vcombine.high %v1317_v20, %v1321_v18  ;;  %v1348_v63 = vld [vmem:[#allocation8 + $0x1280] sm:$0xff] }
 0x229   :  { %7108 = vmatprep.subr.bf16.mxu0 %v9539_v22  ;;  %7436 = vmatprep.subr.bf16.mxu1 %v9541_v23  ;;  %v9572_v22 = vcombine.low %v1309_v2, %v1313_v3  ;;  %v9579_v23 = vcombine.high %v1316_v11, %v1320_v17  ;;  %v1352_v2 = vld [vmem:[#allocation8 + $0x12a0] sm:$0xff]  ;;  %v1349_v3 = vld [vmem:[#allocation8 + $0x1288] sm:$0xff] }
 0x22b   :  { %7109 = vmatpush1.bf16.msra.mxu0 %v9538_v47  ;;  %v1329_v47 = vld [vmem:[#allocation8 + $0x11e8] sm:$0xff] }
 0x22c   :  { %7437 = vmatpush1.bf16.msra.mxu1 %v9540_v31  ;;  %7110 = vmatprep.subr.bf16.mxu0 %v9547_v34  ;;  %v9578_v31 = vcombine.low %v1316_v11, %v1320_v17  ;;  %v9580_v34 = vcombine.low %v1317_v20, %v1321_v18  ;;  %v9589_v25 = vcombine.high %v1325_v30, %v1329_v47  ;;  %v1356_v17 = vld [vmem:[#allocation8 + $0x12c0] sm:$0xff]  ;;  %v1357_v18 = vld [vmem:[#allocation8 + $0x12c8] sm:$0xff] }
 0x22d   :  { %7438 = vmatprep.subr.bf16.mxu1 %v9549_v35  ;;  %v9587_v35 = vcombine.high %v1324_v27, %v1328_v28  ;;  %v1360_v20 = vld [vmem:[#allocation8 + $0x12e0] sm:$0xff] }
 0x22f   :  { %7111 = vmatpush1.bf16.msra.mxu0 %v9546_v46  ;;  %v1337_v46 = vld [vmem:[#allocation8 + $0x1228] sm:$0xff] }
 0x230   :  { %7439 = vmatpush1.bf16.msra.mxu1 %v9548_v43  ;;  %7112 = vmatprep.subr.bf16.mxu0 %v9555_v44  ;;  %v9586_v43 = vcombine.low %v1324_v27, %v1328_v28  ;;  %v9588_v44 = vcombine.low %v1325_v30, %v1329_v47  ;;  %v9597_v53 = vcombine.high %v1333_v41, %v1337_v46  ;;  %v1364_v28 = vld [vmem:[#allocation8 + $0x1300] sm:$0xff]  ;;  %v1365_v47 = vld [vmem:[#allocation8 + $0x1308] sm:$0xff] }
 0x231   :  { %7440 = vmatprep.subr.bf16.mxu1 %v9557_v52  ;;  %v9595_v52 = vcombine.high %v1332_v37, %v1336_v39  ;;  %v1368_v30 = vld [vmem:[#allocation8 + $0x1320] sm:$0xff] }
 0x233   :  { %7113 = vmatpush1.bf16.msra.mxu0 %v9554_v56  ;;  %v1345_v56 = vld [vmem:[#allocation8 + $0x1268] sm:$0xff] }
 0x234   :  { %7441 = vmatpush1.bf16.msra.mxu1 %v9556_v59  ;;  %7114 = vmatprep.subr.bf16.mxu0 %v9563_v60  ;;  %v9594_v59 = vcombine.low %v1332_v37, %v1336_v39  ;;  %v9596_v60 = vcombine.low %v1333_v41, %v1337_v46  ;;  %v9605_v12 = vcombine.high %v1341_v58, %v1345_v56  ;;  %v1372_v39 = vld [vmem:[#allocation8 + $0x1340] sm:$0xff]  ;;  %v1373_v46 = vld [vmem:[#allocation8 + $0x1348] sm:$0xff] }
 0x235   :  { %7442 = vmatprep.subr.bf16.mxu1 %v9565_v61  ;;  %v9603_v61 = vcombine.high %v1340_v54, %v1344_v55  ;;  %v1376_v41 = vld [vmem:[#allocation8 + $0x1360] sm:$0xff] }
 0x237   :  { %7115 = vmatpush1.bf16.msra.mxu0 %v9562_v4  ;;  %v1353_v4 = vld [vmem:[#allocation8 + $0x12a8] sm:$0xff] }
 0x238   :  { %7443 = vmatpush1.bf16.msra.mxu1 %v9564_v5  ;;  %7116 = vmatprep.subr.bf16.mxu0 %v9571_v51  ;;  %v9602_v5 = vcombine.low %v1340_v54, %v1344_v55  ;;  %v9604_v51 = vcombine.low %v1341_v58, %v1345_v56  ;;  %v9613_v11 = vcombine.high %v1349_v3, %v1353_v4  ;;  %v1380_v55 = vld [vmem:[#allocation8 + $0x1380] sm:$0xff]  ;;  %v1381_v56 = vld [vmem:[#allocation8 + $0x1388] sm:$0xff] }
 0x239   :  { %7444 = vmatprep.subr.bf16.mxu1 %v9573_v6  ;;  %v9611_v6 = vcombine.high %v1348_v63, %v1352_v2  ;;  %v1384_v58 = vld [vmem:[#allocation8 + $0x13a0] sm:$0xff] }
 0x23b   :  { %7117 = vmatpush1.bf16.msra.mxu0 %v9570_v24  ;;  %v1361_v24 = vld [vmem:[#allocation8 + $0x12e8] sm:$0xff] }
 0x23c   :  { %7445 = vmatpush1.bf16.msra.mxu1 %v9572_v22  ;;  %7118 = vmatprep.subr.bf16.mxu0 %v9579_v23  ;;  %v9610_v22 = vcombine.low %v1348_v63, %v1352_v2  ;;  %v9612_v23 = vcombine.low %v1349_v3, %v1353_v4  ;;  %v9621_v27 = vcombine.high %v1357_v18, %v1361_v24  ;;  %v1388_v3 = vld [vmem:[#allocation8 + $0x13c0] sm:$0xff] }
 0x23d   :  { %7446 = vmatprep.subr.bf16.mxu1 %v9581_v26  ;;  %v9619_v26 = vcombine.high %v1356_v17, %v1360_v20  ;;  %v9643_v63 = vcombine.high %v1380_v55, %v1384_v58  ;;  %v1392_v4 = vld [vmem:[#allocation8 + $0x13e0] sm:$0xff] }
 0x23f   :  { %7119 = vmatpush1.bf16.msra.mxu0 %v9578_v31  ;;  %v1369_v31 = vld [vmem:[#allocation8 + $0x1328] sm:$0xff] }
 0x240   :  { %7447 = vmatpush1.bf16.msra.mxu1 %v9580_v34  ;;  %7120 = vmatprep.subr.bf16.mxu0 %v9587_v35  ;;  %v9618_v34 = vcombine.low %v1356_v17, %v1360_v20  ;;  %v9620_v35 = vcombine.low %v1357_v18, %v1361_v24  ;;  %v9629_v37 = vcombine.high %v1365_v47, %v1369_v31  ;;  %v1396_v18 = vld [vmem:[#allocation8 + $0x1400] sm:$0xff] }
 0x241   :  { %7448 = vmatprep.subr.bf16.mxu1 %v9589_v25  ;;  %v9627_v25 = vcombine.high %v1364_v28, %v1368_v30  ;;  %v9651_v20 = vcombine.high %v1388_v3, %v1392_v4  ;;  %v1400_v24 = vld [vmem:[#allocation8 + $0x1420] sm:$0xff] }
 0x243   :  { %7121 = vmatpush1.bf16.msra.mxu0 %v9586_v43  ;;  %v1377_v43 = vld [vmem:[#allocation8 + $0x1368] sm:$0xff] }
 0x244   :  { %7449 = vmatpush1.bf16.msra.mxu1 %v9588_v44  ;;  %7122 = vmatprep.subr.bf16.mxu0 %v9595_v52  ;;  %v9626_v44 = vcombine.low %v1364_v28, %v1368_v30  ;;  %v9628_v52 = vcombine.low %v1365_v47, %v1369_v31  ;;  %v9637_v54 = vcombine.high %v1373_v46, %v1377_v43  ;;  %v1404_v31 = vld [vmem:[#allocation8 + $0x1440] sm:$0xff] }
 0x245   :  { %7450 = vmatprep.subr.bf16.mxu1 %v9597_v53  ;;  %v9635_v53 = vcombine.high %v1372_v39, %v1376_v41  ;;  %v9659_v30 = vcombine.high %v1396_v18, %v1400_v24 }
 0x247   :  { %7123 = vmatpush1.bf16.msra.mxu0 %v9594_v59  ;;  %v1385_v59 = vld [vmem:[#allocation8 + $0x13a8] sm:$0xff] }
 0x248   :  { %7451 = vmatpush1.bf16.msra.mxu1 %v9596_v60  ;;  %7124 = vmatprep.subr.bf16.mxu0 %v9603_v61  ;;  %v9634_v60 = vcombine.low %v1372_v39, %v1376_v41  ;;  %v187_v61 = vrot.slane %v10859_v14, %v10755_v13  ;;  %v9645_v2 = vcombine.high %v1381_v56, %v1385_v59 }
 0x249   :  { %7452 = vmatprep.subr.bf16.mxu1 %v9605_v12  ;;  %v9636_v12 = vcombine.low %v1373_v46, %v1377_v43  ;;  %v9644_v17 = vcombine.low %v1381_v56, %v1385_v59  ;;  %v1412_v43 = vld [vmem:[#allocation8 + $0x1480] sm:$0xff] }
 0x24b   :  { %7125 = vmatpush1.bf16.msra.mxu0 %v9602_v5  ;;  %v1389_v5 = vld [vmem:[#allocation8 + $0x13c8] sm:$0xff] }
 0x24c   :  { %7453 = vmatpush1.bf16.msra.mxu1 %v9604_v51  ;;  %7126 = vmatprep.subr.bf16.mxu0 %v9611_v6  ;;  %v1393_v51 = vld [vmem:[#allocation8 + $0x13e8] sm:$0xff]  ;;  %v9642_v6 = vcombine.low %v1380_v55, %v1384_v58 }
 0x24d   :  { %7454 = vmatprep.subr.bf16.mxu1 %v9613_v11  ;;  %v595_v11 = vadd.f32 %v10793_v7, %v187_v61  ;;  %v9653_v14 = vcombine.high %v1389_v5, %v1393_v51  ;;  %v9652_v28 = vcombine.low %v1389_v5, %v1393_v51  ;;  %v735_v7 = vmax.f32 %v10804_v33, 0.0  ;;  %v1424_v61 = vld [vmem:[#allocation8 + $0x14e0] sm:$0xff] }
 0x24e   :  { %v1428_v51 = vld [vmem:[#allocation8 + $0x1500] sm:$0xff] }
 0x24f   :  { %7127 = vmatpush1.bf16.msra.mxu0 %v9610_v22  ;;  %v1397_v22 = vld [vmem:[#allocation8 + $0x1408] sm:$0xff] }
 0x250   :  { %7455 = vmatpush1.bf16.msra.mxu1 %v9612_v23  ;;  %7128 = vmatprep.subr.bf16.mxu0 %v9619_v26  ;;  %v1401_v23 = vld [vmem:[#allocation8 + $0x1428] sm:$0xff]  ;;  %v9650_v26 = vcombine.low %v1388_v3, %v1392_v4 }
 0x251   :  { %7456 = vmatprep.subr.bf16.mxu1 %v9621_v27  ;;  %v732_v27 = vmax.f32 %v595_v11, 0.0  ;;  %v9661_v47 = vcombine.high %v1397_v22, %v1401_v23  ;;  %v9660_v41 = vcombine.low %v1397_v22, %v1401_v23  ;;  %v1429_v11 = vld [vmem:[#allocation8 + $0x1508] sm:$0xff]  ;;  %v1436_v22 = vld [vmem:[#allocation8 + $0x1540] sm:$0xff] }
 0x252   :  { %v1440_v23 = vld [vmem:[#allocation8 + $0x1560] sm:$0xff] }
 0x253   :  { %7129 = vmatpush1.bf16.msra.mxu0 %v9618_v34  ;;  %v1408_v34 = vld [vmem:[#allocation8 + $0x1460] sm:$0xff]  ;;  %v10877_v39 = vpack.c.bf16 %v732_v27, %v732_v27  ;;  %v1441_v27 = vld [vmem:[#allocation8 + $0x1568] sm:$0xff] }
 0x254   :  { %7457 = vmatpush1.bf16.msra.mxu1 %v9620_v35  ;;  %7130 = vmatprep.subr.bf16.mxu0 %v9627_v25  ;;  %v9658_v35 = vcombine.low %v1396_v18, %v1400_v24  ;;  %v1405_v25 = vld [vmem:[#allocation8 + $0x1448] sm:$0xff]  ;;  %v9667_v46 = vcombine.high %v1404_v31, %v1408_v34  ;;  %v9666_v55 = vcombine.low %v1404_v31, %v1408_v34  ;;  %v1444_v31 = vld [vmem:[#allocation8 + $0x1580] sm:$0xff] }
 0x255   :  { %7458 = vmatprep.subr.bf16.mxu1 %v9629_v37  ;;  %v1409_v37 = vld [vmem:[#allocation8 + $0x1468] sm:$0xff]  ;;  %v1448_v34 = vld [vmem:[#allocation8 + $0x15a0] sm:$0xff] }
 0x256   :  { %v9669_v33 = vcombine.high %v1405_v25, %v1409_v37  ;;  %v9668_v58 = vcombine.low %v1405_v25, %v1409_v37  ;;  %v1449_v25 = vld [vmem:[#allocation8 + $0x15a8] sm:$0xff]  ;;  %v9698_v37 = vcombine.low %v1436_v22, %v1440_v23 }
 0x257   :  { %7131 = vmatpush1.bf16.msra.mxu0 %v9626_v44  ;;  %v1416_v44 = vld [vmem:[#allocation8 + $0x14a0] sm:$0xff] }
 0x258   :  { %7459 = vmatpush1.bf16.msra.mxu1 %v9628_v52  ;;  %7132 = vmatprep.subr.bf16.mxu0 %v9635_v53  ;;  %v10879_v52 = vpack.c.bf16 %v735_v7, %v735_v7  ;;  %v1413_v53 = vld [vmem:[#allocation8 + $0x1488] sm:$0xff]  ;;  %v9675_v56 = vcombine.high %v1412_v43, %v1416_v44 }
 0x259   :  { %7460 = vmatprep.subr.bf16.mxu1 %v9637_v54  ;;  %v1417_v54 = vld [vmem:[#allocation8 + $0x14a8] sm:$0xff] }
 0x25a   :  { %v9677_v59 = vcombine.high %v1413_v53, %v1417_v54  ;;  %v9676_v3 = vcombine.low %v1413_v53, %v1417_v54  ;;  %v1453_v53 = vld [vmem:[#allocation8 + $0x15c8] sm:$0xff] }
 0x25b   :  { %7133 = vmatpush1.bf16.msra.mxu0 %v9634_v60  ;;  %v1420_v60 = vld [vmem:[#allocation8 + $0x14c0] sm:$0xff]  ;;  %v1457_v54 = vld [vmem:[#allocation8 + $0x15e8] sm:$0xff] }
 0x25c   :  { %7461 = vmatpush1.bf16.msra.mxu1 %v9636_v12  ;;  %7134 = vmatprep.subr.bf16.mxu0 %v9643_v63  ;;  %v1421_v12 = vld [vmem:[#allocation8 + $0x14c8] sm:$0xff]  ;;  %v9683_v4 = vcombine.high %v1420_v60, %v1424_v61 }
 0x25d   :  { %7462 = vmatprep.subr.bf16.mxu1 %v9645_v2  ;;  %v1425_v63 = vld [vmem:[#allocation8 + $0x14e8] sm:$0xff]  ;;  %v9674_v2 = vcombine.low %v1412_v43, %v1416_v44  ;;  %v1452_v44 = vld [vmem:[#allocation8 + $0x15c0] sm:$0xff] }
 0x25e   :  { %v9685_v5 = vcombine.high %v1421_v12, %v1425_v63 }
 0x25f   :  { %7135 = vmatpush1.bf16.msra.mxu0 %v9642_v6  ;;  %v1432_v6 = vld [vmem:[#allocation8 + $0x1520] sm:$0xff] }
 0x260   :  { %7463 = vmatpush1.bf16.msra.mxu1 %v9644_v17  ;;  %7136 = vmatprep.subr.bf16.mxu0 %v9651_v20  ;;  %v1433_v17 = vld [vmem:[#allocation8 + $0x1528] sm:$0xff]  ;;  %v9682_v20 = vcombine.low %v1420_v60, %v1424_v61  ;;  %v9691_v18 = vcombine.high %v1428_v51, %v1432_v6  ;;  %v1460_v60 = vld [vmem:[#allocation8 + $0x1600] sm:$0xff] }
 0x261   :  { %7464 = vmatprep.subr.bf16.mxu1 %v9653_v14  ;;  %v9684_v14 = vcombine.low %v1421_v12, %v1425_v63  ;;  %v9693_v24 = vcombine.high %v1429_v11, %v1433_v17  ;;  %v1464_v61 = vld [vmem:[#allocation8 + $0x1620] sm:$0xff]  ;;  %v1461_v12 = vld [vmem:[#allocation8 + $0x1608] sm:$0xff] }
 0x262   :  { %v1465_v63 = vld [vmem:[#allocation8 + $0x1628] sm:$0xff] }
 0x263   :  { %7137 = vmatpush1.bf16.msra.mxu0 %v9650_v26  ;;  %v1437_v26 = vld [vmem:[#allocation8 + $0x1548] sm:$0xff] }
 0x264   :  { %7465 = vmatpush1.bf16.msra.mxu1 %v9652_v28  ;;  %7147 = vmatprep.subr.bf16.mxu0 %v9659_v30  ;;  %v9690_v28 = vcombine.low %v1428_v51, %v1432_v6  ;;  %v9692_v30 = vcombine.low %v1429_v11, %v1433_v17  ;;  %v9701_v7 = vcombine.high %v1437_v26, %v1441_v27  ;;  %v1468_v51 = vld [vmem:[#allocation8 + $0x1640] sm:$0xff]  ;;  %v1469_v11 = vld [vmem:[#allocation8 + $0x1648] sm:$0xff] }
 0x265   :  { %7475 = vmatprep.subr.bf16.mxu1 %v9661_v47  ;;  %v9699_v47 = vcombine.high %v1436_v22, %v1440_v23  ;;  %v1472_v6 = vld [vmem:[#allocation8 + $0x1660] sm:$0xff]  ;;  %v1473_v17 = vld [vmem:[#allocation8 + $0x1668] sm:$0xff] }
 0x266   :  { %7139 = vmatmul.mubr.bf16.vlgmr.msra.gmra.mrb[16].mxu0 %v10877_v39  ;;  %v1476_v22 = vld [vmem:[#allocation8 + $0x1680] sm:$0xff] }
 0x267   :  { %7467 = vmatmul.mubr.bf16.vlgmr.msra.gmra.mrb[16].mxu1 %v10877_v39  ;;  %7148 = vmatpush1.bf16.msra.mxu0 %v9658_v35  ;;  %v1445_v35 = vld [vmem:[#allocation8 + $0x1588] sm:$0xff]  ;;  %v1480_v23 = vld [vmem:[#allocation8 + $0x16a0] sm:$0xff] }
 0x268   :  { %7179 = vmatprep.mubr.bf16.mxu0 %v10879_v52  ;;  %7476 = vmatpush1.bf16.msra.mxu1 %v9660_v41  ;;  %v9700_v41 = vcombine.low %v1437_v26, %v1441_v27  ;;  %v9709_v43 = vcombine.high %v1445_v35, %v1449_v25  ;;  %v1477_v26 = vld [vmem:[#allocation8 + $0x1688] sm:$0xff] }
 0x269   :  { %7507 = vmatprep.mubr.bf16.mxu1 %v10879_v52  ;;  %7149 = vmatprep.subr.bf16.mxu0 %v9667_v46  ;;  %v9707_v46 = vcombine.high %v1444_v31, %v1448_v34  ;;  %v1481_v27 = vld [vmem:[#allocation8 + $0x16a8] sm:$0xff] }
 0x26a   :  { %7477 = vmatprep.subr.bf16.mxu1 %v9669_v33  ;;  %v1456_v33 = vld [vmem:[#allocation8 + $0x15e0] sm:$0xff] }
 0x26b   :  { %7150 = vmatpush1.bf16.msra.mxu0 %v9666_v55  ;;  %v9706_v55 = vcombine.low %v1444_v31, %v1448_v34  ;;  %v1484_v31 = vld [vmem:[#allocation8 + $0x16c0] sm:$0xff] }
 0x26c   :  { %7478 = vmatpush1.bf16.msra.mxu1 %v9668_v58  ;;  %7151 = vmatprep.subr.bf16.mxu0 %v9675_v56  ;;  %v9708_v58 = vcombine.low %v1445_v35, %v1449_v25  ;;  %v9715_v56 = vcombine.high %v1452_v44, %v1456_v33  ;;  %v1488_v34 = vld [vmem:[#allocation8 + $0x16e0] sm:$0xff]  ;;  %v1485_v35 = vld [vmem:[#allocation8 + $0x16c8] sm:$0xff] }
 0x26d   :  { %7479 = vmatprep.subr.bf16.mxu1 %v9677_v59  ;;  %v9717_v59 = vcombine.high %v1453_v53, %v1457_v54  ;;  %v1489_v25 = vld [vmem:[#allocation8 + $0x16e8] sm:$0xff] }
 0x26f   :  { %7152 = vmatpush1.bf16.msra.mxu0 %v9674_v2  ;;  %v9714_v2 = vcombine.low %v1452_v44, %v1456_v33  ;;  %v1492_v44 = vld [vmem:[#allocation8 + $0x1700] sm:$0xff] }
 0x270   :  { %7480 = vmatpush1.bf16.msra.mxu1 %v9676_v3  ;;  %7153 = vmatprep.subr.bf16.mxu0 %v9683_v4  ;;  %v9716_v3 = vcombine.low %v1453_v53, %v1457_v54  ;;  %v9723_v4 = vcombine.high %v1460_v60, %v1464_v61  ;;  %v1496_v33 = vld [vmem:[#allocation8 + $0x1720] sm:$0xff]  ;;  %v1493_v53 = vld [vmem:[#allocation8 + $0x1708] sm:$0xff] }
 0x271   :  { %7481 = vmatprep.subr.bf16.mxu1 %v9685_v5  ;;  %v9725_v5 = vcombine.high %v1461_v12, %v1465_v63  ;;  %v1497_v54 = vld [vmem:[#allocation8 + $0x1728] sm:$0xff] }
 0x273   :  { %7154 = vmatpush1.bf16.msra.mxu0 %v9682_v20  ;;  %v9722_v20 = vcombine.low %v1460_v60, %v1464_v61  ;;  %v1500_v60 = vld [vmem:[#allocation8 + $0x1740] sm:$0xff] }
 0x274   :  { %7482 = vmatpush1.bf16.msra.mxu1 %v9684_v14  ;;  %7155 = vmatprep.subr.bf16.mxu0 %v9691_v18  ;;  %v9724_v14 = vcombine.low %v1461_v12, %v1465_v63  ;;  %v9731_v18 = vcombine.high %v1468_v51, %v1472_v6  ;;  %v1504_v61 = vld [vmem:[#allocation8 + $0x1760] sm:$0xff]  ;;  %v1501_v12 = vld [vmem:[#allocation8 + $0x1748] sm:$0xff] }
 0x275   :  { %7483 = vmatprep.subr.bf16.mxu1 %v9693_v24  ;;  %v9733_v24 = vcombine.high %v1469_v11, %v1473_v17  ;;  %v1505_v63 = vld [vmem:[#allocation8 + $0x1768] sm:$0xff] }
 0x277   :  { %7156 = vmatpush1.bf16.msra.mxu0 %v9690_v28  ;;  %v9730_v28 = vcombine.low %v1468_v51, %v1472_v6  ;;  %v1508_v51 = vld [vmem:[#allocation8 + $0x1780] sm:$0xff] }
 0x278   :  { %7484 = vmatpush1.bf16.msra.mxu1 %v9692_v30  ;;  %7157 = vmatprep.subr.bf16.mxu0 %v9699_v47  ;;  %v9732_v30 = vcombine.low %v1469_v11, %v1473_v17  ;;  %v9739_v47 = vcombine.high %v1476_v22, %v1480_v23  ;;  %v1512_v6 = vld [vmem:[#allocation8 + $0x17a0] sm:$0xff]  ;;  %v1509_v11 = vld [vmem:[#allocation8 + $0x1788] sm:$0xff] }
 0x279   :  { %7485 = vmatprep.subr.bf16.mxu1 %v9701_v7  ;;  %v9741_v7 = vcombine.high %v1477_v26, %v1481_v27  ;;  %v1513_v17 = vld [vmem:[#allocation8 + $0x17a8] sm:$0xff] }
 0x27b   :  { %7158 = vmatpush1.bf16.msra.mxu0 %v9698_v37  ;;  %v9738_v37 = vcombine.low %v1476_v22, %v1480_v23  ;;  %v1516_v22 = vld [vmem:[#allocation8 + $0x17c0] sm:$0xff] }
 0x27c   :  { %7486 = vmatpush1.bf16.msra.mxu1 %v9700_v41  ;;  %7159 = vmatprep.subr.bf16.mxu0 %v9707_v46  ;;  %v9740_v41 = vcombine.low %v1477_v26, %v1481_v27  ;;  %v9747_v46 = vcombine.high %v1484_v31, %v1488_v34  ;;  %v1520_v23 = vld [vmem:[#allocation8 + $0x17e0] sm:$0xff]  ;;  %v1517_v26 = vld [vmem:[#allocation8 + $0x17c8] sm:$0xff] }
 0x27d   :  { %7487 = vmatprep.subr.bf16.mxu1 %v9709_v43  ;;  %v9749_v43 = vcombine.high %v1485_v35, %v1489_v25  ;;  %v1521_v27 = vld [vmem:[#allocation8 + $0x17e8] sm:$0xff] }
 0x27f   :  { %7160 = vmatpush1.bf16.msra.mxu0 %v9706_v55  ;;  %v9746_v55 = vcombine.low %v1484_v31, %v1488_v34  ;;  %v1524_v31 = vld [vmem:[#allocation8 + $0x1800] sm:$0xff] }
 0x280   :  { %7488 = vmatpush1.bf16.msra.mxu1 %v9708_v58  ;;  %7161 = vmatprep.subr.bf16.mxu0 %v9715_v56  ;;  %v9748_v58 = vcombine.low %v1485_v35, %v1489_v25  ;;  %v9755_v56 = vcombine.high %v1492_v44, %v1496_v33  ;;  %v1528_v34 = vld [vmem:[#allocation8 + $0x1820] sm:$0xff]  ;;  %v1525_v35 = vld [vmem:[#allocation8 + $0x1808] sm:$0xff] }
 0x281   :  { %7489 = vmatprep.subr.bf16.mxu1 %v9717_v59  ;;  %v9757_v59 = vcombine.high %v1493_v53, %v1497_v54  ;;  %v1529_v25 = vld [vmem:[#allocation8 + $0x1828] sm:$0xff] }
 0x283   :  { %7162 = vmatpush1.bf16.msra.mxu0 %v9714_v2  ;;  %v9754_v2 = vcombine.low %v1492_v44, %v1496_v33  ;;  %v9789_v44 = vcombine.high %v1525_v35, %v1529_v25  ;;  %v737_v33 = vmax.f32 %v10824_v9, 0.0 }
 0x284   :  { %7490 = vmatpush1.bf16.msra.mxu1 %v9716_v3  ;;  %7163 = vmatprep.subr.bf16.mxu0 %v9723_v4  ;;  %v9756_v3 = vcombine.low %v1493_v53, %v1497_v54  ;;  %v9763_v4 = vcombine.high %v1500_v60, %v1504_v61  ;;  %v1532_v53 = vld [vmem:[#allocation8 + $0x1840] sm:$0xff] }
 0x285   :  { %7491 = vmatprep.subr.bf16.mxu1 %v9725_v5  ;;  %v9765_v5 = vcombine.high %v1501_v12, %v1505_v63  ;;  %v1536_v54 = vld [vmem:[#allocation8 + $0x1860] sm:$0xff] }
 0x287   :  { %7164 = vmatpush1.bf16.msra.mxu0 %v9722_v20  ;;  %v9762_v20 = vcombine.low %v1500_v60, %v1504_v61  ;;  %v9788_v60 = vcombine.low %v1525_v35, %v1529_v25  ;;  %v1540_v61 = vld [vmem:[#allocation8 + $0x1880] sm:$0xff] }
 0x288   :  { %7492 = vmatpush1.bf16.msra.mxu1 %v9724_v14  ;;  %7165 = vmatprep.subr.bf16.mxu0 %v9731_v18  ;;  %v9764_v14 = vcombine.low %v1501_v12, %v1505_v63  ;;  %v9771_v18 = vcombine.high %v1508_v51, %v1512_v6  ;;  %v1544_v12 = vld [vmem:[#allocation8 + $0x18a0] sm:$0xff]  ;;  %v10889_v63 = vpack.c.bf16 %v737_v33, %v737_v33 }
 0x289   :  { %7493 = vmatprep.subr.bf16.mxu1 %v9733_v24  ;;  %v9773_v24 = vcombine.high %v1509_v11, %v1513_v17  ;;  %v1564_v35 = vld [vmem:[#allocation8 + $0x1940] sm:$0xff] }
 0x28a   :  { %v1568_v25 = vld [vmem:[#allocation8 + $0x1960] sm:$0xff] }
 0x28b   :  { %7166 = vmatpush1.bf16.msra.mxu0 %v9730_v28  ;;  %v9770_v28 = vcombine.low %v1508_v51, %v1512_v6  ;;  %v9803_v51 = vcombine.high %v1540_v61, %v1544_v12 }
 0x28c   :  { %7494 = vmatpush1.bf16.msra.mxu1 %v9732_v30  ;;  %7167 = vmatprep.subr.bf16.mxu0 %v9739_v47  ;;  %v9772_v30 = vcombine.low %v1509_v11, %v1513_v17  ;;  %v9779_v47 = vcombine.high %v1516_v22, %v1520_v23  ;;  %v1548_v11 = vld [vmem:[#allocation8 + $0x18c0] sm:$0xff] }
 0x28d   :  { %7495 = vmatprep.subr.bf16.mxu1 %v9741_v7  ;;  %v9781_v7 = vcombine.high %v1517_v26, %v1521_v27  ;;  %v1552_v17 = vld [vmem:[#allocation8 + $0x18e0] sm:$0xff] }
 0x28f   :  { %7168 = vmatpush1.bf16.msra.mxu0 %v9738_v37  ;;  %v9778_v37 = vcombine.low %v1516_v22, %v1520_v23  ;;  %v9811_v22 = vcombine.high %v1548_v11, %v1552_v17 }
 0x290   :  { %7496 = vmatpush1.bf16.msra.mxu1 %v9740_v41  ;;  %7169 = vmatprep.subr.bf16.mxu0 %v9747_v46  ;;  %v734_v41 = vmax.f32 %v10802_v32, 0.0  ;;  %v9780_v46 = vcombine.low %v1517_v26, %v1521_v27  ;;  %v9795_v32 = vcombine.high %v1532_v53, %v1536_v54  ;;  %v1556_v26 = vld [vmem:[#allocation8 + $0x1900] sm:$0xff] }
 0x291   :  { %7497 = vmatprep.subr.bf16.mxu1 %v9749_v43  ;;  %v9787_v43 = vcombine.high %v1524_v31, %v1528_v34  ;;  %v1560_v27 = vld [vmem:[#allocation8 + $0x1920] sm:$0xff] }
 0x293   :  { %7170 = vmatpush1.bf16.msra.mxu0 %v9746_v55  ;;  %v9786_v55 = vcombine.low %v1524_v31, %v1528_v34  ;;  %v9819_v31 = vcombine.high %v1556_v26, %v1560_v27 }
 0x294   :  { %7498 = vmatpush1.bf16.msra.mxu1 %v9748_v58  ;;  %7171 = vmatprep.subr.bf16.mxu0 %v9755_v56  ;;  %v1533_v58 = vld [vmem:[#allocation8 + $0x1848] sm:$0xff] }
 0x295   :  { %7499 = vmatprep.subr.bf16.mxu1 %v9757_v59  ;;  %v1537_v56 = vld [vmem:[#allocation8 + $0x1868] sm:$0xff]  ;;  %v10887_v59 = vpack.c.bf16 %v734_v41, %v734_v41 }
 0x296   :  { %v9797_v9 = vcombine.high %v1533_v58, %v1537_v56  ;;  %v1569_v41 = vld [vmem:[#allocation8 + $0x1968] sm:$0xff] }
 0x297   :  { %7172 = vmatpush1.bf16.msra.mxu0 %v9754_v2  ;;  %v1541_v2 = vld [vmem:[#allocation8 + $0x1888] sm:$0xff] }
 0x298   :  { %7500 = vmatpush1.bf16.msra.mxu1 %v9756_v3  ;;  %7173 = vmatprep.subr.bf16.mxu0 %v9763_v4  ;;  %v1545_v3 = vld [vmem:[#allocation8 + $0x18a8] sm:$0xff]  ;;  %v9794_v4 = vcombine.low %v1532_v53, %v1536_v54  ;;  %v1572_v53 = vld [vmem:[#allocation8 + $0x1980] sm:$0xff] }
 0x299   :  { %7501 = vmatprep.subr.bf16.mxu1 %v9765_v5  ;;  %v9796_v5 = vcombine.low %v1533_v58, %v1537_v56  ;;  %v9805_v6 = vcombine.high %v1541_v2, %v1545_v3  ;;  %v1576_v54 = vld [vmem:[#allocation8 + $0x19a0] sm:$0xff]  ;;  %v1577_v58 = vld [vmem:[#allocation8 + $0x19a8] sm:$0xff]  ;;  %v9826_v56 = vcombine.low %v1564_v35, %v1568_v25 }
 0x29b   :  { %7174 = vmatpush1.bf16.msra.mxu0 %v9762_v20  ;;  %v1549_v20 = vld [vmem:[#allocation8 + $0x18c8] sm:$0xff] }
 0x29c   :  { %7502 = vmatpush1.bf16.msra.mxu1 %v9764_v14  ;;  %7175 = vmatprep.subr.bf16.mxu0 %v9771_v18  ;;  %v1553_v14 = vld [vmem:[#allocation8 + $0x18e8] sm:$0xff]  ;;  %v9802_v18 = vcombine.low %v1540_v61, %v1544_v12  ;;  %v1580_v12 = vld [vmem:[#allocation8 + $0x19c0] sm:$0xff] }
 0x29d   :  { %7503 = vmatprep.subr.bf16.mxu1 %v9773_v24  ;;  %v9804_v24 = vcombine.low %v1541_v2, %v1545_v3  ;;  %v9813_v23 = vcombine.high %v1549_v20, %v1553_v14  ;;  %v1581_v2 = vld [vmem:[#allocation8 + $0x19c8] sm:$0xff] }
 0x29e   :  { %v1585_v3 = vld [vmem:[#allocation8 + $0x19e8] sm:$0xff] }
 0x29f   :  { %7176 = vmatpush1.bf16.msra.mxu0 %v9770_v28  ;;  %v1557_v28 = vld [vmem:[#allocation8 + $0x1908] sm:$0xff] }
 0x2a0   :  { %7504 = vmatpush1.bf16.msra.mxu1 %v9772_v30  ;;  %7177 = vmatprep.subr.bf16.mxu0 %v9779_v47  ;;  %v1561_v30 = vld [vmem:[#allocation8 + $0x1928] sm:$0xff]  ;;  %v9810_v47 = vcombine.low %v1548_v11, %v1552_v17  ;;  %v1588_v11 = vld [vmem:[#allocation8 + $0x1a00] sm:$0xff] }
 0x2a1   :  { %7505 = vmatprep.subr.bf16.mxu1 %v9781_v7  ;;  %v9812_v7 = vcombine.low %v1549_v20, %v1553_v14  ;;  %v9821_v34 = vcombine.high %v1557_v28, %v1561_v30  ;;  %v1592_v17 = vld [vmem:[#allocation8 + $0x1a20] sm:$0xff]  ;;  %v1589_v20 = vld [vmem:[#allocation8 + $0x1a08] sm:$0xff] }
 0x2a2   :  { %v1593_v14 = vld [vmem:[#allocation8 + $0x1a28] sm:$0xff] }
 0x2a3   :  { %7178 = vmatpush1.bf16.msra.mxu0 %v9778_v37  ;;  %v1565_v37 = vld [vmem:[#allocation8 + $0x1948] sm:$0xff] }
 0x2a4   :  { %7506 = vmatpush1.bf16.msra.mxu1 %v9780_v46  ;;  %7188 = vmatprep.subr.bf16.mxu0 %v9787_v43  ;;  %v9818_v46 = vcombine.low %v1556_v26, %v1560_v27  ;;  %v9820_v43 = vcombine.low %v1557_v28, %v1561_v30  ;;  %v9829_v33 = vcombine.high %v1565_v37, %v1569_v41  ;;  %v1596_v26 = vld [vmem:[#allocation8 + $0x1a40] sm:$0xff]  ;;  %v1597_v28 = vld [vmem:[#allocation8 + $0x1a48] sm:$0xff] }
 0x2a5   :  { %7516 = vmatprep.subr.bf16.mxu1 %v9789_v44  ;;  %v9827_v44 = vcombine.high %v1564_v35, %v1568_v25  ;;  %v1600_v27 = vld [vmem:[#allocation8 + $0x1a60] sm:$0xff]  ;;  %v1601_v30 = vld [vmem:[#allocation8 + $0x1a68] sm:$0xff] }
 0x2a6   :  { %7180 = vmatmul.mubr.bf16.vlgmr.msra.gmra.mrb[16].mxu0 %v10887_v59  ;;  %v1604_v35 = vld [vmem:[#allocation8 + $0x1a80] sm:$0xff] }
 0x2a7   :  { %7508 = vmatmul.mubr.bf16.vlgmr.msra.gmra.mrb[16].mxu1 %v10887_v59  ;;  %7189 = vmatpush1.bf16.msra.mxu0 %v9786_v55  ;;  %v1573_v55 = vld [vmem:[#allocation8 + $0x1988] sm:$0xff]  ;;  %v1608_v25 = vld [vmem:[#allocation8 + $0x1aa0] sm:$0xff] }
 0x2a8   :  { %7220 = vmatprep.mubr.bf16.mxu0 %v10889_v63  ;;  %7517 = vmatpush1.bf16.msra.mxu1 %v9788_v60  ;;  %v9828_v60 = vcombine.low %v1565_v37, %v1569_v41  ;;  %v9837_v61 = vcombine.high %v1573_v55, %v1577_v58  ;;  %v1605_v37 = vld [vmem:[#allocation8 + $0x1a88] sm:$0xff] }
 0x2a9   :  { %7548 = vmatprep.mubr.bf16.mxu1 %v10889_v63  ;;  %7190 = vmatprep.subr.bf16.mxu0 %v9795_v32  ;;  %v9835_v32 = vcombine.high %v1572_v53, %v1576_v54  ;;  %v1609_v41 = vld [vmem:[#allocation8 + $0x1aa8] sm:$0xff] }
 0x2aa   :  { %7518 = vmatprep.subr.bf16.mxu1 %v9797_v9  ;;  %v1584_v9 = vld [vmem:[#allocation8 + $0x19e0] sm:$0xff] }
 0x2ab   :  { %7191 = vmatpush1.bf16.msra.mxu0 %v9794_v4  ;;  %v9834_v4 = vcombine.low %v1572_v53, %v1576_v54  ;;  %v1612_v53 = vld [vmem:[#allocation8 + $0x1ac0] sm:$0xff] }
 0x2ac   :  { %7519 = vmatpush1.bf16.msra.mxu1 %v9796_v5  ;;  %7192 = vmatprep.subr.bf16.mxu0 %v9803_v51  ;;  %v9836_v5 = vcombine.low %v1573_v55, %v1577_v58  ;;  %v9843_v51 = vcombine.high %v1580_v12, %v1584_v9  ;;  %v1616_v54 = vld [vmem:[#allocation8 + $0x1ae0] sm:$0xff]  ;;  %v1613_v55 = vld [vmem:[#allocation8 + $0x1ac8] sm:$0xff] }
 0x2ad   :  { %7520 = vmatprep.subr.bf16.mxu1 %v9805_v6  ;;  %v9845_v6 = vcombine.high %v1581_v2, %v1585_v3  ;;  %v1617_v58 = vld [vmem:[#allocation8 + $0x1ae8] sm:$0xff] }
 0x2af   :  { %7193 = vmatpush1.bf16.msra.mxu0 %v9802_v18  ;;  %v9842_v18 = vcombine.low %v1580_v12, %v1584_v9  ;;  %v1620_v12 = vld [vmem:[#allocation8 + $0x1b00] sm:$0xff] }
 0x2b0   :  { %7521 = vmatpush1.bf16.msra.mxu1 %v9804_v24  ;;  %7194 = vmatprep.subr.bf16.mxu0 %v9811_v22  ;;  %v9844_v24 = vcombine.low %v1581_v2, %v1585_v3  ;;  %v9851_v22 = vcombine.high %v1588_v11, %v1592_v17  ;;  %v1624_v9 = vld [vmem:[#allocation8 + $0x1b20] sm:$0xff]  ;;  %v1621_v2 = vld [vmem:[#allocation8 + $0x1b08] sm:$0xff] }
 0x2b1   :  { %7522 = vmatprep.subr.bf16.mxu1 %v9813_v23  ;;  %v9853_v23 = vcombine.high %v1589_v20, %v1593_v14  ;;  %v1625_v3 = vld [vmem:[#allocation8 + $0x1b28] sm:$0xff] }
 0x2b3   :  { %7195 = vmatpush1.bf16.msra.mxu0 %v9810_v47  ;;  %v9850_v47 = vcombine.low %v1588_v11, %v1592_v17  ;;  %v1628_v11 = vld [vmem:[#allocation8 + $0x1b40] sm:$0xff] }
 0x2b4   :  { %7523 = vmatpush1.bf16.msra.mxu1 %v9812_v7  ;;  %7196 = vmatprep.subr.bf16.mxu0 %v9819_v31  ;;  %v9852_v7 = vcombine.low %v1589_v20, %v1593_v14  ;;  %v9859_v31 = vcombine.high %v1596_v26, %v1600_v27  ;;  %v1632_v17 = vld [vmem:[#allocation8 + $0x1b60] sm:$0xff]  ;;  %v1629_v20 = vld [vmem:[#allocation8 + $0x1b48] sm:$0xff] }
 0x2b5   :  { %7524 = vmatprep.subr.bf16.mxu1 %v9821_v34  ;;  %v9861_v34 = vcombine.high %v1597_v28, %v1601_v30  ;;  %v1633_v14 = vld [vmem:[#allocation8 + $0x1b68] sm:$0xff] }
 0x2b7   :  { %7197 = vmatpush1.bf16.msra.mxu0 %v9818_v46  ;;  %v9858_v46 = vcombine.low %v1596_v26, %v1600_v27  ;;  %v1636_v26 = vld [vmem:[#allocation8 + $0x1b80] sm:$0xff] }
 0x2b8   :  { %7525 = vmatpush1.bf16.msra.mxu1 %v9820_v43  ;;  %7198 = vmatprep.subr.bf16.mxu0 %v9827_v44  ;;  %v9860_v43 = vcombine.low %v1597_v28, %v1601_v30  ;;  %v9867_v44 = vcombine.high %v1604_v35, %v1608_v25  ;;  %v1640_v27 = vld [vmem:[#allocation8 + $0x1ba0] sm:$0xff]  ;;  %v1637_v28 = vld [vmem:[#allocation8 + $0x1b88] sm:$0xff] }
 0x2b9   :  { %7526 = vmatprep.subr.bf16.mxu1 %v9829_v33  ;;  %v9869_v33 = vcombine.high %v1605_v37, %v1609_v41  ;;  %v1641_v30 = vld [vmem:[#allocation8 + $0x1ba8] sm:$0xff] }
 0x2bb   :  { %7199 = vmatpush1.bf16.msra.mxu0 %v9826_v56  ;;  %v9866_v56 = vcombine.low %v1604_v35, %v1608_v25  ;;  %v1644_v35 = vld [vmem:[#allocation8 + $0x1bc0] sm:$0xff] }
 0x2bc   :  { %7527 = vmatpush1.bf16.msra.mxu1 %v9828_v60  ;;  %7200 = vmatprep.subr.bf16.mxu0 %v9835_v32  ;;  %v9868_v60 = vcombine.low %v1605_v37, %v1609_v41  ;;  %v9875_v32 = vcombine.high %v1612_v53, %v1616_v54  ;;  %v1648_v25 = vld [vmem:[#allocation8 + $0x1be0] sm:$0xff]  ;;  %v1645_v37 = vld [vmem:[#allocation8 + $0x1bc8] sm:$0xff] }
 0x2bd   :  { %7528 = vmatprep.subr.bf16.mxu1 %v9837_v61  ;;  %v9877_v61 = vcombine.high %v1613_v55, %v1617_v58  ;;  %v1649_v41 = vld [vmem:[#allocation8 + $0x1be8] sm:$0xff] }
 0x2bf   :  { %7201 = vmatpush1.bf16.msra.mxu0 %v9834_v4  ;;  %v9874_v4 = vcombine.low %v1612_v53, %v1616_v54  ;;  %v1652_v53 = vld [vmem:[#allocation8 + $0x1c00] sm:$0xff] }
 0x2c0   :  { %7529 = vmatpush1.bf16.msra.mxu1 %v9836_v5  ;;  %7202 = vmatprep.subr.bf16.mxu0 %v9843_v51  ;;  %v9876_v5 = vcombine.low %v1613_v55, %v1617_v58  ;;  %v9883_v51 = vcombine.high %v1620_v12, %v1624_v9  ;;  %v1656_v54 = vld [vmem:[#allocation8 + $0x1c20] sm:$0xff]  ;;  %v1653_v55 = vld [vmem:[#allocation8 + $0x1c08] sm:$0xff] }
 0x2c1   :  { %7530 = vmatprep.subr.bf16.mxu1 %v9845_v6  ;;  %v9885_v6 = vcombine.high %v1621_v2, %v1625_v3  ;;  %v1657_v58 = vld [vmem:[#allocation8 + $0x1c28] sm:$0xff] }
 0x2c3   :  { %7203 = vmatpush1.bf16.msra.mxu0 %v9842_v18  ;;  %v9882_v18 = vcombine.low %v1620_v12, %v1624_v9  ;;  %v9917_v12 = vcombine.high %v1653_v55, %v1657_v58  ;;  %v739_v9 = vmax.f32 %v10828_v19, 0.0 }
 0x2c4   :  { %7531 = vmatpush1.bf16.msra.mxu1 %v9844_v24  ;;  %7204 = vmatprep.subr.bf16.mxu0 %v9851_v22  ;;  %v9884_v24 = vcombine.low %v1621_v2, %v1625_v3  ;;  %v9891_v22 = vcombine.high %v1628_v11, %v1632_v17  ;;  %v1660_v2 = vld [vmem:[#allocation8 + $0x1c40] sm:$0xff] }
 0x2c5   :  { %7532 = vmatprep.subr.bf16.mxu1 %v9853_v23  ;;  %v9893_v23 = vcombine.high %v1629_v20, %v1633_v14  ;;  %v1664_v3 = vld [vmem:[#allocation8 + $0x1c60] sm:$0xff] }
 0x2c7   :  { %7205 = vmatpush1.bf16.msra.mxu0 %v9850_v47  ;;  %v9890_v47 = vcombine.low %v1628_v11, %v1632_v17  ;;  %v9916_v11 = vcombine.low %v1653_v55, %v1657_v58  ;;  %v1668_v17 = vld [vmem:[#allocation8 + $0x1c80] sm:$0xff] }
 0x2c8   :  { %7533 = vmatpush1.bf16.msra.mxu1 %v9852_v7  ;;  %7206 = vmatprep.subr.bf16.mxu0 %v9859_v31  ;;  %v9892_v7 = vcombine.low %v1629_v20, %v1633_v14  ;;  %v9899_v31 = vcombine.high %v1636_v26, %v1640_v27  ;;  %v1672_v20 = vld [vmem:[#allocation8 + $0x1ca0] sm:$0xff]  ;;  %v10899_v14 = vpack.c.bf16 %v739_v9, %v739_v9 }
 0x2c9   :  { %7534 = vmatprep.subr.bf16.mxu1 %v9861_v34  ;;  %v9901_v34 = vcombine.high %v1637_v28, %v1641_v30  ;;  %v1692_v55 = vld [vmem:[#allocation8 + $0x1d40] sm:$0xff] }
 0x2ca   :  { %v1696_v58 = vld [vmem:[#allocation8 + $0x1d60] sm:$0xff] }
 0x2cb   :  { %7207 = vmatpush1.bf16.msra.mxu0 %v9858_v46  ;;  %v9898_v46 = vcombine.low %v1636_v26, %v1640_v27  ;;  %v9931_v26 = vcombine.high %v1668_v17, %v1672_v20 }
 0x2cc   :  { %7535 = vmatpush1.bf16.msra.mxu1 %v9860_v43  ;;  %7208 = vmatprep.subr.bf16.mxu0 %v9867_v44  ;;  %v9900_v43 = vcombine.low %v1637_v28, %v1641_v30  ;;  %v9907_v44 = vcombine.high %v1644_v35, %v1648_v25  ;;  %v1676_v28 = vld [vmem:[#allocation8 + $0x1cc0] sm:$0xff] }
 0x2cd   :  { %7536 = vmatprep.subr.bf16.mxu1 %v9869_v33  ;;  %v9909_v33 = vcombine.high %v1645_v37, %v1649_v41  ;;  %v1680_v30 = vld [vmem:[#allocation8 + $0x1ce0] sm:$0xff] }
 0x2cf   :  { %7209 = vmatpush1.bf16.msra.mxu0 %v9866_v56  ;;  %v9906_v56 = vcombine.low %v1644_v35, %v1648_v25  ;;  %v9939_v35 = vcombine.high %v1676_v28, %v1680_v30 }
 0x2d0   :  { %7537 = vmatpush1.bf16.msra.mxu1 %v9868_v60  ;;  %7210 = vmatprep.subr.bf16.mxu0 %v9875_v32  ;;  %v736_v60 = vmax.f32 %v10822_v1, 0.0  ;;  %v9908_v32 = vcombine.low %v1645_v37, %v1649_v41  ;;  %v9923_v1 = vcombine.high %v1660_v2, %v1664_v3  ;;  %v1684_v37 = vld [vmem:[#allocation8 + $0x1d00] sm:$0xff] }
 0x2d1   :  { %7538 = vmatprep.subr.bf16.mxu1 %v9877_v61  ;;  %v9915_v61 = vcombine.high %v1652_v53, %v1656_v54  ;;  %v1688_v41 = vld [vmem:[#allocation8 + $0x1d20] sm:$0xff] }
 0x2d3   :  { %7211 = vmatpush1.bf16.msra.mxu0 %v9874_v4  ;;  %v9914_v4 = vcombine.low %v1652_v53, %v1656_v54  ;;  %v9947_v53 = vcombine.high %v1684_v37, %v1688_v41 }
 0x2d4   :  { %7539 = vmatpush1.bf16.msra.mxu1 %v9876_v5  ;;  %7212 = vmatprep.subr.bf16.mxu0 %v9883_v51  ;;  %v1661_v5 = vld [vmem:[#allocation8 + $0x1c48] sm:$0xff] }
 0x2d5   :  { %7540 = vmatprep.subr.bf16.mxu1 %v9885_v6  ;;  %v1665_v51 = vld [vmem:[#allocation8 + $0x1c68] sm:$0xff]  ;;  %v10897_v6 = vpack.c.bf16 %v736_v60, %v736_v60 }
 0x2d6   :  { %v9925_v19 = vcombine.high %v1661_v5, %v1665_v51  ;;  %v1697_v60 = vld [vmem:[#allocation8 + $0x1d68] sm:$0xff] }
 0x2d7   :  { %7213 = vmatpush1.bf16.msra.mxu0 %v9882_v18  ;;  %v1669_v18 = vld [vmem:[#allocation8 + $0x1c88] sm:$0xff] }
 0x2d8   :  { %7541 = vmatpush1.bf16.msra.mxu1 %v9884_v24  ;;  %7214 = vmatprep.subr.bf16.mxu0 %v9891_v22  ;;  %v1673_v24 = vld [vmem:[#allocation8 + $0x1ca8] sm:$0xff]  ;;  %v9922_v22 = vcombine.low %v1660_v2, %v1664_v3  ;;  %v1700_v2 = vld [vmem:[#allocation8 + $0x1d80] sm:$0xff] }
 0x2d9   :  { %7542 = vmatprep.subr.bf16.mxu1 %v9893_v23  ;;  %v9924_v23 = vcombine.low %v1661_v5, %v1665_v51  ;;  %v9933_v27 = vcombine.high %v1669_v18, %v1673_v24  ;;  %v1704_v3 = vld [vmem:[#allocation8 + $0x1da0] sm:$0xff]  ;;  %v1705_v5 = vld [vmem:[#allocation8 + $0x1da8] sm:$0xff]  ;;  %v9954_v51 = vcombine.low %v1692_v55, %v1696_v58 }
 0x2db   :  { %7215 = vmatpush1.bf16.msra.mxu0 %v9890_v47  ;;  %v1677_v47 = vld [vmem:[#allocation8 + $0x1cc8] sm:$0xff] }
 0x2dc   :  { %7543 = vmatpush1.bf16.msra.mxu1 %v9892_v7  ;;  %7216 = vmatprep.subr.bf16.mxu0 %v9899_v31  ;;  %v1681_v7 = vld [vmem:[#allocation8 + $0x1ce8] sm:$0xff]  ;;  %v9930_v31 = vcombine.low %v1668_v17, %v1672_v20  ;;  %v1708_v20 = vld [vmem:[#allocation8 + $0x1dc0] sm:$0xff] }
 0x2dd   :  { %7544 = vmatprep.subr.bf16.mxu1 %v9901_v34  ;;  %v9932_v34 = vcombine.low %v1669_v18, %v1673_v24  ;;  %v9941_v25 = vcombine.high %v1677_v47, %v1681_v7  ;;  %v1709_v18 = vld [vmem:[#allocation8 + $0x1dc8] sm:$0xff] }
 0x2de   :  { %v1713_v24 = vld [vmem:[#allocation8 + $0x1de8] sm:$0xff] }
 0x2df   :  { %7217 = vmatpush1.bf16.msra.mxu0 %v9898_v46  ;;  %v1685_v46 = vld [vmem:[#allocation8 + $0x1d08] sm:$0xff] }
 0x2e0   :  { %7545 = vmatpush1.bf16.msra.mxu1 %v9900_v43  ;;  %7218 = vmatprep.subr.bf16.mxu0 %v9907_v44  ;;  %v1689_v43 = vld [vmem:[#allocation8 + $0x1d28] sm:$0xff]  ;;  %v9938_v44 = vcombine.low %v1676_v28, %v1680_v30  ;;  %v1716_v28 = vld [vmem:[#allocation8 + $0x1e00] sm:$0xff] }
 0x2e1   :  { %7546 = vmatprep.subr.bf16.mxu1 %v9909_v33  ;;  %v9940_v33 = vcombine.low %v1677_v47, %v1681_v7  ;;  %v9949_v54 = vcombine.high %v1685_v46, %v1689_v43  ;;  %v1720_v30 = vld [vmem:[#allocation8 + $0x1e20] sm:$0xff]  ;;  %v1717_v47 = vld [vmem:[#allocation8 + $0x1e08] sm:$0xff] }
 0x2e2   :  { %v1721_v7 = vld [vmem:[#allocation8 + $0x1e28] sm:$0xff] }
 0x2e3   :  { %7219 = vmatpush1.bf16.msra.mxu0 %v9906_v56  ;;  %v1693_v56 = vld [vmem:[#allocation8 + $0x1d48] sm:$0xff] }
 0x2e4   :  { %7547 = vmatpush1.bf16.msra.mxu1 %v9908_v32  ;;  %7229 = vmatprep.subr.bf16.mxu0 %v9915_v61  ;;  %v9946_v32 = vcombine.low %v1684_v37, %v1688_v41  ;;  %v9948_v61 = vcombine.low %v1685_v46, %v1689_v43  ;;  %v9957_v9 = vcombine.high %v1693_v56, %v1697_v60  ;;  %v1724_v37 = vld [vmem:[#allocation8 + $0x1e40] sm:$0xff]  ;;  %v1725_v46 = vld [vmem:[#allocation8 + $0x1e48] sm:$0xff] }
 0x2e5   :  { %7557 = vmatprep.subr.bf16.mxu1 %v9917_v12  ;;  %v9955_v12 = vcombine.high %v1692_v55, %v1696_v58  ;;  %v1728_v41 = vld [vmem:[#allocation8 + $0x1e60] sm:$0xff]  ;;  %v1729_v43 = vld [vmem:[#allocation8 + $0x1e68] sm:$0xff] }
 0x2e6   :  { %7221 = vmatmul.mubr.bf16.vlgmr.msra.gmra.mrb[16].mxu0 %v10897_v6  ;;  %v1732_v55 = vld [vmem:[#allocation8 + $0x1e80] sm:$0xff] }
 0x2e7   :  { %7549 = vmatmul.mubr.bf16.vlgmr.msra.gmra.mrb[16].mxu1 %v10897_v6  ;;  %7230 = vmatpush1.bf16.msra.mxu0 %v9914_v4  ;;  %v1701_v4 = vld [vmem:[#allocation8 + $0x1d88] sm:$0xff]  ;;  %v1736_v58 = vld [vmem:[#allocation8 + $0x1ea0] sm:$0xff] }
 0x2e8   :  { %7261 = vmatprep.mubr.bf16.mxu0 %v10899_v14  ;;  %7558 = vmatpush1.bf16.msra.mxu1 %v9916_v11  ;;  %v9956_v11 = vcombine.low %v1693_v56, %v1697_v60  ;;  %v9965_v17 = vcombine.high %v1701_v4, %v1705_v5  ;;  %v1733_v56 = vld [vmem:[#allocation8 + $0x1e88] sm:$0xff] }
 0x2e9   :  { %7589 = vmatprep.mubr.bf16.mxu1 %v10899_v14  ;;  %7231 = vmatprep.subr.bf16.mxu0 %v9923_v1  ;;  %v9963_v1 = vcombine.high %v1700_v2, %v1704_v3  ;;  %v1737_v60 = vld [vmem:[#allocation8 + $0x1ea8] sm:$0xff] }
 0x2ea   :  { %7559 = vmatprep.subr.bf16.mxu1 %v9925_v19  ;;  %v1712_v19 = vld [vmem:[#allocation8 + $0x1de0] sm:$0xff] }
 0x2eb   :  { %7232 = vmatpush1.bf16.msra.mxu0 %v9922_v22  ;;  %v9962_v22 = vcombine.low %v1700_v2, %v1704_v3  ;;  %v1740_v2 = vld [vmem:[#allocation8 + $0x1ec0] sm:$0xff] }
 0x2ec   :  { %7560 = vmatpush1.bf16.msra.mxu1 %v9924_v23  ;;  %7233 = vmatprep.subr.bf16.mxu0 %v9931_v26  ;;  %v9964_v23 = vcombine.low %v1701_v4, %v1705_v5  ;;  %v9971_v26 = vcombine.high %v1708_v20, %v1712_v19  ;;  %v1744_v3 = vld [vmem:[#allocation8 + $0x1ee0] sm:$0xff]  ;;  %v1741_v4 = vld [vmem:[#allocation8 + $0x1ec8] sm:$0xff] }
 0x2ed   :  { %7561 = vmatprep.subr.bf16.mxu1 %v9933_v27  ;;  %v9973_v27 = vcombine.high %v1709_v18, %v1713_v24  ;;  %v1745_v5 = vld [vmem:[#allocation8 + $0x1ee8] sm:$0xff] }
 0x2ef   :  { %7234 = vmatpush1.bf16.msra.mxu0 %v9930_v31  ;;  %v9970_v31 = vcombine.low %v1708_v20, %v1712_v19  ;;  %v1748_v20 = vld [vmem:[#allocation8 + $0x1f00] sm:$0xff] }
 0x2f0   :  { %7562 = vmatpush1.bf16.msra.mxu1 %v9932_v34  ;;  %7235 = vmatprep.subr.bf16.mxu0 %v9939_v35  ;;  %v9972_v34 = vcombine.low %v1709_v18, %v1713_v24  ;;  %v9979_v35 = vcombine.high %v1716_v28, %v1720_v30  ;;  %v1752_v19 = vld [vmem:[#allocation8 + $0x1f20] sm:$0xff]  ;;  %v1749_v18 = vld [vmem:[#allocation8 + $0x1f08] sm:$0xff] }
 0x2f1   :  { %7563 = vmatprep.subr.bf16.mxu1 %v9941_v25  ;;  %v9981_v25 = vcombine.high %v1717_v47, %v1721_v7  ;;  %v1753_v24 = vld [vmem:[#allocation8 + $0x1f28] sm:$0xff] }
 0x2f3   :  { %7236 = vmatpush1.bf16.msra.mxu0 %v9938_v44  ;;  %v9978_v44 = vcombine.low %v1716_v28, %v1720_v30  ;;  %v1756_v28 = vld [vmem:[#allocation8 + $0x1f40] sm:$0xff] }
 0x2f4   :  { %7564 = vmatpush1.bf16.msra.mxu1 %v9940_v33  ;;  %7237 = vmatprep.subr.bf16.mxu0 %v9947_v53  ;;  %v9980_v33 = vcombine.low %v1717_v47, %v1721_v7  ;;  %v9987_v53 = vcombine.high %v1724_v37, %v1728_v41  ;;  %v1760_v30 = vld [vmem:[#allocation8 + $0x1f60] sm:$0xff]  ;;  %v1757_v47 = vld [vmem:[#allocation8 + $0x1f48] sm:$0xff] }
 0x2f5   :  { %7565 = vmatprep.subr.bf16.mxu1 %v9949_v54  ;;  %v9989_v54 = vcombine.high %v1725_v46, %v1729_v43  ;;  %v1761_v7 = vld [vmem:[#allocation8 + $0x1f68] sm:$0xff] }
 0x2f7   :  { %7238 = vmatpush1.bf16.msra.mxu0 %v9946_v32  ;;  %v9986_v32 = vcombine.low %v1724_v37, %v1728_v41  ;;  %v1764_v37 = vld [vmem:[#allocation8 + $0x1f80] sm:$0xff] }
 0x2f8   :  { %7566 = vmatpush1.bf16.msra.mxu1 %v9948_v61  ;;  %7239 = vmatprep.subr.bf16.mxu0 %v9955_v12  ;;  %v9988_v61 = vcombine.low %v1725_v46, %v1729_v43  ;;  %v9995_v12 = vcombine.high %v1732_v55, %v1736_v58  ;;  %v1768_v41 = vld [vmem:[#allocation8 + $0x1fa0] sm:$0xff]  ;;  %v1765_v46 = vld [vmem:[#allocation8 + $0x1f88] sm:$0xff] }
 0x2f9   :  { %7567 = vmatprep.subr.bf16.mxu1 %v9957_v9  ;;  %v9997_v9 = vcombine.high %v1733_v56, %v1737_v60  ;;  %v1769_v43 = vld [vmem:[#allocation8 + $0x1fa8] sm:$0xff] }
 0x2fb   :  { %7240 = vmatpush1.bf16.msra.mxu0 %v9954_v51  ;;  %v9994_v51 = vcombine.low %v1732_v55, %v1736_v58  ;;  %v1772_v55 = vld [vmem:[#allocation8 + $0x1fc0] sm:$0xff] }
 0x2fc   :  { %7568 = vmatpush1.bf16.msra.mxu1 %v9956_v11  ;;  %7241 = vmatprep.subr.bf16.mxu0 %v9963_v1  ;;  %v9996_v11 = vcombine.low %v1733_v56, %v1737_v60  ;;  %v10003_v1 = vcombine.high %v1740_v2, %v1744_v3  ;;  %v1776_v58 = vld [vmem:[#allocation8 + $0x1fe0] sm:$0xff]  ;;  %v1773_v56 = vld [vmem:[#allocation8 + $0x1fc8] sm:$0xff] }
 0x2fd   :  { %7569 = vmatprep.subr.bf16.mxu1 %v9965_v17  ;;  %v10005_v17 = vcombine.high %v1741_v4, %v1745_v5  ;;  %v1777_v60 = vld [vmem:[#allocation8 + $0x1fe8] sm:$0xff] }
 0x2ff   :  { %7242 = vmatpush1.bf16.msra.mxu0 %v9962_v22  ;;  %v10002_v22 = vcombine.low %v1740_v2, %v1744_v3  ;;  %v758_v2 = vld [vmem:[#allocation8 + $0x10] sm:$0xff] }
 0x300   :  { %7570 = vmatpush1.bf16.msra.mxu1 %v9964_v23  ;;  %7243 = vmatprep.subr.bf16.mxu0 %v9971_v26  ;;  %v10004_v23 = vcombine.low %v1741_v4, %v1745_v5  ;;  %v10011_v26 = vcombine.high %v1748_v20, %v1752_v19  ;;  %v762_v3 = vld [vmem:[#allocation8 + $0x30] sm:$0xff]  ;;  %v759_v4 = vld [vmem:[#allocation8 + $0x18] sm:$0xff] }
 0x301   :  { %7571 = vmatprep.subr.bf16.mxu1 %v9973_v27  ;;  %v10013_v27 = vcombine.high %v1749_v18, %v1753_v24  ;;  %v763_v5 = vld [vmem:[#allocation8 + $0x38] sm:$0xff] }
 0x303   :  { %7244 = vmatpush1.bf16.msra.mxu0 %v9970_v31  ;;  %v10010_v31 = vcombine.low %v1748_v20, %v1752_v19  ;;  %v9025_v20 = vcombine.high %v759_v4, %v763_v5  ;;  %v766_v19 = vld [vmem:[#allocation8 + $0x50] sm:$0xff] }
 0x304   :  { %7572 = vmatpush1.bf16.msra.mxu1 %v9972_v34  ;;  %7245 = vmatprep.subr.bf16.mxu0 %v9979_v35  ;;  %v10012_v34 = vcombine.low %v1749_v18, %v1753_v24  ;;  %v10019_v35 = vcombine.high %v1756_v28, %v1760_v30  ;;  %v770_v18 = vld [vmem:[#allocation8 + $0x70] sm:$0xff]  ;;  %v9022_v24 = vcombine.low %v758_v2, %v762_v3 }
 0x305   :  { %7573 = vmatprep.subr.bf16.mxu1 %v9981_v25  ;;  %v10021_v25 = vcombine.high %v1757_v47, %v1761_v7 }
 0x307   :  { %7246 = vmatpush1.bf16.msra.mxu0 %v9978_v44  ;;  %v10018_v44 = vcombine.low %v1756_v28, %v1760_v30  ;;  %v9031_v28 = vcombine.high %v766_v19, %v770_v18  ;;  %v778_v30 = vld [vmem:[#allocation8 + $0xb0] sm:$0xff] }
 0x308   :  { %7574 = vmatpush1.bf16.msra.mxu1 %v9980_v33  ;;  %7247 = vmatprep.subr.bf16.mxu0 %v9987_v53  ;;  %v10020_v33 = vcombine.low %v1757_v47, %v1761_v7  ;;  %v10027_v53 = vcombine.high %v1764_v37, %v1768_v41  ;;  %v775_v7 = vld [vmem:[#allocation8 + $0x98] sm:$0xff] }
 0x309   :  { %7575 = vmatprep.subr.bf16.mxu1 %v9989_v54  ;;  %v10029_v54 = vcombine.high %v1765_v46, %v1769_v43 }
 0x30b   :  { %7248 = vmatpush1.bf16.msra.mxu0 %v9986_v32  ;;  %v10026_v32 = vcombine.low %v1764_v37, %v1768_v41  ;;  %v782_v41 = vld [vmem:[#allocation8 + $0xd0] sm:$0xff] }
 0x30c   :  { %7576 = vmatpush1.bf16.msra.mxu1 %v9988_v61  ;;  %7249 = vmatprep.subr.bf16.mxu0 %v9995_v12  ;;  %v10028_v61 = vcombine.low %v1765_v46, %v1769_v43  ;;  %v10035_v12 = vcombine.high %v1772_v55, %v1776_v58  ;;  %v786_v46 = vld [vmem:[#allocation8 + $0xf0] sm:$0xff]  ;;  %v783_v43 = vld [vmem:[#allocation8 + $0xd8] sm:$0xff] }
 0x30d   :  { %7577 = vmatprep.subr.bf16.mxu1 %v9997_v9  ;;  %v10037_v9 = vcombine.high %v1773_v56, %v1777_v60 }
 0x30f   :  { %7250 = vmatpush1.bf16.msra.mxu0 %v9994_v51  ;;  %v10034_v51 = vcombine.low %v1772_v55, %v1776_v58  ;;  %v790_v58 = vld [vmem:[#allocation8 + $0x110] sm:$0xff] }
 0x310   :  { %7578 = vmatpush1.bf16.msra.mxu1 %v9996_v11  ;;  %7251 = vmatprep.subr.bf16.mxu0 %v10003_v1  ;;  %v738_v11 = vmax.f32 %v10826_v10, 0.0  ;;  %v10036_v1 = vcombine.low %v1773_v56, %v1777_v60  ;;  %v774_v10 = vld [vmem:[#allocation8 + $0x90] sm:$0xff]  ;;  %v791_v60 = vld [vmem:[#allocation8 + $0x118] sm:$0xff] }
 0x311   :  { %7579 = vmatprep.subr.bf16.mxu1 %v10005_v17  ;;  %v9023_v17 = vcombine.high %v758_v2, %v762_v3  ;;  %v794_v56 = vld [vmem:[#allocation8 + $0x130] sm:$0xff] }
 0x312   :  { %v798_v2 = vld [vmem:[#allocation8 + $0x150] sm:$0xff] }
 0x313   :  { %7252 = vmatpush1.bf16.msra.mxu0 %v10002_v22  ;;  %v767_v22 = vld [vmem:[#allocation8 + $0x58] sm:$0xff]  ;;  %v802_v3 = vld [vmem:[#allocation8 + $0x170] sm:$0xff] }
 0x314   :  { %7580 = vmatpush1.bf16.msra.mxu1 %v10004_v23  ;;  %7253 = vmatprep.subr.bf16.mxu0 %v10011_v26  ;;  %v771_v23 = vld [vmem:[#allocation8 + $0x78] sm:$0xff]  ;;  %v10906_v26 = vpack.c.bf16 %v738_v11, %v738_v11 }
 0x315   :  { %7581 = vmatprep.subr.bf16.mxu1 %v10013_v27  ;;  %v9024_v27 = vcombine.low %v759_v4, %v763_v5  ;;  %v9033_v47 = vcombine.high %v767_v22, %v771_v23  ;;  %v799_v4 = vld [vmem:[#allocation8 + $0x158] sm:$0xff] }
 0x316   :  { %v803_v5 = vld [vmem:[#allocation8 + $0x178] sm:$0xff] }
 0x317   :  { %7254 = vmatpush1.bf16.msra.mxu0 %v10010_v31  ;;  %v779_v31 = vld [vmem:[#allocation8 + $0xb8] sm:$0xff] }
 0x318   :  { %7582 = vmatpush1.bf16.msra.mxu1 %v10012_v34  ;;  %7255 = vmatprep.subr.bf16.mxu0 %v10019_v35  ;;  %v9030_v34 = vcombine.low %v766_v19, %v770_v18  ;;  %v9032_v35 = vcombine.low %v767_v22, %v771_v23  ;;  %v9041_v37 = vcombine.high %v775_v7, %v779_v31  ;;  %v810_v19 = vld [vmem:[#allocation8 + $0x1b0] sm:$0xff]  ;;  %v807_v18 = vld [vmem:[#allocation8 + $0x198] sm:$0xff] }
 0x319   :  { %7583 = vmatprep.subr.bf16.mxu1 %v10021_v25  ;;  %v9039_v25 = vcombine.high %v774_v10, %v778_v30  ;;  %v9062_v22 = vcombine.low %v798_v2, %v802_v3  ;;  %v9064_v23 = vcombine.low %v799_v4, %v803_v5 }
 0x31b   :  { %7256 = vmatpush1.bf16.msra.mxu0 %v10018_v44  ;;  %v787_v44 = vld [vmem:[#allocation8 + $0xf8] sm:$0xff] }
 0x31c   :  { %7584 = vmatpush1.bf16.msra.mxu1 %v10020_v33  ;;  %7257 = vmatprep.subr.bf16.mxu0 %v10027_v53  ;;  %v9038_v33 = vcombine.low %v774_v10, %v778_v30  ;;  %v9040_v53 = vcombine.low %v775_v7, %v779_v31  ;;  %v9049_v55 = vcombine.high %v783_v43, %v787_v44  ;;  %v814_v10 = vld [vmem:[#allocation8 + $0x1d0] sm:$0xff]  ;;  %v819_v7 = vld [vmem:[#allocation8 + $0x1f8] sm:$0xff] }
 0x31d   :  { %7585 = vmatprep.subr.bf16.mxu1 %v10029_v54  ;;  %v9047_v54 = vcombine.high %v782_v41, %v786_v46  ;;  %v818_v30 = vld [vmem:[#allocation8 + $0x1f0] sm:$0xff] }
 0x31f   :  { %7258 = vmatpush1.bf16.msra.mxu0 %v10026_v32  ;;  %v795_v32 = vld [vmem:[#allocation8 + $0x138] sm:$0xff] }
 0x320   :  { %7586 = vmatpush1.bf16.msra.mxu1 %v10028_v61  ;;  %7259 = vmatprep.subr.bf16.mxu0 %v10035_v12  ;;  %v9048_v61 = vcombine.low %v783_v43, %v787_v44  ;;  %v9055_v12 = vcombine.high %v790_v58, %v794_v56  ;;  %v9056_v11 = vcombine.low %v791_v60, %v795_v32  ;;  %v827_v43 = vld [vmem:[#allocation8 + $0x238] sm:$0xff] }
 0x321   :  { %7587 = vmatprep.subr.bf16.mxu1 %v10037_v9  ;;  %v9057_v9 = vcombine.high %v791_v60, %v795_v32  ;;  %v9078_v44 = vcombine.low %v814_v10, %v818_v30  ;;  %v835_v60 = vld [vmem:[#allocation8 + $0x278] sm:$0xff] }
 0x323   :  { %7260 = vmatpush1.bf16.msra.mxu0 %v10034_v51  ;;  %v9054_v51 = vcombine.low %v790_v58, %v794_v56  ;;  %v834_v58 = vld [vmem:[#allocation8 + $0x270] sm:$0xff]  ;;  %v831_v56 = vld [vmem:[#allocation8 + $0x258] sm:$0xff] }
 0x324   :  { %7588 = vmatpush1.bf16.msra.mxu1 %v10036_v1  ;;  %7598 = vmatprep.subr.bf16.mxu0 %v9023_v17  ;;  %v9063_v1 = vcombine.high %v798_v2, %v802_v3  ;;  %v9065_v17 = vcombine.high %v799_v4, %v803_v5  ;;  %v842_v2 = vld [vmem:[#allocation8 + $0x2b0] sm:$0xff]  ;;  %v839_v3 = vld [vmem:[#allocation8 + $0x298] sm:$0xff] }
 0x325   :  { %7926 = vmatprep.subr.bf16.mxu1 %v9025_v20  ;;  %v806_v20 = vld [vmem:[#allocation8 + $0x190] sm:$0xff]  ;;  %v843_v4 = vld [vmem:[#allocation8 + $0x2b8] sm:$0xff] }
 0x326   :  { %7262 = vmatmul.mubr.bf16.vlgmr.msra.gmra.mrb[16].mxu0 %v10906_v26  ;;  %v9070_v31 = vcombine.low %v806_v20, %v810_v19 }
 0x327   :  { %7590 = vmatmul.mubr.bf16.vlgmr.msra.gmra.mrb[16].mxu1 %v10906_v26  ;;  %7599 = vmatpush1.bf16.msra.mxu0 %v9022_v24  ;;  %v811_v24 = vld [vmem:[#allocation8 + $0x1b8] sm:$0xff] }
 0x328   :  { %7630 = vmatprep.mubr.bf16.mxu0 %v10773_v36  ;;  %7927 = vmatpush1.bf16.msra.mxu1 %v9024_v27  ;;  %v9071_v27 = vcombine.high %v806_v20, %v810_v19  ;;  %v850_v20 = vld [vmem:[#allocation8 + $0x2f0] sm:$0xff]  ;;  %v847_v19 = vld [vmem:[#allocation8 + $0x2d8] sm:$0xff] }
 0x329   :  { %7958 = vmatprep.mubr.bf16.mxu1 %v10773_v36  ;;  %7600 = vmatprep.subr.bf16.mxu0 %v9031_v28  ;;  %v9046_v36 = vcombine.low %v782_v41, %v786_v46  ;;  %v9073_v28 = vcombine.high %v807_v18, %v811_v24  ;;  %v826_v41 = vld [vmem:[#allocation8 + $0x230] sm:$0xff]  ;;  %v823_v46 = vld [vmem:[#allocation8 + $0x218] sm:$0xff] }
 0x32a   :  { %7928 = vmatprep.subr.bf16.mxu1 %v9033_v47  ;;  %v815_v47 = vld [vmem:[#allocation8 + $0x1d8] sm:$0xff] }
 0x32b   :  { %7601 = vmatpush1.bf16.msra.mxu0 %v9030_v34  ;;  %v9072_v34 = vcombine.low %v807_v18, %v811_v24  ;;  %v851_v18 = vld [vmem:[#allocation8 + $0x2f8] sm:$0xff] }
 0x32c   :  { %7929 = vmatpush1.bf16.msra.mxu1 %v9032_v35  ;;  %7602 = vmatprep.subr.bf16.mxu0 %v9039_v25  ;;  %v9079_v35 = vcombine.high %v814_v10, %v818_v30  ;;  %v9081_v25 = vcombine.high %v815_v47, %v819_v7  ;;  %v858_v10 = vld [vmem:[#allocation8 + $0x330] sm:$0xff]  ;;  %v855_v30 = vld [vmem:[#allocation8 + $0x318] sm:$0xff] }
 0x32d   :  { %7930 = vmatprep.subr.bf16.mxu1 %v9041_v37  ;;  %v822_v37 = vld [vmem:[#allocation8 + $0x210] sm:$0xff] }
 0x32e   :  { %v9086_v32 = vcombine.low %v822_v37, %v826_v41 }
 0x32f   :  { %7603 = vmatpush1.bf16.msra.mxu0 %v9038_v33  ;;  %v9080_v33 = vcombine.low %v815_v47, %v819_v7  ;;  %v859_v47 = vld [vmem:[#allocation8 + $0x338] sm:$0xff] }
 0x330   :  { %7931 = vmatpush1.bf16.msra.mxu1 %v9040_v53  ;;  %7604 = vmatprep.subr.bf16.mxu0 %v9047_v54  ;;  %v9087_v53 = vcombine.high %v822_v37, %v826_v41  ;;  %v9089_v54 = vcombine.high %v823_v46, %v827_v43  ;;  %v866_v37 = vld [vmem:[#allocation8 + $0x370] sm:$0xff]  ;;  %v863_v41 = vld [vmem:[#allocation8 + $0x358] sm:$0xff] }
 0x331   :  { %7932 = vmatprep.subr.bf16.mxu1 %v9049_v55  ;;  %v830_v55 = vld [vmem:[#allocation8 + $0x250] sm:$0xff] }
 0x332   :  { %v9094_v5 = vcombine.low %v830_v55, %v834_v58 }
 0x333   :  { %7605 = vmatpush1.bf16.msra.mxu0 %v9046_v36  ;;  %v9088_v36 = vcombine.low %v823_v46, %v827_v43  ;;  %v867_v46 = vld [vmem:[#allocation8 + $0x378] sm:$0xff] }
 0x334   :  { %7933 = vmatpush1.bf16.msra.mxu1 %v9048_v61  ;;  %7606 = vmatprep.subr.bf16.mxu0 %v9055_v12  ;;  %v9095_v61 = vcombine.high %v830_v55, %v834_v58  ;;  %v9097_v12 = vcombine.high %v831_v56, %v835_v60  ;;  %v874_v55 = vld [vmem:[#allocation8 + $0x3b0] sm:$0xff]  ;;  %v871_v58 = vld [vmem:[#allocation8 + $0x398] sm:$0xff] }
 0x335   :  { %7934 = vmatprep.subr.bf16.mxu1 %v9057_v9  ;;  %v838_v9 = vld [vmem:[#allocation8 + $0x290] sm:$0xff] }
 0x336   :  { %v9102_v24 = vcombine.low %v838_v9, %v842_v2 }
 0x337   :  { %7607 = vmatpush1.bf16.msra.mxu0 %v9054_v51  ;;  %v9096_v51 = vcombine.low %v831_v56, %v835_v60  ;;  %v875_v56 = vld [vmem:[#allocation8 + $0x3b8] sm:$0xff] }
 0x338   :  { %7935 = vmatpush1.bf16.msra.mxu1 %v9056_v11  ;;  %7608 = vmatprep.subr.bf16.mxu0 %v9063_v1  ;;  %v9103_v11 = vcombine.high %v838_v9, %v842_v2  ;;  %v9105_v1 = vcombine.high %v839_v3, %v843_v4  ;;  %v882_v9 = vld [vmem:[#allocation8 + $0x3f0] sm:$0xff]  ;;  %v879_v2 = vld [vmem:[#allocation8 + $0x3d8] sm:$0xff] }
 0x339   :  { %7936 = vmatprep.subr.bf16.mxu1 %v9065_v17  ;;  %v846_v17 = vld [vmem:[#allocation8 + $0x2d0] sm:$0xff] }
 0x33a   :  { %v9110_v7 = vcombine.low %v846_v17, %v850_v20 }
 0x33b   :  { %7609 = vmatpush1.bf16.msra.mxu0 %v9062_v22  ;;  %v9104_v22 = vcombine.low %v839_v3, %v843_v4  ;;  %v883_v3 = vld [vmem:[#allocation8 + $0x3f8] sm:$0xff] }
 0x33c   :  { %7937 = vmatpush1.bf16.msra.mxu1 %v9064_v23  ;;  %7610 = vmatprep.subr.bf16.mxu0 %v9071_v27  ;;  %v9111_v23 = vcombine.high %v846_v17, %v850_v20  ;;  %v9113_v27 = vcombine.high %v847_v19, %v851_v18  ;;  %v890_v17 = vld [vmem:[#allocation8 + $0x430] sm:$0xff]  ;;  %v887_v20 = vld [vmem:[#allocation8 + $0x418] sm:$0xff] }
 0x33d   :  { %7938 = vmatprep.subr.bf16.mxu1 %v9073_v28  ;;  %v854_v28 = vld [vmem:[#allocation8 + $0x310] sm:$0xff] }
 0x33e   :  { %v9118_v43 = vcombine.low %v854_v28, %v858_v10 }
 0x33f   :  { %7611 = vmatpush1.bf16.msra.mxu0 %v9070_v31  ;;  %v9112_v31 = vcombine.low %v847_v19, %v851_v18  ;;  %v891_v19 = vld [vmem:[#allocation8 + $0x438] sm:$0xff] }
 0x340   :  { %7939 = vmatpush1.bf16.msra.mxu1 %v9072_v34  ;;  %7612 = vmatprep.subr.bf16.mxu0 %v9079_v35  ;;  %v9119_v34 = vcombine.high %v854_v28, %v858_v10  ;;  %v9121_v35 = vcombine.high %v855_v30, %v859_v47  ;;  %v898_v28 = vld [vmem:[#allocation8 + $0x470] sm:$0xff] }
 0x341   :  { %7940 = vmatprep.subr.bf16.mxu1 %v9081_v25  ;;  %v862_v25 = vld [vmem:[#allocation8 + $0x350] sm:$0xff] }
 0x342   :  { %v9126_v60 = vcombine.low %v862_v25, %v866_v37 }
 0x343   :  { %7613 = vmatpush1.bf16.msra.mxu0 %v9078_v44  ;;  %v9120_v44 = vcombine.low %v855_v30, %v859_v47  ;;  %v895_v30 = vld [vmem:[#allocation8 + $0x458] sm:$0xff] }
 0x344   :  { %7941 = vmatpush1.bf16.msra.mxu1 %v9080_v33  ;;  %7614 = vmatprep.subr.bf16.mxu0 %v9087_v53  ;;  %v9127_v33 = vcombine.high %v862_v25, %v866_v37  ;;  %v9129_v53 = vcombine.high %v863_v41, %v867_v46  ;;  %v899_v47 = vld [vmem:[#allocation8 + $0x478] sm:$0xff] }
 0x345   :  { %7942 = vmatprep.subr.bf16.mxu1 %v9089_v54  ;;  %v870_v54 = vld [vmem:[#allocation8 + $0x390] sm:$0xff]  ;;  %v9161_v25 = vcombine.high %v895_v30, %v899_v47  ;;  %v903_v37 = vld [vmem:[#allocation8 + $0x498] sm:$0xff] }
 0x346   :  { %v9134_v4 = vcombine.low %v870_v54, %v874_v55 }
 0x347   :  { %7615 = vmatpush1.bf16.msra.mxu0 %v9086_v32  ;;  %v9128_v32 = vcombine.low %v863_v41, %v867_v46  ;;  %v907_v41 = vld [vmem:[#allocation8 + $0x4b8] sm:$0xff] }
 0x348   :  { %7943 = vmatpush1.bf16.msra.mxu1 %v9088_v36  ;;  %7616 = vmatprep.subr.bf16.mxu0 %v9095_v61  ;;  %v9135_v36 = vcombine.high %v870_v54, %v874_v55  ;;  %v9137_v61 = vcombine.high %v871_v58, %v875_v56  ;;  %v914_v54 = vld [vmem:[#allocation8 + $0x4f0] sm:$0xff]  ;;  %v911_v55 = vld [vmem:[#allocation8 + $0x4d8] sm:$0xff] }
 0x349   :  { %7944 = vmatprep.subr.bf16.mxu1 %v9097_v12  ;;  %v878_v12 = vld [vmem:[#allocation8 + $0x3d0] sm:$0xff] }
 0x34a   :  { %v9142_v18 = vcombine.low %v878_v12, %v882_v9 }
 0x34b   :  { %7617 = vmatpush1.bf16.msra.mxu0 %v9094_v5  ;;  %v9136_v5 = vcombine.low %v871_v58, %v875_v56  ;;  %v915_v58 = vld [vmem:[#allocation8 + $0x4f8] sm:$0xff] }
 0x34c   :  { %7945 = vmatpush1.bf16.msra.mxu1 %v9096_v51  ;;  %7618 = vmatprep.subr.bf16.mxu0 %v9103_v11  ;;  %v9143_v51 = vcombine.high %v878_v12, %v882_v9  ;;  %v9145_v11 = vcombine.high %v879_v2, %v883_v3  ;;  %v919_v12 = vld [vmem:[#allocation8 + $0x518] sm:$0xff] }
 0x34d   :  { %7946 = vmatprep.subr.bf16.mxu1 %v9105_v1  ;;  %v886_v1 = vld [vmem:[#allocation8 + $0x410] sm:$0xff]  ;;  %v923_v9 = vld [vmem:[#allocation8 + $0x538] sm:$0xff] }
 0x34e   :  { %v9150_v10 = vcombine.low %v886_v1, %v890_v17 }
 0x34f   :  { %7619 = vmatpush1.bf16.msra.mxu0 %v9102_v24  ;;  %v9144_v24 = vcombine.low %v879_v2, %v883_v3  ;;  %v9176_v2 = vcombine.low %v911_v55, %v915_v58 }
 0x350   :  { %7947 = vmatpush1.bf16.msra.mxu1 %v9104_v22  ;;  %7620 = vmatprep.subr.bf16.mxu0 %v9111_v23  ;;  %v9151_v22 = vcombine.high %v886_v1, %v890_v17  ;;  %v9153_v23 = vcombine.high %v887_v20, %v891_v19  ;;  %v931_v1 = vld [vmem:[#allocation8 + $0x578] sm:$0xff] }
 0x351   :  { %7948 = vmatprep.subr.bf16.mxu1 %v9113_v27  ;;  %v894_v27 = vld [vmem:[#allocation8 + $0x450] sm:$0xff] }
 0x352   :  { %v9158_v46 = vcombine.low %v894_v27, %v898_v28 }
 0x353   :  { %7621 = vmatpush1.bf16.msra.mxu0 %v9110_v7  ;;  %v9152_v7 = vcombine.low %v887_v20, %v891_v19  ;;  %v9184_v20 = vcombine.low %v919_v12, %v923_v9 }
 0x354   :  { %7949 = vmatpush1.bf16.msra.mxu1 %v9112_v31  ;;  %7622 = vmatprep.subr.bf16.mxu0 %v9119_v34  ;;  %v9159_v31 = vcombine.high %v894_v27, %v898_v28  ;;  %v902_v34 = vld [vmem:[#allocation8 + $0x490] sm:$0xff]  ;;  %v939_v27 = vld [vmem:[#allocation8 + $0x5b8] sm:$0xff] }
 0x355   :  { %7950 = vmatprep.subr.bf16.mxu1 %v9121_v35  ;;  %v906_v35 = vld [vmem:[#allocation8 + $0x4b0] sm:$0xff] }
 0x356   :  { %v9166_v56 = vcombine.low %v902_v34, %v906_v35 }
 0x357   :  { %7623 = vmatpush1.bf16.msra.mxu0 %v9118_v43  ;;  %v9160_v43 = vcombine.low %v895_v30, %v899_v47 }
 0x358   :  { %7951 = vmatpush1.bf16.msra.mxu1 %v9120_v44  ;;  %7624 = vmatprep.subr.bf16.mxu0 %v9127_v33  ;;  %v9167_v44 = vcombine.high %v902_v34, %v906_v35  ;;  %v9169_v33 = vcombine.high %v903_v37, %v907_v41  ;;  %v943_v34 = vld [vmem:[#allocation8 + $0x5d8] sm:$0xff] }
 0x359   :  { %7952 = vmatprep.subr.bf16.mxu1 %v9129_v53  ;;  %v910_v53 = vld [vmem:[#allocation8 + $0x4d0] sm:$0xff]  ;;  %v947_v35 = vld [vmem:[#allocation8 + $0x5f8] sm:$0xff] }
 0x35b   :  { %7625 = vmatpush1.bf16.msra.mxu0 %v9126_v60  ;;  %v9175_v60 = vcombine.high %v910_v53, %v914_v54 }
 0x35c   :  { %7953 = vmatpush1.bf16.msra.mxu1 %v9128_v32  ;;  %7626 = vmatprep.subr.bf16.mxu0 %v9135_v36  ;;  %v9177_v32 = vcombine.high %v911_v55, %v915_v58  ;;  %v918_v36 = vld [vmem:[#allocation8 + $0x510] sm:$0xff]  ;;  %v9208_v55 = vcombine.low %v943_v34, %v947_v35 }
 0x35d   :  { %7954 = vmatprep.subr.bf16.mxu1 %v9137_v61  ;;  %v922_v61 = vld [vmem:[#allocation8 + $0x530] sm:$0xff] }
 0x35e   :  { %v9183_v3 = vcombine.high %v918_v36, %v922_v61  ;;  %v9182_v17 = vcombine.low %v918_v36, %v922_v61  ;;  %v963_v36 = vld [vmem:[#allocation8 + $0x678] sm:$0xff] }
 0x35f   :  { %7627 = vmatpush1.bf16.msra.mxu0 %v9134_v4  ;;  %v9185_v4 = vcombine.high %v919_v12, %v923_v9 }
 0x360   :  { %7955 = vmatpush1.bf16.msra.mxu1 %v9136_v5  ;;  %7628 = vmatprep.subr.bf16.mxu0 %v9143_v51  ;;  %v926_v5 = vld [vmem:[#allocation8 + $0x550] sm:$0xff] }
 0x361   :  { %7956 = vmatprep.subr.bf16.mxu1 %v9145_v11  ;;  %v930_v51 = vld [vmem:[#allocation8 + $0x570] sm:$0xff]  ;;  %v927_v11 = vld [vmem:[#allocation8 + $0x558] sm:$0xff] }
 0x362   :  { %v9191_v19 = vcombine.high %v926_v5, %v930_v51  ;;  %v9190_v28 = vcombine.low %v926_v5, %v930_v51  ;;  %v971_v5 = vld [vmem:[#allocation8 + $0x6b8] sm:$0xff] }
 0x363   :  { %7629 = vmatpush1.bf16.msra.mxu0 %v9142_v18  ;;  %v9193_v18 = vcombine.high %v927_v11, %v931_v1 }
 0x364   :  { %7957 = vmatpush1.bf16.msra.mxu1 %v9144_v24  ;;  %7639 = vmatprep.subr.bf16.mxu0 %v9151_v22  ;;  %v934_v24 = vld [vmem:[#allocation8 + $0x590] sm:$0xff] }
 0x365   :  { %7967 = vmatprep.subr.bf16.mxu1 %v9153_v23  ;;  %v938_v22 = vld [vmem:[#allocation8 + $0x5b0] sm:$0xff]  ;;  %v935_v23 = vld [vmem:[#allocation8 + $0x598] sm:$0xff] }
 0x366   :  { %7631 = vmatmul.mubr.bf16.vlgmr.msra.gmra.mrb[20].mxu0 %v10775_v38  ;;  %v9199_v30 = vcombine.high %v934_v24, %v938_v22  ;;  %v9201_v47 = vcombine.high %v935_v23, %v939_v27 }
 0x367   :  { %7959 = vmatmul.mubr.bf16.vlgmr.msra.gmra.mrb[20].mxu1 %v10775_v38  ;;  %7640 = vmatpush1.bf16.msra.mxu0 %v9150_v10  ;;  %v9168_v38 = vcombine.low %v903_v37, %v907_v41  ;;  %v9192_v10 = vcombine.low %v927_v11, %v931_v1  ;;  %v9200_v37 = vcombine.low %v935_v23, %v939_v27 }
 0x368   :  { %7671 = vmatprep.mubr.bf16.mxu0 %v10779_v45  ;;  %7968 = vmatpush1.bf16.msra.mxu1 %v9152_v7  ;;  %v942_v7 = vld [vmem:[#allocation8 + $0x5d0] sm:$0xff] }
 0x369   :  { %7999 = vmatprep.mubr.bf16.mxu1 %v10779_v45  ;;  %7641 = vmatprep.subr.bf16.mxu0 %v9159_v31  ;;  %v9174_v45 = vcombine.low %v910_v53, %v914_v54  ;;  %v946_v31 = vld [vmem:[#allocation8 + $0x5f0] sm:$0xff]  ;;  %v955_v53 = vld [vmem:[#allocation8 + $0x638] sm:$0xff] }
 0x36a   :  { %7969 = vmatprep.subr.bf16.mxu1 %v9161_v25  ;;  %v9198_v25 = vcombine.low %v934_v24, %v938_v22  ;;  %v9207_v41 = vcombine.high %v942_v7, %v946_v31  ;;  %v9206_v54 = vcombine.low %v942_v7, %v946_v31  ;;  %v979_v24 = vld [vmem:[#allocation8 + $0x6f8] sm:$0xff] }
 0x36b   :  { %7642 = vmatpush1.bf16.msra.mxu0 %v9158_v46  ;;  %v9209_v46 = vcombine.high %v943_v34, %v947_v35  ;;  %v987_v7 = vld [vmem:[#allocation8 + $0x738] sm:$0xff] }
 0x36c   :  { %7970 = vmatpush1.bf16.msra.mxu1 %v9160_v43  ;;  %7643 = vmatprep.subr.bf16.mxu0 %v9167_v44  ;;  %v950_v43 = vld [vmem:[#allocation8 + $0x610] sm:$0xff] }
 0x36d   :  { %7971 = vmatprep.subr.bf16.mxu1 %v9169_v33  ;;  %v954_v44 = vld [vmem:[#allocation8 + $0x630] sm:$0xff]  ;;  %v951_v33 = vld [vmem:[#allocation8 + $0x618] sm:$0xff] }
 0x36e   :  { %v9215_v58 = vcombine.high %v950_v43, %v954_v44  ;;  %v9214_v61 = vcombine.low %v950_v43, %v954_v44  ;;  %v9216_v12 = vcombine.low %v951_v33, %v955_v53  ;;  %v995_v43 = vld [vmem:[#allocation8 + $0x778] sm:$0xff] }
 0x36f   :  { %7644 = vmatpush1.bf16.msra.mxu0 %v9166_v56  ;;  %v9217_v56 = vcombine.high %v951_v33, %v955_v53 }
 0x370   :  { %7972 = vmatpush1.bf16.msra.mxu1 %v9168_v38  ;;  %7645 = vmatprep.subr.bf16.mxu0 %v9175_v60  ;;  %v958_v38 = vld [vmem:[#allocation8 + $0x650] sm:$0xff] }
 0x371   :  { %7973 = vmatprep.subr.bf16.mxu1 %v9177_v32  ;;  %v962_v60 = vld [vmem:[#allocation8 + $0x670] sm:$0xff]  ;;  %v959_v32 = vld [vmem:[#allocation8 + $0x658] sm:$0xff] }
 0x372   :  { %v9223_v9 = vcombine.high %v958_v38, %v962_v60  ;;  %v9222_v51 = vcombine.low %v958_v38, %v962_v60  ;;  %v9224_v11 = vcombine.low %v959_v32, %v963_v36  ;;  %v1003_v38 = vld [vmem:[#allocation8 + $0x7b8] sm:$0xff] }
 0x373   :  { %7646 = vmatpush1.bf16.msra.mxu0 %v9174_v45  ;;  %v9225_v45 = vcombine.high %v959_v32, %v963_v36 }
 0x374   :  { %7974 = vmatpush1.bf16.msra.mxu1 %v9176_v2  ;;  %7647 = vmatprep.subr.bf16.mxu0 %v9183_v3  ;;  %v966_v2 = vld [vmem:[#allocation8 + $0x690] sm:$0xff] }
 0x375   :  { %7975 = vmatprep.subr.bf16.mxu1 %v9185_v4  ;;  %v970_v3 = vld [vmem:[#allocation8 + $0x6b0] sm:$0xff]  ;;  %v967_v4 = vld [vmem:[#allocation8 + $0x698] sm:$0xff] }
 0x376   :  { %v9231_v1 = vcombine.high %v966_v2, %v970_v3  ;;  %v9230_v22 = vcombine.low %v966_v2, %v970_v3  ;;  %v9232_v23 = vcombine.low %v967_v4, %v971_v5  ;;  %v1011_v2 = vld [vmem:[#allocation8 + $0x7f8] sm:$0xff] }
 0x377   :  { %7648 = vmatpush1.bf16.msra.mxu0 %v9182_v17  ;;  %v9233_v17 = vcombine.high %v967_v4, %v971_v5 }
 0x378   :  { %7976 = vmatpush1.bf16.msra.mxu1 %v9184_v20  ;;  %7649 = vmatprep.subr.bf16.mxu0 %v9191_v19  ;;  %v974_v20 = vld [vmem:[#allocation8 + $0x6d0] sm:$0xff] }
 0x379   :  { %7977 = vmatprep.subr.bf16.mxu1 %v9193_v18  ;;  %v978_v19 = vld [vmem:[#allocation8 + $0x6f0] sm:$0xff]  ;;  %v975_v18 = vld [vmem:[#allocation8 + $0x6d8] sm:$0xff] }
 0x37a   :  { %v9239_v27 = vcombine.high %v974_v20, %v978_v19  ;;  %v9238_v31 = vcombine.low %v974_v20, %v978_v19  ;;  %v9240_v34 = vcombine.low %v975_v18, %v979_v24  ;;  %v1019_v20 = vld [vmem:[#allocation8 + $0x838] sm:$0xff] }
 0x37b   :  { %7650 = vmatpush1.bf16.msra.mxu0 %v9190_v28  ;;  %v9241_v28 = vcombine.high %v975_v18, %v979_v24 }
 0x37c   :  { %7978 = vmatpush1.bf16.msra.mxu1 %v9192_v10  ;;  %7651 = vmatprep.subr.bf16.mxu0 %v9199_v30  ;;  %v982_v10 = vld [vmem:[#allocation8 + $0x710] sm:$0xff] }
 0x37d   :  { %7979 = vmatprep.subr.bf16.mxu1 %v9201_v47  ;;  %v986_v30 = vld [vmem:[#allocation8 + $0x730] sm:$0xff]  ;;  %v983_v47 = vld [vmem:[#allocation8 + $0x718] sm:$0xff] }
 0x37e   :  { %v9247_v35 = vcombine.high %v982_v10, %v986_v30  ;;  %v9246_v44 = vcombine.low %v982_v10, %v986_v30  ;;  %v9248_v33 = vcombine.low %v983_v47, %v987_v7  ;;  %v1023_v10 = vld [vmem:[#allocation8 + $0x858] sm:$0xff] }
 0x37f   :  { %7652 = vmatpush1.bf16.msra.mxu0 %v9198_v25  ;;  %v9249_v25 = vcombine.high %v983_v47, %v987_v7  ;;  %v1027_v30 = vld [vmem:[#allocation8 + $0x878] sm:$0xff] }
 0x380   :  { %7980 = vmatpush1.bf16.msra.mxu1 %v9200_v37  ;;  %7653 = vmatprep.subr.bf16.mxu0 %v9207_v41  ;;  %v990_v37 = vld [vmem:[#allocation8 + $0x750] sm:$0xff] }
 0x381   :  { %7981 = vmatprep.subr.bf16.mxu1 %v9209_v46  ;;  %v994_v41 = vld [vmem:[#allocation8 + $0x770] sm:$0xff]  ;;  %v991_v46 = vld [vmem:[#allocation8 + $0x758] sm:$0xff] }
 0x382   :  { %v9255_v53 = vcombine.high %v990_v37, %v994_v41  ;;  %v9254_v60 = vcombine.low %v990_v37, %v994_v41  ;;  %v9256_v32 = vcombine.low %v991_v46, %v995_v43  ;;  %v1035_v37 = vld [vmem:[#allocation8 + $0x8b8] sm:$0xff] }
 0x383   :  { %7654 = vmatpush1.bf16.msra.mxu0 %v9206_v54  ;;  %v9257_v54 = vcombine.high %v991_v46, %v995_v43  ;;  %v9288_v46 = vcombine.low %v1023_v10, %v1027_v30 }
 0x384   :  { %7982 = vmatpush1.bf16.msra.mxu1 %v9208_v55  ;;  %7655 = vmatprep.subr.bf16.mxu0 %v9215_v58  ;;  %v998_v55 = vld [vmem:[#allocation8 + $0x790] sm:$0xff] }
 0x385   :  { %7983 = vmatprep.subr.bf16.mxu1 %v9217_v56  ;;  %v1002_v58 = vld [vmem:[#allocation8 + $0x7b0] sm:$0xff]  ;;  %v999_v56 = vld [vmem:[#allocation8 + $0x798] sm:$0xff] }
 0x386   :  { %v9263_v36 = vcombine.high %v998_v55, %v1002_v58  ;;  %v9262_v3 = vcombine.low %v998_v55, %v1002_v58  ;;  %v9264_v4 = vcombine.low %v999_v56, %v1003_v38  ;;  %v1043_v55 = vld [vmem:[#allocation8 + $0x8f8] sm:$0xff] }
 0x387   :  { %7656 = vmatpush1.bf16.msra.mxu0 %v9214_v61  ;;  %v9265_v61 = vcombine.high %v999_v56, %v1003_v38 }
 0x388   :  { %7984 = vmatpush1.bf16.msra.mxu1 %v9216_v12  ;;  %7657 = vmatprep.subr.bf16.mxu0 %v9223_v9  ;;  %v1006_v12 = vld [vmem:[#allocation8 + $0x7d0] sm:$0xff] }
 0x389   :  { %7985 = vmatprep.subr.bf16.mxu1 %v9225_v45  ;;  %v1010_v9 = vld [vmem:[#allocation8 + $0x7f0] sm:$0xff]  ;;  %v1007_v45 = vld [vmem:[#allocation8 + $0x7d8] sm:$0xff] }
 0x38a   :  { %v9271_v5 = vcombine.high %v1006_v12, %v1010_v9  ;;  %v9270_v19 = vcombine.low %v1006_v12, %v1010_v9  ;;  %v9272_v18 = vcombine.low %v1007_v45, %v1011_v2 }
 0x38b   :  { %7658 = vmatpush1.bf16.msra.mxu0 %v9222_v51  ;;  %v9273_v51 = vcombine.high %v1007_v45, %v1011_v2  ;;  %v1054_v2 = vld [vmem:[#allocation8 + $0x950] sm:$0xff] }
 0x38c   :  { %7986 = vmatpush1.bf16.msra.mxu1 %v9224_v11  ;;  %7659 = vmatprep.subr.bf16.mxu0 %v9231_v1  ;;  %v1014_v11 = vld [vmem:[#allocation8 + $0x810] sm:$0xff] }
 0x38d   :  { %7987 = vmatprep.subr.bf16.mxu1 %v9233_v17  ;;  %v1018_v1 = vld [vmem:[#allocation8 + $0x830] sm:$0xff]  ;;  %v1015_v17 = vld [vmem:[#allocation8 + $0x818] sm:$0xff] }
 0x38e   :  { %v9279_v24 = vcombine.high %v1014_v11, %v1018_v1  ;;  %v9280_v47 = vcombine.low %v1015_v17, %v1019_v20 }
 0x38f   :  { %7660 = vmatpush1.bf16.msra.mxu0 %v9230_v22  ;;  %v9281_v22 = vcombine.high %v1015_v17, %v1019_v20  ;;  %v1062_v20 = vld [vmem:[#allocation8 + $0x990] sm:$0xff] }
 0x390   :  { %7988 = vmatpush1.bf16.msra.mxu1 %v9232_v23  ;;  %7661 = vmatprep.subr.bf16.mxu0 %v9239_v27  ;;  %v1022_v23 = vld [vmem:[#allocation8 + $0x850] sm:$0xff] }
 0x391   :  { %7989 = vmatprep.subr.bf16.mxu1 %v9241_v28  ;;  %v1026_v27 = vld [vmem:[#allocation8 + $0x870] sm:$0xff]  ;;  %v9278_v28 = vcombine.low %v1014_v11, %v1018_v1 }
 0x392   :  { %v9287_v7 = vcombine.high %v1022_v23, %v1026_v27  ;;  %v9286_v41 = vcombine.low %v1022_v23, %v1026_v27 }
 0x393   :  { %7662 = vmatpush1.bf16.msra.mxu0 %v9238_v31  ;;  %v1030_v31 = vld [vmem:[#allocation8 + $0x890] sm:$0xff] }
 0x394   :  { %7990 = vmatpush1.bf16.msra.mxu1 %v9240_v34  ;;  %7663 = vmatprep.subr.bf16.mxu0 %v9247_v35  ;;  %v1034_v34 = vld [vmem:[#allocation8 + $0x8b0] sm:$0xff]  ;;  %v9289_v35 = vcombine.high %v1023_v10, %v1027_v30 }
 0x395   :  { %7991 = vmatprep.subr.bf16.mxu1 %v9249_v25  ;;  %v1031_v25 = vld [vmem:[#allocation8 + $0x898] sm:$0xff]  ;;  %v9295_v43 = vcombine.high %v1030_v31, %v1034_v34  ;;  %v9294_v58 = vcombine.low %v1030_v31, %v1034_v34  ;;  %v1070_v10 = vld [vmem:[#allocation8 + $0x9d0] sm:$0xff] }
 0x396   :  { %v1074_v30 = vld [vmem:[#allocation8 + $0x9f0] sm:$0xff] }
 0x397   :  { %7664 = vmatpush1.bf16.msra.mxu0 %v9246_v44  ;;  %v9297_v44 = vcombine.high %v1031_v25, %v1035_v37 }
 0x398   :  { %7992 = vmatpush1.bf16.msra.mxu1 %v9248_v33  ;;  %7665 = vmatprep.subr.bf16.mxu0 %v9255_v53  ;;  %v1038_v33 = vld [vmem:[#allocation8 + $0x8d0] sm:$0xff] }
 0x399   :  { %7993 = vmatprep.subr.bf16.mxu1 %v9257_v54  ;;  %v1042_v53 = vld [vmem:[#allocation8 + $0x8f0] sm:$0xff]  ;;  %v1039_v54 = vld [vmem:[#allocation8 + $0x8d8] sm:$0xff] }
 0x39a   :  { %v9303_v56 = vcombine.high %v1038_v33, %v1042_v53  ;;  %v9305_v38 = vcombine.high %v1039_v54, %v1043_v55  ;;  %v9304_v12 = vcombine.low %v1039_v54, %v1043_v55  ;;  %v1086_v55 = vld [vmem:[#allocation8 + $0xa50] sm:$0xff] }
 0x39b   :  { %7666 = vmatpush1.bf16.msra.mxu0 %v9254_v60  ;;  %v1046_v60 = vld [vmem:[#allocation8 + $0x910] sm:$0xff] }
 0x39c   :  { %7994 = vmatpush1.bf16.msra.mxu1 %v9256_v32  ;;  %7667 = vmatprep.subr.bf16.mxu0 %v9263_v36  ;;  %v1050_v32 = vld [vmem:[#allocation8 + $0x930] sm:$0xff]  ;;  %v1047_v36 = vld [vmem:[#allocation8 + $0x918] sm:$0xff] }
 0x39d   :  { %7995 = vmatprep.subr.bf16.mxu1 %v9265_v61  ;;  %v1051_v61 = vld [vmem:[#allocation8 + $0x938] sm:$0xff]  ;;  %v9311_v9 = vcombine.high %v1046_v60, %v1050_v32 }
 0x39e   :  { %v9313_v45 = vcombine.high %v1047_v36, %v1051_v61  ;;  %v9312_v11 = vcombine.low %v1047_v36, %v1051_v61  ;;  %v1094_v61 = vld [vmem:[#allocation8 + $0xa90] sm:$0xff] }
 0x39f   :  { %7668 = vmatpush1.bf16.msra.mxu0 %v9262_v3  ;;  %v1058_v3 = vld [vmem:[#allocation8 + $0x970] sm:$0xff] }
 0x3a0   :  { %7996 = vmatpush1.bf16.msra.mxu1 %v9264_v4  ;;  %7669 = vmatprep.subr.bf16.mxu0 %v9271_v5  ;;  %v1055_v4 = vld [vmem:[#allocation8 + $0x958] sm:$0xff]  ;;  %v9319_v1 = vcombine.high %v1054_v2, %v1058_v3 }
 0x3a1   :  { %7997 = vmatprep.subr.bf16.mxu1 %v9273_v51  ;;  %v1059_v5 = vld [vmem:[#allocation8 + $0x978] sm:$0xff]  ;;  %v9310_v51 = vcombine.low %v1046_v60, %v1050_v32 }
 0x3a2   :  { %v9321_v17 = vcombine.high %v1055_v4, %v1059_v5  ;;  %v9320_v23 = vcombine.low %v1055_v4, %v1059_v5  ;;  %v1102_v5 = vld [vmem:[#allocation8 + $0xad0] sm:$0xff] }
 0x3a3   :  { %7670 = vmatpush1.bf16.msra.mxu0 %v9270_v19  ;;  %v1066_v19 = vld [vmem:[#allocation8 + $0x9b0] sm:$0xff] }
 0x3a4   :  { %7998 = vmatpush1.bf16.msra.mxu1 %v9272_v18  ;;  %7680 = vmatprep.subr.bf16.mxu0 %v9279_v24  ;;  %v1063_v18 = vld [vmem:[#allocation8 + $0x998] sm:$0xff]  ;;  %v9327_v27 = vcombine.high %v1062_v20, %v1066_v19  ;;  %v9326_v31 = vcombine.low %v1062_v20, %v1066_v19 }
 0x3a5   :  { %8008 = vmatprep.subr.bf16.mxu1 %v9281_v22  ;;  %v1067_v24 = vld [vmem:[#allocation8 + $0x9b8] sm:$0xff]  ;;  %v9318_v22 = vcombine.low %v1054_v2, %v1058_v3 }
 0x3a6   :  { %7672 = vmatmul.mubr.bf16.vlgmr.msra.gmra.mrb[20].mxu0 %v10836_v29  ;;  %v9328_v34 = vcombine.low %v1063_v18, %v1067_v24 }
 0x3a7   :  { %8000 = vmatmul.mubr.bf16.vlgmr.msra.gmra.mrb[20].mxu1 %v10836_v29  ;;  %7681 = vmatpush1.bf16.msra.mxu0 %v9278_v28  ;;  %v9296_v29 = vcombine.low %v1031_v25, %v1035_v37  ;;  %v9329_v28 = vcombine.high %v1063_v18, %v1067_v24  ;;  %v1078_v37 = vld [vmem:[#allocation8 + $0xa10] sm:$0xff] }
 0x3a8   :  { %7712 = vmatprep.mubr.bf16.mxu0 %v10838_v40  ;;  %8009 = vmatpush1.bf16.msra.mxu1 %v9280_v47  ;;  %v1071_v47 = vld [vmem:[#allocation8 + $0x9d8] sm:$0xff]  ;;  %v1110_v24 = vld [vmem:[#allocation8 + $0xb10] sm:$0xff] }
 0x3a9   :  { %8040 = vmatprep.mubr.bf16.mxu1 %v10838_v40  ;;  %7682 = vmatprep.subr.bf16.mxu0 %v9287_v7  ;;  %v9302_v40 = vcombine.low %v1038_v33, %v1042_v53  ;;  %v1075_v7 = vld [vmem:[#allocation8 + $0x9f8] sm:$0xff] }
 0x3aa   :  { %8010 = vmatprep.subr.bf16.mxu1 %v9289_v35  ;;  %v9335_v35 = vcombine.high %v1070_v10, %v1074_v30  ;;  %v9337_v25 = vcombine.high %v1071_v47, %v1075_v7  ;;  %v9336_v33 = vcombine.low %v1071_v47, %v1075_v7  ;;  %v1118_v7 = vld [vmem:[#allocation8 + $0xb50] sm:$0xff] }
 0x3ab   :  { %7683 = vmatpush1.bf16.msra.mxu0 %v9286_v41  ;;  %v1082_v41 = vld [vmem:[#allocation8 + $0xa30] sm:$0xff] }
 0x3ac   :  { %8011 = vmatpush1.bf16.msra.mxu1 %v9288_v46  ;;  %7684 = vmatprep.subr.bf16.mxu0 %v9295_v43  ;;  %v1079_v46 = vld [vmem:[#allocation8 + $0xa18] sm:$0xff]  ;;  %v9343_v53 = vcombine.high %v1078_v37, %v1082_v41 }
 0x3ad   :  { %8012 = vmatprep.subr.bf16.mxu1 %v9297_v44  ;;  %v1083_v43 = vld [vmem:[#allocation8 + $0xa38] sm:$0xff]  ;;  %v9334_v44 = vcombine.low %v1070_v10, %v1074_v30 }
 0x3ae   :  { %v9345_v54 = vcombine.high %v1079_v46, %v1083_v43  ;;  %v9344_v60 = vcombine.low %v1079_v46, %v1083_v43  ;;  %v1126_v43 = vld [vmem:[#allocation8 + $0xb90] sm:$0xff] }
 0x3af   :  { %7685 = vmatpush1.bf16.msra.mxu0 %v9294_v58  ;;  %v1090_v58 = vld [vmem:[#allocation8 + $0xa70] sm:$0xff] }
 0x3b0   :  { %8013 = vmatpush1.bf16.msra.mxu1 %v9296_v29  ;;  %7686 = vmatprep.subr.bf16.mxu0 %v9303_v56  ;;  %v1087_v29 = vld [vmem:[#allocation8 + $0xa58] sm:$0xff]  ;;  %v9351_v32 = vcombine.high %v1086_v55, %v1090_v58 }
 0x3b1   :  { %8014 = vmatprep.subr.bf16.mxu1 %v9305_v38  ;;  %v1091_v56 = vld [vmem:[#allocation8 + $0xa78] sm:$0xff]  ;;  %v9342_v38 = vcombine.low %v1078_v37, %v1082_v41 }
 0x3b2   :  { %v9353_v36 = vcombine.high %v1087_v29, %v1091_v56  ;;  %v9352_v2 = vcombine.low %v1087_v29, %v1091_v56  ;;  %v1134_v56 = vld [vmem:[#allocation8 + $0xbd0] sm:$0xff] }
 0x3b3   :  { %7687 = vmatpush1.bf16.msra.mxu0 %v9302_v40  ;;  %v1098_v40 = vld [vmem:[#allocation8 + $0xab0] sm:$0xff] }
 0x3b4   :  { %8015 = vmatpush1.bf16.msra.mxu1 %v9304_v12  ;;  %7688 = vmatprep.subr.bf16.mxu0 %v9311_v9  ;;  %v1095_v12 = vld [vmem:[#allocation8 + $0xa98] sm:$0xff]  ;;  %v9359_v3 = vcombine.high %v1094_v61, %v1098_v40 }
 0x3b5   :  { %8016 = vmatprep.subr.bf16.mxu1 %v9313_v45  ;;  %v1099_v9 = vld [vmem:[#allocation8 + $0xab8] sm:$0xff]  ;;  %v9350_v45 = vcombine.low %v1086_v55, %v1090_v58 }
 0x3b6   :  { %v9361_v4 = vcombine.high %v1095_v12, %v1099_v9  ;;  %v9360_v20 = vcombine.low %v1095_v12, %v1099_v9  ;;  %v1142_v9 = vld [vmem:[#allocation8 + $0xc10] sm:$0xff] }
 0x3b7   :  { %7689 = vmatpush1.bf16.msra.mxu0 %v9310_v51  ;;  %v1106_v51 = vld [vmem:[#allocation8 + $0xaf0] sm:$0xff] }
 0x3b8   :  { %8017 = vmatpush1.bf16.msra.mxu1 %v9312_v11  ;;  %7690 = vmatprep.subr.bf16.mxu0 %v9319_v1  ;;  %v1103_v11 = vld [vmem:[#allocation8 + $0xad8] sm:$0xff]  ;;  %v9367_v19 = vcombine.high %v1102_v5, %v1106_v51 }
 0x3b9   :  { %8018 = vmatprep.subr.bf16.mxu1 %v9321_v17  ;;  %v1107_v1 = vld [vmem:[#allocation8 + $0xaf8] sm:$0xff]  ;;  %v9358_v17 = vcombine.low %v1094_v61, %v1098_v40 }
 0x3ba   :  { %v9369_v18 = vcombine.high %v1103_v11, %v1107_v1  ;;  %v9368_v10 = vcombine.low %v1103_v11, %v1107_v1  ;;  %v1150_v1 = vld [vmem:[#allocation8 + $0xc50] sm:$0xff] }
 0x3bb   :  { %7691 = vmatpush1.bf16.msra.mxu0 %v9318_v22  ;;  %v1114_v22 = vld [vmem:[#allocation8 + $0xb30] sm:$0xff] }
 0x3bc   :  { %8019 = vmatpush1.bf16.msra.mxu1 %v9320_v23  ;;  %7692 = vmatprep.subr.bf16.mxu0 %v9327_v27  ;;  %v1111_v23 = vld [vmem:[#allocation8 + $0xb18] sm:$0xff]  ;;  %v9375_v30 = vcombine.high %v1110_v24, %v1114_v22 }
 0x3bd   :  { %8020 = vmatprep.subr.bf16.mxu1 %v9329_v28  ;;  %v1115_v27 = vld [vmem:[#allocation8 + $0xb38] sm:$0xff]  ;;  %v9366_v28 = vcombine.low %v1102_v5, %v1106_v51 }
 0x3be   :  { %v9377_v47 = vcombine.high %v1111_v23, %v1115_v27  ;;  %v9376_v37 = vcombine.low %v1111_v23, %v1115_v27  ;;  %v1158_v23 = vld [vmem:[#allocation8 + $0xc90] sm:$0xff] }
 0x3bf   :  { %7693 = vmatpush1.bf16.msra.mxu0 %v9326_v31  ;;  %v1122_v31 = vld [vmem:[#allocation8 + $0xb70] sm:$0xff] }
 0x3c0   :  { %8021 = vmatpush1.bf16.msra.mxu1 %v9328_v34  ;;  %7694 = vmatprep.subr.bf16.mxu0 %v9335_v35  ;;  %v1119_v34 = vld [vmem:[#allocation8 + $0xb58] sm:$0xff]  ;;  %v9383_v41 = vcombine.high %v1118_v7, %v1122_v31  ;;  %v1162_v27 = vld [vmem:[#allocation8 + $0xcb0] sm:$0xff] }
 0x3c1   :  { %8022 = vmatprep.subr.bf16.mxu1 %v9337_v25  ;;  %v1123_v35 = vld [vmem:[#allocation8 + $0xb78] sm:$0xff]  ;;  %v9374_v25 = vcombine.low %v1110_v24, %v1114_v22 }
 0x3c2   :  { %v9385_v46 = vcombine.high %v1119_v34, %v1123_v35  ;;  %v9384_v55 = vcombine.low %v1119_v34, %v1123_v35  ;;  %v1166_v35 = vld [vmem:[#allocation8 + $0xcd0] sm:$0xff] }
 0x3c3   :  { %7695 = vmatpush1.bf16.msra.mxu0 %v9334_v44  ;;  %v1130_v44 = vld [vmem:[#allocation8 + $0xbb0] sm:$0xff] }
 0x3c4   :  { %8023 = vmatpush1.bf16.msra.mxu1 %v9336_v33  ;;  %7696 = vmatprep.subr.bf16.mxu0 %v9343_v53  ;;  %v1127_v33 = vld [vmem:[#allocation8 + $0xb98] sm:$0xff]  ;;  %v9391_v58 = vcombine.high %v1126_v43, %v1130_v44 }
 0x3c5   :  { %8024 = vmatprep.subr.bf16.mxu1 %v9345_v54  ;;  %v1131_v53 = vld [vmem:[#allocation8 + $0xbb8] sm:$0xff]  ;;  %v9382_v54 = vcombine.low %v1118_v7, %v1122_v31  ;;  %v9423_v31 = vcombine.high %v1158_v23, %v1162_v27 }
 0x3c6   :  { %v9393_v29 = vcombine.high %v1127_v33, %v1131_v53  ;;  %v9392_v61 = vcombine.low %v1127_v33, %v1131_v53  ;;  %v1174_v33 = vld [vmem:[#allocation8 + $0xd10] sm:$0xff] }
 0x3c7   :  { %7697 = vmatpush1.bf16.msra.mxu0 %v9342_v38  ;;  %v1138_v38 = vld [vmem:[#allocation8 + $0xbf0] sm:$0xff] }
 0x3c8   :  { %8025 = vmatpush1.bf16.msra.mxu1 %v9344_v60  ;;  %7698 = vmatprep.subr.bf16.mxu0 %v9351_v32  ;;  %v1135_v60 = vld [vmem:[#allocation8 + $0xbd8] sm:$0xff]  ;;  %v9399_v40 = vcombine.high %v1134_v56, %v1138_v38  ;;  %v1178_v53 = vld [vmem:[#allocation8 + $0xd30] sm:$0xff] }
 0x3c9   :  { %8026 = vmatprep.subr.bf16.mxu1 %v9353_v36  ;;  %v1139_v32 = vld [vmem:[#allocation8 + $0xbf8] sm:$0xff]  ;;  %v9390_v36 = vcombine.low %v1126_v43, %v1130_v44 }
 0x3ca   :  { %v9401_v12 = vcombine.high %v1135_v60, %v1139_v32  ;;  %v9400_v5 = vcombine.low %v1135_v60, %v1139_v32  ;;  %v1186_v60 = vld [vmem:[#allocation8 + $0xd70] sm:$0xff]  ;;  %v1183_v32 = vld [vmem:[#allocation8 + $0xd58] sm:$0xff] }
 0x3cb   :  { %7699 = vmatpush1.bf16.msra.mxu0 %v9350_v45  ;;  %v1146_v45 = vld [vmem:[#allocation8 + $0xc30] sm:$0xff] }
 0x3cc   :  { %8027 = vmatpush1.bf16.msra.mxu1 %v9352_v2  ;;  %7700 = vmatprep.subr.bf16.mxu0 %v9359_v3  ;;  %v1143_v2 = vld [vmem:[#allocation8 + $0xc18] sm:$0xff]  ;;  %v9407_v51 = vcombine.high %v1142_v9, %v1146_v45 }
 0x3cd   :  { %8028 = vmatprep.subr.bf16.mxu1 %v9361_v4  ;;  %v1147_v3 = vld [vmem:[#allocation8 + $0xc38] sm:$0xff]  ;;  %v9398_v4 = vcombine.low %v1134_v56, %v1138_v38  ;;  %v1182_v38 = vld [vmem:[#allocation8 + $0xd50] sm:$0xff] }
 0x3ce   :  { %v9409_v11 = vcombine.high %v1143_v2, %v1147_v3  ;;  %v9408_v24 = vcombine.low %v1143_v2, %v1147_v3  ;;  %v1194_v2 = vld [vmem:[#allocation8 + $0xdb0] sm:$0xff]  ;;  %v1191_v3 = vld [vmem:[#allocation8 + $0xd98] sm:$0xff] }
 0x3cf   :  { %7701 = vmatpush1.bf16.msra.mxu0 %v9358_v17  ;;  %v1154_v17 = vld [vmem:[#allocation8 + $0xc70] sm:$0xff] }
 0x3d0   :  { %8029 = vmatpush1.bf16.msra.mxu1 %v9360_v20  ;;  %7702 = vmatprep.subr.bf16.mxu0 %v9367_v19  ;;  %v9406_v20 = vcombine.low %v1142_v9, %v1146_v45  ;;  %v1151_v19 = vld [vmem:[#allocation8 + $0xc58] sm:$0xff]  ;;  %v9415_v22 = vcombine.high %v1150_v1, %v1154_v17  ;;  %v1190_v45 = vld [vmem:[#allocation8 + $0xd90] sm:$0xff] }
 0x3d1   :  { %8030 = vmatprep.subr.bf16.mxu1 %v9369_v18  ;;  %v1155_v18 = vld [vmem:[#allocation8 + $0xc78] sm:$0xff] }
 0x3d2   :  { %v9416_v7 = vcombine.low %v1151_v19, %v1155_v18 }
 0x3d3   :  { %7703 = vmatpush1.bf16.msra.mxu0 %v9366_v28  ;;  %v9417_v28 = vcombine.high %v1151_v19, %v1155_v18  ;;  %v1202_v19 = vld [vmem:[#allocation8 + $0xdf0] sm:$0xff] }
 0x3d4   :  { %8031 = vmatpush1.bf16.msra.mxu1 %v9368_v10  ;;  %7704 = vmatprep.subr.bf16.mxu0 %v9375_v30  ;;  %v1159_v10 = vld [vmem:[#allocation8 + $0xc98] sm:$0xff] }
 0x3d5   :  { %8032 = vmatprep.subr.bf16.mxu1 %v9377_v47  ;;  %v1163_v30 = vld [vmem:[#allocation8 + $0xcb8] sm:$0xff]  ;;  %v9414_v47 = vcombine.low %v1150_v1, %v1154_v17 }
 0x3d6   :  { %v9425_v34 = vcombine.high %v1159_v10, %v1163_v30 }
 0x3d7   :  { %7705 = vmatpush1.bf16.msra.mxu0 %v9374_v25  ;;  %v1170_v25 = vld [vmem:[#allocation8 + $0xcf0] sm:$0xff] }
 0x3d8   :  { %8033 = vmatpush1.bf16.msra.mxu1 %v9376_v37  ;;  %7706 = vmatprep.subr.bf16.mxu0 %v9383_v41  ;;  %v1167_v37 = vld [vmem:[#allocation8 + $0xcd8] sm:$0xff]  ;;  %v9431_v43 = vcombine.high %v1166_v35, %v1170_v25 }
 0x3d9   :  { %8034 = vmatprep.subr.bf16.mxu1 %v9385_v46  ;;  %v1171_v41 = vld [vmem:[#allocation8 + $0xcf8] sm:$0xff]  ;;  %v9422_v46 = vcombine.low %v1158_v23, %v1162_v27 }
 0x3da   :  { %v9433_v44 = vcombine.high %v1167_v37, %v1171_v41  ;;  %v1203_v23 = vld [vmem:[#allocation8 + $0xdf8] sm:$0xff] }
 0x3db   :  { %7707 = vmatpush1.bf16.msra.mxu0 %v9382_v54  ;;  %v1175_v54 = vld [vmem:[#allocation8 + $0xd18] sm:$0xff] }
 0x3dc   :  { %8035 = vmatpush1.bf16.msra.mxu1 %v9384_v55  ;;  %7708 = vmatprep.subr.bf16.mxu0 %v9391_v58  ;;  %v1179_v55 = vld [vmem:[#allocation8 + $0xd38] sm:$0xff]  ;;  %v9432_v58 = vcombine.low %v1167_v37, %v1171_v41  ;;  %v1210_v37 = vld [vmem:[#allocation8 + $0xe30] sm:$0xff] }
 0x3dd   :  { %8036 = vmatprep.subr.bf16.mxu1 %v9393_v29  ;;  %v9439_v29 = vcombine.high %v1174_v33, %v1178_v53  ;;  %v9441_v56 = vcombine.high %v1175_v54, %v1179_v55  ;;  %v1207_v41 = vld [vmem:[#allocation8 + $0xe18] sm:$0xff] }
 0x3df   :  { %7709 = vmatpush1.bf16.msra.mxu0 %v9390_v36  ;;  %v1187_v36 = vld [vmem:[#allocation8 + $0xd78] sm:$0xff] }
 0x3e0   :  { %8037 = vmatpush1.bf16.msra.mxu1 %v9392_v61  ;;  %7710 = vmatprep.subr.bf16.mxu0 %v9399_v40  ;;  %v9438_v61 = vcombine.low %v1174_v33, %v1178_v53  ;;  %v9440_v40 = vcombine.low %v1175_v54, %v1179_v55  ;;  %v9449_v9 = vcombine.high %v1183_v32, %v1187_v36  ;;  %v1214_v53 = vld [vmem:[#allocation8 + $0xe50] sm:$0xff]  ;;  %v1215_v55 = vld [vmem:[#allocation8 + $0xe58] sm:$0xff] }
 0x3e1   :  { %8038 = vmatprep.subr.bf16.mxu1 %v9401_v12  ;;  %v9447_v12 = vcombine.high %v1182_v38, %v1186_v60  ;;  %v1218_v54 = vld [vmem:[#allocation8 + $0xe70] sm:$0xff] }
 0x3e3   :  { %7711 = vmatpush1.bf16.msra.mxu0 %v9398_v4  ;;  %v1195_v4 = vld [vmem:[#allocation8 + $0xdb8] sm:$0xff] }
 0x3e4   :  { %8039 = vmatpush1.bf16.msra.mxu1 %v9400_v5  ;;  %7721 = vmatprep.subr.bf16.mxu0 %v9407_v51  ;;  %v9446_v5 = vcombine.low %v1182_v38, %v1186_v60  ;;  %v9448_v51 = vcombine.low %v1183_v32, %v1187_v36  ;;  %v9457_v17 = vcombine.high %v1191_v3, %v1195_v4  ;;  %v1222_v60 = vld [vmem:[#allocation8 + $0xe90] sm:$0xff]  ;;  %v1223_v36 = vld [vmem:[#allocation8 + $0xe98] sm:$0xff] }
 0x3e5   :  { %8049 = vmatprep.subr.bf16.mxu1 %v9409_v11  ;;  %v9455_v11 = vcombine.high %v1190_v45, %v1194_v2  ;;  %v1226_v32 = vld [vmem:[#allocation8 + $0xeb0] sm:$0xff] }
 0x3e6   :  { %7713 = vmatmul.mubr.bf16.vlgmr.msra.gmra.mrb[20].mxu0 %v10850_v57 }
 0x3e7   :  { %8041 = vmatmul.mubr.bf16.vlgmr.msra.gmra.mrb[20].mxu1 %v10850_v57  ;;  %7722 = vmatpush1.bf16.msra.mxu0 %v9406_v20  ;;  %v9424_v57 = vcombine.low %v1159_v10, %v1163_v30  ;;  %v1198_v20 = vld [vmem:[#allocation8 + $0xdd0] sm:$0xff]  ;;  %v9454_v10 = vcombine.low %v1190_v45, %v1194_v2 }
 0x3e8   :  { %7753 = vmatprep.mubr.bf16.mxu0 %v10852_v62  ;;  %8050 = vmatpush1.bf16.msra.mxu1 %v9408_v24  ;;  %v1230_v2 = vld [vmem:[#allocation8 + $0xed0] sm:$0xff] }
 0x3e9   :  { %8081 = vmatprep.mubr.bf16.mxu1 %v10852_v62  ;;  %7723 = vmatprep.subr.bf16.mxu0 %v9415_v22  ;;  %v9430_v62 = vcombine.low %v1166_v35, %v1170_v25  ;;  %v1199_v22 = vld [vmem:[#allocation8 + $0xdd8] sm:$0xff]  ;;  %v1206_v25 = vld [vmem:[#allocation8 + $0xe10] sm:$0xff] }
 0x3ea   :  { %8051 = vmatprep.subr.bf16.mxu1 %v9417_v28  ;;  %v9465_v35 = vcombine.high %v1199_v22, %v1203_v23 }
 0x3eb   :  { %7724 = vmatpush1.bf16.msra.mxu0 %v9414_v47 }
 0x3ec   :  { %8052 = vmatpush1.bf16.msra.mxu1 %v9416_v7  ;;  %7725 = vmatprep.subr.bf16.mxu0 %v9423_v31  ;;  %v9456_v7 = vcombine.low %v1191_v3, %v1195_v4  ;;  %v9463_v31 = vcombine.high %v1198_v20, %v1202_v19  ;;  %v1234_v3 = vld [vmem:[#allocation8 + $0xef0] sm:$0xff]  ;;  %v1231_v4 = vld [vmem:[#allocation8 + $0xed8] sm:$0xff] }
 0x3ed   :  { %8053 = vmatprep.subr.bf16.mxu1 %v9425_v34 }
 0x3ef   :  { %7726 = vmatpush1.bf16.msra.mxu0 %v9422_v46  ;;  %v1211_v46 = vld [vmem:[#allocation8 + $0xe38] sm:$0xff] }
 0x3f0   :  { %8054 = vmatpush1.bf16.msra.mxu1 %v9424_v57  ;;  %7727 = vmatprep.subr.bf16.mxu0 %v9431_v43  ;;  %v9462_v57 = vcombine.low %v1198_v20, %v1202_v19  ;;  %v9464_v43 = vcombine.low %v1199_v22, %v1203_v23  ;;  %v9473_v33 = vcombine.high %v1207_v41, %v1211_v46  ;;  %v1238_v19 = vld [vmem:[#allocation8 + $0xf10] sm:$0xff]  ;;  %v1239_v23 = vld [vmem:[#allocation8 + $0xf18] sm:$0xff] }
 0x3f1   :  { %8055 = vmatprep.subr.bf16.mxu1 %v9433_v44  ;;  %v9471_v44 = vcombine.high %v1206_v25, %v1210_v37  ;;  %v1242_v22 = vld [vmem:[#allocation8 + $0xf30] sm:$0xff] }
 0x3f3   :  { %7728 = vmatpush1.bf16.msra.mxu0 %v9430_v62  ;;  %v1219_v62 = vld [vmem:[#allocation8 + $0xe78] sm:$0xff] }
 0x3f4   :  { %8056 = vmatpush1.bf16.msra.mxu1 %v9432_v58  ;;  %7729 = vmatprep.subr.bf16.mxu0 %v9439_v29  ;;  %v9470_v58 = vcombine.low %v1206_v25, %v1210_v37  ;;  %v9472_v29 = vcombine.low %v1207_v41, %v1211_v46  ;;  %v9481_v38 = vcombine.high %v1215_v55, %v1219_v62  ;;  %v1251_v25 = vld [vmem:[#allocation8 + $0xf78] sm:$0xff] }
 0x3f5   :  { %8057 = vmatprep.subr.bf16.mxu1 %v9441_v56  ;;  %v9479_v56 = vcombine.high %v1214_v53, %v1218_v54  ;;  %v9502_v37 = vcombine.low %v1238_v19, %v1242_v22 }
 0x3f7   :  { %7730 = vmatpush1.bf16.msra.mxu0 %v9438_v61  ;;  %v1227_v61 = vld [vmem:[#allocation8 + $0xeb8] sm:$0xff] }
 0x3f8   :  { %8058 = vmatpush1.bf16.msra.mxu1 %v9440_v40  ;;  %7731 = vmatprep.subr.bf16.mxu0 %v9447_v12  ;;  %v9478_v40 = vcombine.low %v1214_v53, %v1218_v54  ;;  %v9480_v12 = vcombine.low %v1215_v55, %v1219_v62  ;;  %v9489_v45 = vcombine.high %v1223_v36, %v1227_v61  ;;  %v1259_v53 = vld [vmem:[#allocation8 + $0xfb8] sm:$0xff] }
 0x3f9   :  { %v10924_v1 = vpop.f32.mrb[16].mxu0  ;;  %8059 = vmatprep.subr.bf16.mxu1 %v9449_v9  ;;  %v9487_v9 = vcombine.high %v1222_v60, %v1226_v32 }
 0x3fa   :  { %v10926_v18 = vpop.f32.mrb[16].mxu1  ;;  %v10928_v24 = vpop.f32.mrb[17].mxu0 }
 0x3fb   :  { %v10930_v27 = vpop.f32.mrb[17].mxu1  ;;  %v7267_v28 = vpop.f32.mrb[18].mxu0  ;;  %7732 = vmatpush1.bf16.msra.mxu0 %v9446_v5  ;;  %v1235_v5 = vld [vmem:[#allocation8 + $0xef8] sm:$0xff] }
 0x3fc   :  { %v7595_v30 = vpop.f32.mrb[18].mxu1  ;;  %8060 = vmatpush1.bf16.msra.mxu1 %v9448_v51  ;;  %v7268_v47 = vpop.f32.mrb[19].mxu0  ;;  %7733 = vmatprep.subr.bf16.mxu0 %v9455_v11  ;;  %v9486_v51 = vcombine.low %v1222_v60, %v1226_v32  ;;  %v9488_v11 = vcombine.low %v1223_v36, %v1227_v61  ;;  %v9497_v20 = vcombine.high %v1231_v4, %v1235_v5  ;;  %v1243_v28 = vld [vmem:[#allocation8 + $0xf38] sm:$0xff] }
 0x3fd   :  { %v7596_v34 = vpop.f32.mrb[19].mxu1  ;;  %8061 = vmatprep.subr.bf16.mxu1 %v9457_v17  ;;  %v9495_v17 = vcombine.high %v1230_v2, %v1234_v3  ;;  %v9496_v30 = vcombine.low %v1231_v4, %v1235_v5  ;;  %v9503_v47 = vcombine.high %v1238_v19, %v1242_v22  ;;  %v9504_v41 = vcombine.low %v1239_v23, %v1243_v28  ;;  %v1267_v60 = vld [vmem:[#allocation8 + $0xff8] sm:$0xff] }
 0x3fe   :  { %v1250_v34 = vld [vmem:[#allocation8 + $0xf70] sm:$0xff]  ;;  %v1279_v19 = vld [vmem:[#allocation8 + $0x1058] sm:$0xff] }
 0x3ff   :  { %7734 = vmatpush1.bf16.msra.mxu0 %v9454_v10  ;;  %v9494_v10 = vcombine.low %v1230_v2, %v1234_v3  ;;  %v1275_v2 = vld [vmem:[#allocation8 + $0x1038] sm:$0xff] }
 0x400   :  { %8062 = vmatpush1.bf16.msra.mxu1 %v9456_v7  ;;  %7735 = vmatprep.subr.bf16.mxu0 %v9463_v31  ;;  %v9505_v7 = vcombine.high %v1239_v23, %v1243_v28  ;;  %v1246_v31 = vld [vmem:[#allocation8 + $0xf50] sm:$0xff]  ;;  %v1283_v22 = vld [vmem:[#allocation8 + $0x1078] sm:$0xff] }
 0x401   :  { %8063 = vmatprep.subr.bf16.mxu1 %v9465_v35  ;;  %v1247_v35 = vld [vmem:[#allocation8 + $0xf58] sm:$0xff]  ;;  %v9511_v46 = vcombine.high %v1246_v31, %v1250_v34  ;;  %v9510_v54 = vcombine.low %v1246_v31, %v1250_v34 }
 0x402   :  { %v9512_v55 = vcombine.low %v1247_v35, %v1251_v25  ;;  %v1291_v31 = vld [vmem:[#allocation8 + $0x10b8] sm:$0xff] }
 0x403   :  { %7736 = vmatpush1.bf16.msra.mxu0 %v9462_v57  ;;  %v9513_v57 = vcombine.high %v1247_v35, %v1251_v25  ;;  %v9544_v35 = vcombine.low %v1279_v19, %v1283_v22 }
 0x404   :  { %8064 = vmatpush1.bf16.msra.mxu1 %v9464_v43  ;;  %7737 = vmatprep.subr.bf16.mxu0 %v9471_v44  ;;  %v1254_v43 = vld [vmem:[#allocation8 + $0xf90] sm:$0xff] }
 0x405   :  { %8065 = vmatprep.subr.bf16.mxu1 %v9473_v33  ;;  %v1258_v44 = vld [vmem:[#allocation8 + $0xfb0] sm:$0xff]  ;;  %v1255_v33 = vld [vmem:[#allocation8 + $0xf98] sm:$0xff] }
 0x406   :  { %v9519_v62 = vcombine.high %v1254_v43, %v1258_v44  ;;  %v9518_v32 = vcombine.low %v1254_v43, %v1258_v44  ;;  %v9520_v36 = vcombine.low %v1255_v33, %v1259_v53  ;;  %v1299_v43 = vld [vmem:[#allocation8 + $0x10f8] sm:$0xff] }
 0x407   :  { %7738 = vmatpush1.bf16.msra.mxu0 %v9470_v58  ;;  %v9521_v58 = vcombine.high %v1255_v33, %v1259_v53 }
 0x408   :  { %8066 = vmatpush1.bf16.msra.mxu1 %v9472_v29  ;;  %7739 = vmatprep.subr.bf16.mxu0 %v9479_v56  ;;  %v1262_v29 = vld [vmem:[#allocation8 + $0xfd0] sm:$0xff] }
 0x409   :  { %8067 = vmatprep.subr.bf16.mxu1 %v9481_v38  ;;  %v1266_v56 = vld [vmem:[#allocation8 + $0xff0] sm:$0xff]  ;;  %v1263_v38 = vld [vmem:[#allocation8 + $0xfd8] sm:$0xff] }
 0x40a   :  { %v9527_v61 = vcombine.high %v1262_v29, %v1266_v56  ;;  %v9526_v3 = vcombine.low %v1262_v29, %v1266_v56  ;;  %v9528_v4 = vcombine.low %v1263_v38, %v1267_v60 }
 0x40b   :  { %7740 = vmatpush1.bf16.msra.mxu0 %v9478_v40  ;;  %v9529_v40 = vcombine.high %v1263_v38, %v1267_v60  ;;  %v1310_v60 = vld [vmem:[#allocation8 + $0x1150] sm:$0xff] }
 0x40c   :  { %8068 = vmatpush1.bf16.msra.mxu1 %v9480_v12  ;;  %7741 = vmatprep.subr.bf16.mxu0 %v9487_v9  ;;  %v1270_v12 = vld [vmem:[#allocation8 + $0x1010] sm:$0xff] }
 0x40d   :  { %8069 = vmatprep.subr.bf16.mxu1 %v9489_v45  ;;  %v1274_v9 = vld [vmem:[#allocation8 + $0x1030] sm:$0xff]  ;;  %v1271_v45 = vld [vmem:[#allocation8 + $0x1018] sm:$0xff] }
 0x40e   :  { %v9535_v5 = vcombine.high %v1270_v12, %v1274_v9  ;;  %v9536_v23 = vcombine.low %v1271_v45, %v1275_v2 }
 0x40f   :  { %7742 = vmatpush1.bf16.msra.mxu0 %v9486_v51  ;;  %v9537_v51 = vcombine.high %v1271_v45, %v1275_v2  ;;  %v1318_v2 = vld [vmem:[#allocation8 + $0x1190] sm:$0xff] }
 0x410   :  { %8070 = vmatpush1.bf16.msra.mxu1 %v9488_v11  ;;  %7743 = vmatprep.subr.bf16.mxu0 %v9495_v17  ;;  %v1278_v11 = vld [vmem:[#allocation8 + $0x1050] sm:$0xff] }
 0x411   :  { %8071 = vmatprep.subr.bf16.mxu1 %v9497_v20  ;;  %v1282_v17 = vld [vmem:[#allocation8 + $0x1070] sm:$0xff]  ;;  %v9534_v20 = vcombine.low %v1270_v12, %v1274_v9 }
 0x412   :  { %v9543_v28 = vcombine.high %v1278_v11, %v1282_v17  ;;  %v9542_v34 = vcombine.low %v1278_v11, %v1282_v17 }
 0x413   :  { %7744 = vmatpush1.bf16.msra.mxu0 %v9494_v10  ;;  %v1286_v10 = vld [vmem:[#allocation8 + $0x1090] sm:$0xff] }
 0x414   :  { %8072 = vmatpush1.bf16.msra.mxu1 %v9496_v30  ;;  %7745 = vmatprep.subr.bf16.mxu0 %v9503_v47  ;;  %v1290_v30 = vld [vmem:[#allocation8 + $0x10b0] sm:$0xff]  ;;  %v9545_v47 = vcombine.high %v1279_v19, %v1283_v22 }
 0x415   :  { %8073 = vmatprep.subr.bf16.mxu1 %v9505_v7  ;;  %v1287_v7 = vld [vmem:[#allocation8 + $0x1098] sm:$0xff]  ;;  %v9551_v25 = vcombine.high %v1286_v10, %v1290_v30  ;;  %v9550_v44 = vcombine.low %v1286_v10, %v1290_v30  ;;  %v1326_v19 = vld [vmem:[#allocation8 + $0x11d0] sm:$0xff] }
 0x416   :  { %v1330_v22 = vld [vmem:[#allocation8 + $0x11f0] sm:$0xff] }
 0x417   :  { %7746 = vmatpush1.bf16.msra.mxu0 %v9502_v37  ;;  %v9553_v37 = vcombine.high %v1287_v7, %v1291_v31 }
 0x418   :  { %8074 = vmatpush1.bf16.msra.mxu1 %v9504_v41  ;;  %7747 = vmatprep.subr.bf16.mxu0 %v9511_v46  ;;  %v1294_v41 = vld [vmem:[#allocation8 + $0x10d0] sm:$0xff] }
 0x419   :  { %8075 = vmatprep.subr.bf16.mxu1 %v9513_v57  ;;  %v1298_v46 = vld [vmem:[#allocation8 + $0x10f0] sm:$0xff]  ;;  %v1295_v57 = vld [vmem:[#allocation8 + $0x10d8] sm:$0xff] }
 0x41a   :  { %v9559_v33 = vcombine.high %v1294_v41, %v1298_v46  ;;  %v9561_v53 = vcombine.high %v1295_v57, %v1299_v43  ;;  %v9560_v29 = vcombine.low %v1295_v57, %v1299_v43  ;;  %v1342_v43 = vld [vmem:[#allocation8 + $0x1250] sm:$0xff] }
 0x41b   :  { %7748 = vmatpush1.bf16.msra.mxu0 %v9510_v54  ;;  %v1302_v54 = vld [vmem:[#allocation8 + $0x1110] sm:$0xff] }
 0x41c   :  { %8076 = vmatpush1.bf16.msra.mxu1 %v9512_v55  ;;  %7749 = vmatprep.subr.bf16.mxu0 %v9519_v62  ;;  %v1306_v55 = vld [vmem:[#allocation8 + $0x1130] sm:$0xff]  ;;  %v1303_v62 = vld [vmem:[#allocation8 + $0x1118] sm:$0xff] }
 0x41d   :  { %8077 = vmatprep.subr.bf16.mxu1 %v9521_v58  ;;  %v1307_v58 = vld [vmem:[#allocation8 + $0x1138] sm:$0xff]  ;;  %v9567_v56 = vcombine.high %v1302_v54, %v1306_v55 }
 0x41e   :  { %v9569_v38 = vcombine.high %v1303_v62, %v1307_v58  ;;  %v9568_v12 = vcombine.low %v1303_v62, %v1307_v58  ;;  %v1350_v58 = vld [vmem:[#allocation8 + $0x1290] sm:$0xff] }
 0x41f   :  { %7750 = vmatpush1.bf16.msra.mxu0 %v9518_v32  ;;  %v1314_v32 = vld [vmem:[#allocation8 + $0x1170] sm:$0xff] }
 0x420   :  { %8078 = vmatpush1.bf16.msra.mxu1 %v9520_v36  ;;  %7751 = vmatprep.subr.bf16.mxu0 %v9527_v61  ;;  %v1311_v36 = vld [vmem:[#allocation8 + $0x1158] sm:$0xff]  ;;  %v9575_v9 = vcombine.high %v1310_v60, %v1314_v32 }
 0x421   :  { %8079 = vmatprep.subr.bf16.mxu1 %v9529_v40  ;;  %v1315_v61 = vld [vmem:[#allocation8 + $0x1178] sm:$0xff]  ;;  %v9566_v40 = vcombine.low %v1302_v54, %v1306_v55 }
 0x422   :  { %v9577_v45 = vcombine.high %v1311_v36, %v1315_v61  ;;  %v9576_v11 = vcombine.low %v1311_v36, %v1315_v61  ;;  %v1358_v61 = vld [vmem:[#allocation8 + $0x12d0] sm:$0xff] }
 0x423   :  { %7752 = vmatpush1.bf16.msra.mxu0 %v9526_v3  ;;  %v1322_v3 = vld [vmem:[#allocation8 + $0x11b0] sm:$0xff] }
 0x424   :  { %8080 = vmatpush1.bf16.msra.mxu1 %v9528_v4  ;;  %7762 = vmatprep.subr.bf16.mxu0 %v9535_v5  ;;  %v1319_v4 = vld [vmem:[#allocation8 + $0x1198] sm:$0xff]  ;;  %v9583_v17 = vcombine.high %v1318_v2, %v1322_v3  ;;  %v9582_v10 = vcombine.low %v1318_v2, %v1322_v3 }
 0x425   :  { %8090 = vmatprep.subr.bf16.mxu1 %v9537_v51  ;;  %v1323_v5 = vld [vmem:[#allocation8 + $0x11b8] sm:$0xff]  ;;  %v9574_v51 = vcombine.low %v1310_v60, %v1314_v32 }
 0x426   :  { %7754 = vmatmul.mubr.bf16.vlgmr.msra.gmra.mrb[20].mxu0 %v10865_v0  ;;  %v9584_v30 = vcombine.low %v1319_v4, %v1323_v5 }
 0x427   :  { %8082 = vmatmul.mubr.bf16.vlgmr.msra.gmra.mrb[20].mxu1 %v10865_v0  ;;  %7763 = vmatpush1.bf16.msra.mxu0 %v9534_v20  ;;  %v9552_v0 = vcombine.low %v1287_v7, %v1291_v31  ;;  %v9585_v20 = vcombine.high %v1319_v4, %v1323_v5  ;;  %v1334_v31 = vld [vmem:[#allocation8 + $0x1210] sm:$0xff] }
 0x428   :  { %7794 = vmatprep.mubr.bf16.mxu0 %v10867_v21  ;;  %8091 = vmatpush1.bf16.msra.mxu1 %v9536_v23  ;;  %v1327_v23 = vld [vmem:[#allocation8 + $0x11d8] sm:$0xff]  ;;  %v1366_v5 = vld [vmem:[#allocation8 + $0x1310] sm:$0xff] }
 0x429   :  { %8122 = vmatprep.mubr.bf16.mxu1 %v10867_v21  ;;  %7764 = vmatprep.subr.bf16.mxu0 %v9543_v28  ;;  %v9558_v21 = vcombine.low %v1294_v41, %v1298_v46  ;;  %v1331_v28 = vld [vmem:[#allocation8 + $0x11f8] sm:$0xff] }
 0x42a   :  { %8092 = vmatprep.subr.bf16.mxu1 %v9545_v47  ;;  %v9591_v47 = vcombine.high %v1326_v19, %v1330_v22  ;;  %v9593_v7 = vcombine.high %v1327_v23, %v1331_v28  ;;  %v9592_v41 = vcombine.low %v1327_v23, %v1331_v28  ;;  %v1374_v28 = vld [vmem:[#allocation8 + $0x1350] sm:$0xff] }
 0x42b   :  { %7765 = vmatpush1.bf16.msra.mxu0 %v9542_v34  ;;  %v1338_v34 = vld [vmem:[#allocation8 + $0x1230] sm:$0xff] }
 0x42c   :  { %8093 = vmatpush1.bf16.msra.mxu1 %v9544_v35  ;;  %7766 = vmatprep.subr.bf16.mxu0 %v9551_v25  ;;  %v1335_v35 = vld [vmem:[#allocation8 + $0x1218] sm:$0xff]  ;;  %v9599_v46 = vcombine.high %v1334_v31, %v1338_v34 }
 0x42d   :  { %8094 = vmatprep.subr.bf16.mxu1 %v9553_v37  ;;  %v1339_v25 = vld [vmem:[#allocation8 + $0x1238] sm:$0xff]  ;;  %v9590_v37 = vcombine.low %v1326_v19, %v1330_v22 }
 0x42e   :  { %v9601_v57 = vcombine.high %v1335_v35, %v1339_v25  ;;  %v9600_v54 = vcombine.low %v1335_v35, %v1339_v25  ;;  %v1382_v25 = vld [vmem:[#allocation8 + $0x1390] sm:$0xff] }
 0x42f   :  { %7767 = vmatpush1.bf16.msra.mxu0 %v9550_v44  ;;  %v1346_v44 = vld [vmem:[#allocation8 + $0x1270] sm:$0xff] }
 0x430   :  { %8095 = vmatpush1.bf16.msra.mxu1 %v9552_v0  ;;  %7768 = vmatprep.subr.bf16.mxu0 %v9559_v33  ;;  %v1343_v0 = vld [vmem:[#allocation8 + $0x1258] sm:$0xff]  ;;  %v9607_v55 = vcombine.high %v1342_v43, %v1346_v44 }
 0x431   :  { %8096 = vmatprep.subr.bf16.mxu1 %v9561_v53  ;;  %v1347_v33 = vld [vmem:[#allocation8 + $0x1278] sm:$0xff]  ;;  %v9598_v53 = vcombine.low %v1334_v31, %v1338_v34 }
 0x432   :  { %v9609_v62 = vcombine.high %v1343_v0, %v1347_v33  ;;  %v9608_v60 = vcombine.low %v1343_v0, %v1347_v33  ;;  %v1390_v33 = vld [vmem:[#allocation8 + $0x13d0] sm:$0xff] }
 0x433   :  { %7769 = vmatpush1.bf16.msra.mxu0 %v9558_v21  ;;  %v1354_v21 = vld [vmem:[#allocation8 + $0x12b0] sm:$0xff] }
 0x434   :  { %8097 = vmatpush1.bf16.msra.mxu1 %v9560_v29  ;;  %7770 = vmatprep.subr.bf16.mxu0 %v9567_v56  ;;  %v1351_v29 = vld [vmem:[#allocation8 + $0x1298] sm:$0xff]  ;;  %v9615_v32 = vcombine.high %v1350_v58, %v1354_v21 }
 0x435   :  { %8098 = vmatprep.subr.bf16.mxu1 %v9569_v38  ;;  %v1355_v56 = vld [vmem:[#allocation8 + $0x12b8] sm:$0xff]  ;;  %v9606_v38 = vcombine.low %v1342_v43, %v1346_v44 }
 0x436   :  { %v9617_v36 = vcombine.high %v1351_v29, %v1355_v56  ;;  %v9616_v2 = vcombine.low %v1351_v29, %v1355_v56  ;;  %v1398_v56 = vld [vmem:[#allocation8 + $0x1410] sm:$0xff] }
 0x437   :  { %7771 = vmatpush1.bf16.msra.mxu0 %v9566_v40  ;;  %v1362_v40 = vld [vmem:[#allocation8 + $0x12f0] sm:$0xff] }
 0x438   :  { %8099 = vmatpush1.bf16.msra.mxu1 %v9568_v12  ;;  %7772 = vmatprep.subr.bf16.mxu0 %v9575_v9  ;;  %v1359_v12 = vld [vmem:[#allocation8 + $0x12d8] sm:$0xff]  ;;  %v9623_v3 = vcombine.high %v1358_v61, %v1362_v40 }
 0x439   :  { %8100 = vmatprep.subr.bf16.mxu1 %v9577_v45  ;;  %v1363_v9 = vld [vmem:[#allocation8 + $0x12f8] sm:$0xff]  ;;  %v9614_v45 = vcombine.low %v1350_v58, %v1354_v21 }
 0x43a   :  { %v9625_v4 = vcombine.high %v1359_v12, %v1363_v9  ;;  %v9624_v19 = vcombine.low %v1359_v12, %v1363_v9  ;;  %v1406_v9 = vld [vmem:[#allocation8 + $0x1450] sm:$0xff] }
 0x43b   :  { %7773 = vmatpush1.bf16.msra.mxu0 %v9574_v51  ;;  %v1370_v51 = vld [vmem:[#allocation8 + $0x1330] sm:$0xff] }
 0x43c   :  { %8101 = vmatpush1.bf16.msra.mxu1 %v9576_v11  ;;  %7774 = vmatprep.subr.bf16.mxu0 %v9583_v17  ;;  %v1367_v11 = vld [vmem:[#allocation8 + $0x1318] sm:$0xff]  ;;  %v9631_v22 = vcombine.high %v1366_v5, %v1370_v51 }
 0x43d   :  { %8102 = vmatprep.subr.bf16.mxu1 %v9585_v20  ;;  %v1371_v17 = vld [vmem:[#allocation8 + $0x1338] sm:$0xff]  ;;  %v9622_v20 = vcombine.low %v1358_v61, %v1362_v40 }
 0x43e   :  { %v9633_v23 = vcombine.high %v1367_v11, %v1371_v17  ;;  %v9632_v31 = vcombine.low %v1367_v11, %v1371_v17  ;;  %v1414_v11 = vld [vmem:[#allocation8 + $0x1490] sm:$0xff] }
 0x43f   :  { %7775 = vmatpush1.bf16.msra.mxu0 %v9582_v10  ;;  %v1378_v10 = vld [vmem:[#allocation8 + $0x1370] sm:$0xff] }
 0x440   :  { %8103 = vmatpush1.bf16.msra.mxu1 %v9584_v30  ;;  %7776 = vmatprep.subr.bf16.mxu0 %v9591_v47  ;;  %v1375_v30 = vld [vmem:[#allocation8 + $0x1358] sm:$0xff]  ;;  %v9639_v34 = vcombine.high %v1374_v28, %v1378_v10  ;;  %v1418_v17 = vld [vmem:[#allocation8 + $0x14b0] sm:$0xff] }
 0x441   :  { %8104 = vmatprep.subr.bf16.mxu1 %v9593_v7  ;;  %v1379_v47 = vld [vmem:[#allocation8 + $0x1378] sm:$0xff]  ;;  %v9630_v7 = vcombine.low %v1366_v5, %v1370_v51 }
 0x442   :  { %v9641_v35 = vcombine.high %v1375_v30, %v1379_v47  ;;  %v9640_v43 = vcombine.low %v1375_v30, %v1379_v47  ;;  %v1422_v47 = vld [vmem:[#allocation8 + $0x14d0] sm:$0xff] }
 0x443   :  { %7777 = vmatpush1.bf16.msra.mxu0 %v9590_v37  ;;  %v1386_v37 = vld [vmem:[#allocation8 + $0x13b0] sm:$0xff] }
 0x444   :  { %8105 = vmatpush1.bf16.msra.mxu1 %v9592_v41  ;;  %7778 = vmatprep.subr.bf16.mxu0 %v9599_v46  ;;  %v1383_v41 = vld [vmem:[#allocation8 + $0x1398] sm:$0xff]  ;;  %v9647_v44 = vcombine.high %v1382_v25, %v1386_v37 }
 0x445   :  { %8106 = vmatprep.subr.bf16.mxu1 %v9601_v57  ;;  %v1387_v46 = vld [vmem:[#allocation8 + $0x13b8] sm:$0xff]  ;;  %v9638_v57 = vcombine.low %v1374_v28, %v1378_v10  ;;  %v9679_v10 = vcombine.high %v1414_v11, %v1418_v17 }
 0x446   :  { %v9649_v0 = vcombine.high %v1383_v41, %v1387_v46  ;;  %v9648_v58 = vcombine.low %v1383_v41, %v1387_v46  ;;  %v1430_v41 = vld [vmem:[#allocation8 + $0x1510] sm:$0xff] }
 0x447   :  { %7779 = vmatpush1.bf16.msra.mxu0 %v9598_v53  ;;  %v1394_v53 = vld [vmem:[#allocation8 + $0x13f0] sm:$0xff] }
 0x448   :  { %8107 = vmatpush1.bf16.msra.mxu1 %v9600_v54  ;;  %7780 = vmatprep.subr.bf16.mxu0 %v9607_v55  ;;  %v1391_v54 = vld [vmem:[#allocation8 + $0x13d8] sm:$0xff]  ;;  %v9655_v21 = vcombine.high %v1390_v33, %v1394_v53  ;;  %v1434_v46 = vld [vmem:[#allocation8 + $0x1530] sm:$0xff] }
 0x449   :  { %8108 = vmatprep.subr.bf16.mxu1 %v9609_v62  ;;  %v1395_v55 = vld [vmem:[#allocation8 + $0x13f8] sm:$0xff]  ;;  %v9646_v62 = vcombine.low %v1382_v25, %v1386_v37 }
 0x44a   :  { %v9657_v29 = vcombine.high %v1391_v54, %v1395_v55  ;;  %v9656_v61 = vcombine.low %v1391_v54, %v1395_v55  ;;  %v1442_v54 = vld [vmem:[#allocation8 + $0x1570] sm:$0xff]  ;;  %v1439_v55 = vld [vmem:[#allocation8 + $0x1558] sm:$0xff] }
 0x44b   :  { %7781 = vmatpush1.bf16.msra.mxu0 %v9606_v38  ;;  %v1402_v38 = vld [vmem:[#allocation8 + $0x1430] sm:$0xff] }
 0x44c   :  { %8109 = vmatpush1.bf16.msra.mxu1 %v9608_v60  ;;  %7782 = vmatprep.subr.bf16.mxu0 %v9615_v32  ;;  %v1399_v60 = vld [vmem:[#allocation8 + $0x1418] sm:$0xff]  ;;  %v9663_v40 = vcombine.high %v1398_v56, %v1402_v38 }
 0x44d   :  { %8110 = vmatprep.subr.bf16.mxu1 %v9617_v36  ;;  %v1403_v32 = vld [vmem:[#allocation8 + $0x1438] sm:$0xff]  ;;  %v9654_v36 = vcombine.low %v1390_v33, %v1394_v53  ;;  %v1438_v53 = vld [vmem:[#allocation8 + $0x1550] sm:$0xff] }
 0x44e   :  { %v9665_v12 = vcombine.high %v1399_v60, %v1403_v32  ;;  %v9664_v5 = vcombine.low %v1399_v60, %v1403_v32  ;;  %v1450_v60 = vld [vmem:[#allocation8 + $0x15b0] sm:$0xff]  ;;  %v1447_v32 = vld [vmem:[#allocation8 + $0x1598] sm:$0xff] }
 0x44f   :  { %7783 = vmatpush1.bf16.msra.mxu0 %v9614_v45  ;;  %v1410_v45 = vld [vmem:[#allocation8 + $0x1470] sm:$0xff] }
 0x450   :  { %8111 = vmatpush1.bf16.msra.mxu1 %v9616_v2  ;;  %7784 = vmatprep.subr.bf16.mxu0 %v9623_v3  ;;  %v9662_v2 = vcombine.low %v1398_v56, %v1402_v38  ;;  %v1407_v3 = vld [vmem:[#allocation8 + $0x1458] sm:$0xff]  ;;  %v9671_v51 = vcombine.high %v1406_v9, %v1410_v45  ;;  %v1446_v38 = vld [vmem:[#allocation8 + $0x1590] sm:$0xff] }
 0x451   :  { %8112 = vmatprep.subr.bf16.mxu1 %v9625_v4  ;;  %v1411_v4 = vld [vmem:[#allocation8 + $0x1478] sm:$0xff] }
 0x452   :  { %v9672_v28 = vcombine.low %v1407_v3, %v1411_v4 }
 0x453   :  { %7785 = vmatpush1.bf16.msra.mxu0 %v9622_v20  ;;  %v9673_v20 = vcombine.high %v1407_v3, %v1411_v4  ;;  %v1455_v3 = vld [vmem:[#allocation8 + $0x15d8] sm:$0xff] }
 0x454   :  { %8113 = vmatpush1.bf16.msra.mxu1 %v9624_v19  ;;  %7786 = vmatprep.subr.bf16.mxu0 %v9631_v22  ;;  %v1415_v19 = vld [vmem:[#allocation8 + $0x1498] sm:$0xff] }
 0x455   :  { %8114 = vmatprep.subr.bf16.mxu1 %v9633_v23  ;;  %v1419_v22 = vld [vmem:[#allocation8 + $0x14b8] sm:$0xff]  ;;  %v9670_v23 = vcombine.low %v1406_v9, %v1410_v45  ;;  %v1454_v45 = vld [vmem:[#allocation8 + $0x15d0] sm:$0xff] }
 0x456   :  { %v9681_v30 = vcombine.high %v1415_v19, %v1419_v22  ;;  %v1459_v4 = vld [vmem:[#allocation8 + $0x15f8] sm:$0xff] }
 0x457   :  { %7787 = vmatpush1.bf16.msra.mxu0 %v9630_v7  ;;  %v1426_v7 = vld [vmem:[#allocation8 + $0x14f0] sm:$0xff] }
 0x458   :  { %8115 = vmatpush1.bf16.msra.mxu1 %v9632_v31  ;;  %7788 = vmatprep.subr.bf16.mxu0 %v9639_v34  ;;  %v1423_v31 = vld [vmem:[#allocation8 + $0x14d8] sm:$0xff]  ;;  %v9687_v25 = vcombine.high %v1422_v47, %v1426_v7 }
 0x459   :  { %8116 = vmatprep.subr.bf16.mxu1 %v9641_v35  ;;  %v1427_v34 = vld [vmem:[#allocation8 + $0x14f8] sm:$0xff]  ;;  %v9678_v35 = vcombine.low %v1414_v11, %v1418_v17  ;;  %v9721_v17 = vcombine.high %v1455_v3, %v1459_v4 }
 0x45a   :  { %v9689_v37 = vcombine.high %v1423_v31, %v1427_v34 }
 0x45b   :  { %7789 = vmatpush1.bf16.msra.mxu0 %v9638_v57  ;;  %v1431_v57 = vld [vmem:[#allocation8 + $0x1518] sm:$0xff] }
 0x45c   :  { %8117 = vmatpush1.bf16.msra.mxu1 %v9640_v43  ;;  %7790 = vmatprep.subr.bf16.mxu0 %v9647_v44  ;;  %v1435_v43 = vld [vmem:[#allocation8 + $0x1538] sm:$0xff]  ;;  %v9688_v44 = vcombine.low %v1423_v31, %v1427_v34  ;;  %v1474_v31 = vld [vmem:[#allocation8 + $0x1670] sm:$0xff] }
 0x45d   :  { %8118 = vmatprep.subr.bf16.mxu1 %v9649_v0  ;;  %v9695_v0 = vcombine.high %v1430_v41, %v1434_v46  ;;  %v9697_v33 = vcombine.high %v1431_v57, %v1435_v43  ;;  %v1471_v34 = vld [vmem:[#allocation8 + $0x1658] sm:$0xff] }
 0x45f   :  { %7791 = vmatpush1.bf16.msra.mxu0 %v9646_v62  ;;  %v1443_v62 = vld [vmem:[#allocation8 + $0x1578] sm:$0xff] }
 0x460   :  { %8119 = vmatpush1.bf16.msra.mxu1 %v9648_v58  ;;  %7792 = vmatprep.subr.bf16.mxu0 %v9655_v21  ;;  %v9694_v58 = vcombine.low %v1430_v41, %v1434_v46  ;;  %v9696_v21 = vcombine.low %v1431_v57, %v1435_v43  ;;  %v9705_v56 = vcombine.high %v1439_v55, %v1443_v62  ;;  %v1478_v46 = vld [vmem:[#allocation8 + $0x1690] sm:$0xff]  ;;  %v1479_v43 = vld [vmem:[#allocation8 + $0x1698] sm:$0xff] }
 0x461   :  { %8120 = vmatprep.subr.bf16.mxu1 %v9657_v29  ;;  %v9703_v29 = vcombine.high %v1438_v53, %v1442_v54  ;;  %v1482_v57 = vld [vmem:[#allocation8 + $0x16b0] sm:$0xff] }
 0x463   :  { %7793 = vmatpush1.bf16.msra.mxu0 %v9654_v36  ;;  %v1451_v36 = vld [vmem:[#allocation8 + $0x15b8] sm:$0xff] }
 0x464   :  { %8121 = vmatpush1.bf16.msra.mxu1 %v9656_v61  ;;  %7803 = vmatprep.subr.bf16.mxu0 %v9663_v40  ;;  %v9702_v61 = vcombine.low %v1438_v53, %v1442_v54  ;;  %v9704_v40 = vcombine.low %v1439_v55, %v1443_v62  ;;  %v9713_v9 = vcombine.high %v1447_v32, %v1451_v36  ;;  %v1486_v54 = vld [vmem:[#allocation8 + $0x16d0] sm:$0xff]  ;;  %v1487_v62 = vld [vmem:[#allocation8 + $0x16d8] sm:$0xff] }
 0x465   :  { %8131 = vmatprep.subr.bf16.mxu1 %v9665_v12  ;;  %v9711_v12 = vcombine.high %v1446_v38, %v1450_v60  ;;  %v1490_v55 = vld [vmem:[#allocation8 + $0x16f0] sm:$0xff] }
 0x466   :  { %7795 = vmatmul.mubr.bf16.vlgmr.msra.gmra.mrb[20].mxu0 %v10877_v39 }
 0x467   :  { %8123 = vmatmul.mubr.bf16.vlgmr.msra.gmra.mrb[20].mxu1 %v10877_v39  ;;  %7804 = vmatpush1.bf16.msra.mxu0 %v9662_v2  ;;  %v9680_v39 = vcombine.low %v1415_v19, %v1419_v22  ;;  %v1458_v2 = vld [vmem:[#allocation8 + $0x15f0] sm:$0xff]  ;;  %v1463_v22 = vld [vmem:[#allocation8 + $0x1618] sm:$0xff] }
 0x468   :  { %7835 = vmatprep.mubr.bf16.mxu0 %v10879_v52  ;;  %8132 = vmatpush1.bf16.msra.mxu1 %v9664_v5  ;;  %v9710_v5 = vcombine.low %v1446_v38, %v1450_v60  ;;  %v9719_v11 = vcombine.high %v1454_v45, %v1458_v2  ;;  %v1466_v19 = vld [vmem:[#allocation8 + $0x1630] sm:$0xff] }
 0x469   :  { %8163 = vmatprep.mubr.bf16.mxu1 %v10879_v52  ;;  %7805 = vmatprep.subr.bf16.mxu0 %v9671_v51  ;;  %v9686_v52 = vcombine.low %v1422_v47, %v1426_v7  ;;  %v9712_v51 = vcombine.low %v1447_v32, %v1451_v36  ;;  %v1470_v7 = vld [vmem:[#allocation8 + $0x1650] sm:$0xff]  ;;  %v1495_v36 = vld [vmem:[#allocation8 + $0x1718] sm:$0xff] }
 0x46a   :  { %8133 = vmatprep.subr.bf16.mxu1 %v9673_v20  ;;  %v1462_v20 = vld [vmem:[#allocation8 + $0x1610] sm:$0xff] }
 0x46b   :  { %7806 = vmatpush1.bf16.msra.mxu0 %v9670_v23  ;;  %v1467_v23 = vld [vmem:[#allocation8 + $0x1638] sm:$0xff]  ;;  %v1494_v60 = vld [vmem:[#allocation8 + $0x1710] sm:$0xff] }
 0x46c   :  { %8134 = vmatpush1.bf16.msra.mxu1 %v9672_v28  ;;  %7807 = vmatprep.subr.bf16.mxu0 %v9679_v10  ;;  %v9718_v28 = vcombine.low %v1454_v45, %v1458_v2  ;;  %v9720_v10 = vcombine.low %v1455_v3, %v1459_v4  ;;  %v9729_v47 = vcombine.high %v1463_v22, %v1467_v23  ;;  %v1498_v32 = vld [vmem:[#allocation8 + $0x1730] sm:$0xff]  ;;  %v1503_v4 = vld [vmem:[#allocation8 + $0x1758] sm:$0xff] }
 0x46d   :  { %8135 = vmatprep.subr.bf16.mxu1 %v9681_v30  ;;  %v9727_v30 = vcombine.high %v1462_v20, %v1466_v19  ;;  %v1502_v2 = vld [vmem:[#allocation8 + $0x1750] sm:$0xff] }
 0x46e   :  { %v1506_v3 = vld [vmem:[#allocation8 + $0x1770] sm:$0xff] }
 0x46f   :  { %7808 = vmatpush1.bf16.msra.mxu0 %v9678_v35  ;;  %v1475_v35 = vld [vmem:[#allocation8 + $0x1678] sm:$0xff] }
 0x470   :  { %8136 = vmatpush1.bf16.msra.mxu1 %v9680_v39  ;;  %7809 = vmatprep.subr.bf16.mxu0 %v9687_v25  ;;  %v9726_v39 = vcombine.low %v1462_v20, %v1466_v19  ;;  %v9728_v25 = vcombine.low %v1463_v22, %v1467_v23  ;;  %v9737_v41 = vcombine.high %v1471_v34, %v1475_v35  ;;  %v1510_v19 = vld [vmem:[#allocation8 + $0x1790] sm:$0xff]  ;;  %v1511_v23 = vld [vmem:[#allocation8 + $0x1798] sm:$0xff] }
 0x471   :  { %8137 = vmatprep.subr.bf16.mxu1 %v9689_v37  ;;  %v9735_v37 = vcombine.high %v1470_v7, %v1474_v31  ;;  %v1514_v22 = vld [vmem:[#allocation8 + $0x17b0] sm:$0xff] }
 0x473   :  { %7810 = vmatpush1.bf16.msra.mxu0 %v9686_v52  ;;  %v1483_v52 = vld [vmem:[#allocation8 + $0x16b8] sm:$0xff] }
 0x474   :  { %8138 = vmatpush1.bf16.msra.mxu1 %v9688_v44  ;;  %7811 = vmatprep.subr.bf16.mxu0 %v9695_v0  ;;  %v9734_v44 = vcombine.low %v1470_v7, %v1474_v31  ;;  %v9736_v0 = vcombine.low %v1471_v34, %v1475_v35  ;;  %v9745_v53 = vcombine.high %v1479_v43, %v1483_v52  ;;  %v1518_v31 = vld [vmem:[#allocation8 + $0x17d0] sm:$0xff]  ;;  %v1519_v35 = vld [vmem:[#allocation8 + $0x17d8] sm:$0xff] }
 0x475   :  { %8139 = vmatprep.subr.bf16.mxu1 %v9697_v33  ;;  %v9743_v33 = vcombine.high %v1478_v46, %v1482_v57  ;;  %v1522_v34 = vld [vmem:[#allocation8 + $0x17f0] sm:$0xff] }
 0x477   :  { %7812 = vmatpush1.bf16.msra.mxu0 %v9694_v58  ;;  %v1491_v58 = vld [vmem:[#allocation8 + $0x16f8] sm:$0xff] }
 0x478   :  { %8140 = vmatpush1.bf16.msra.mxu1 %v9696_v21  ;;  %7813 = vmatprep.subr.bf16.mxu0 %v9703_v29  ;;  %v9742_v21 = vcombine.low %v1478_v46, %v1482_v57  ;;  %v9744_v29 = vcombine.low %v1479_v43, %v1483_v52  ;;  %v9753_v38 = vcombine.high %v1487_v62, %v1491_v58  ;;  %v1526_v57 = vld [vmem:[#allocation8 + $0x1810] sm:$0xff]  ;;  %v1527_v52 = vld [vmem:[#allocation8 + $0x1818] sm:$0xff] }
 0x479   :  { %8141 = vmatprep.subr.bf16.mxu1 %v9705_v56  ;;  %v9751_v56 = vcombine.high %v1486_v54, %v1490_v55  ;;  %v1530_v43 = vld [vmem:[#allocation8 + $0x1830] sm:$0xff] }
 0x47b   :  { %7814 = vmatpush1.bf16.msra.mxu0 %v9702_v61  ;;  %v1499_v61 = vld [vmem:[#allocation8 + $0x1738] sm:$0xff] }
 0x47c   :  { %8142 = vmatpush1.bf16.msra.mxu1 %v9704_v40  ;;  %7815 = vmatprep.subr.bf16.mxu0 %v9711_v12  ;;  %v9750_v40 = vcombine.low %v1486_v54, %v1490_v55  ;;  %v9752_v12 = vcombine.low %v1487_v62, %v1491_v58  ;;  %v9761_v45 = vcombine.high %v1495_v36, %v1499_v61  ;;  %v1534_v55 = vld [vmem:[#allocation8 + $0x1850] sm:$0xff] }
 0x47d   :  { %8143 = vmatprep.subr.bf16.mxu1 %v9713_v9  ;;  %v9759_v9 = vcombine.high %v1494_v60, %v1498_v32  ;;  %v1538_v62 = vld [vmem:[#allocation8 + $0x1870] sm:$0xff]  ;;  %v9790_v58 = vcombine.low %v1526_v57, %v1530_v43 }
 0x47f   :  { %7816 = vmatpush1.bf16.msra.mxu0 %v9710_v5  ;;  %v1507_v5 = vld [vmem:[#allocation8 + $0x1778] sm:$0xff] }
 0x480   :  { %8144 = vmatpush1.bf16.msra.mxu1 %v9712_v51  ;;  %7817 = vmatprep.subr.bf16.mxu0 %v9719_v11  ;;  %v9758_v51 = vcombine.low %v1494_v60, %v1498_v32  ;;  %v9760_v11 = vcombine.low %v1495_v36, %v1499_v61  ;;  %v9769_v20 = vcombine.high %v1503_v4, %v1507_v5  ;;  %v1542_v60 = vld [vmem:[#allocation8 + $0x1890] sm:$0xff]  ;;  %v1543_v61 = vld [vmem:[#allocation8 + $0x1898] sm:$0xff] }
 0x481   :  { %8145 = vmatprep.subr.bf16.mxu1 %v9721_v17  ;;  %v9767_v17 = vcombine.high %v1502_v2, %v1506_v3  ;;  %v1546_v32 = vld [vmem:[#allocation8 + $0x18b0] sm:$0xff] }
 0x483   :  { %7818 = vmatpush1.bf16.msra.mxu0 %v9718_v28  ;;  %v1515_v28 = vld [vmem:[#allocation8 + $0x17b8] sm:$0xff] }
 0x484   :  { %8146 = vmatpush1.bf16.msra.mxu1 %v9720_v10  ;;  %7819 = vmatprep.subr.bf16.mxu0 %v9727_v30  ;;  %v9766_v10 = vcombine.low %v1502_v2, %v1506_v3  ;;  %v9768_v30 = vcombine.low %v1503_v4, %v1507_v5  ;;  %v9777_v7 = vcombine.high %v1511_v23, %v1515_v28  ;;  %v1550_v3 = vld [vmem:[#allocation8 + $0x18d0] sm:$0xff]  ;;  %v1551_v5 = vld [vmem:[#allocation8 + $0x18d8] sm:$0xff] }
 0x485   :  { %8147 = vmatprep.subr.bf16.mxu1 %v9729_v47  ;;  %v9775_v47 = vcombine.high %v1510_v19, %v1514_v22  ;;  %v1554_v4 = vld [vmem:[#allocation8 + $0x18f0] sm:$0xff] }
 0x487   :  { %7820 = vmatpush1.bf16.msra.mxu0 %v9726_v39  ;;  %v1523_v39 = vld [vmem:[#allocation8 + $0x17f8] sm:$0xff] }
 0x488   :  { %8148 = vmatpush1.bf16.msra.mxu1 %v9728_v25  ;;  %7821 = vmatprep.subr.bf16.mxu0 %v9735_v37  ;;  %v9774_v25 = vcombine.low %v1510_v19, %v1514_v22  ;;  %v9776_v37 = vcombine.low %v1511_v23, %v1515_v28  ;;  %v9785_v46 = vcombine.high %v1519_v35, %v1523_v39  ;;  %v1558_v19 = vld [vmem:[#allocation8 + $0x1910] sm:$0xff]  ;;  %v1559_v23 = vld [vmem:[#allocation8 + $0x1918] sm:$0xff] }
 0x489   :  { %8149 = vmatprep.subr.bf16.mxu1 %v9737_v41  ;;  %v9783_v41 = vcombine.high %v1518_v31, %v1522_v34  ;;  %v1562_v22 = vld [vmem:[#allocation8 + $0x1930] sm:$0xff]  ;;  %v1563_v28 = vld [vmem:[#allocation8 + $0x1938] sm:$0xff] }
 0x48b   :  { %7822 = vmatpush1.bf16.msra.mxu0 %v9734_v44  ;;  %v1531_v44 = vld [vmem:[#allocation8 + $0x1838] sm:$0xff] }
 0x48c   :  { %8150 = vmatpush1.bf16.msra.mxu1 %v9736_v0  ;;  %7823 = vmatprep.subr.bf16.mxu0 %v9743_v33  ;;  %v9782_v0 = vcombine.low %v1518_v31, %v1522_v34  ;;  %v9784_v33 = vcombine.low %v1519_v35, %v1523_v39  ;;  %v9793_v54 = vcombine.high %v1527_v52, %v1531_v44  ;;  %v1570_v31 = vld [vmem:[#allocation8 + $0x1970] sm:$0xff]  ;;  %v1567_v34 = vld [vmem:[#allocation8 + $0x1958] sm:$0xff] }
 0x48d   :  { %8151 = vmatprep.subr.bf16.mxu1 %v9745_v53  ;;  %v9791_v53 = vcombine.high %v1526_v57, %v1530_v43  ;;  %v1571_v35 = vld [vmem:[#allocation8 + $0x1978] sm:$0xff]  ;;  %v9822_v39 = vcombine.low %v1558_v19, %v1562_v22  ;;  %v1578_v57 = vld [vmem:[#allocation8 + $0x19b0] sm:$0xff] }
 0x48e   :  { %v1575_v43 = vld [vmem:[#allocation8 + $0x1998] sm:$0xff] }
 0x48f   :  { %7824 = vmatpush1.bf16.msra.mxu0 %v9742_v21  ;;  %v1535_v21 = vld [vmem:[#allocation8 + $0x1858] sm:$0xff] }
 0x490   :  { %8152 = vmatpush1.bf16.msra.mxu1 %v9744_v29  ;;  %7825 = vmatprep.subr.bf16.mxu0 %v9751_v56  ;;  %v1539_v29 = vld [vmem:[#allocation8 + $0x1878] sm:$0xff]  ;;  %v9792_v56 = vcombine.low %v1527_v52, %v1531_v44 }
 0x491   :  { %8153 = vmatprep.subr.bf16.mxu1 %v9753_v38  ;;  %v9799_v38 = vcombine.high %v1534_v55, %v1538_v62  ;;  %v9801_v36 = vcombine.high %v1535_v21, %v1539_v29  ;;  %v1579_v52 = vld [vmem:[#allocation8 + $0x19b8] sm:$0xff] }
 0x493   :  { %7826 = vmatpush1.bf16.msra.mxu0 %v9750_v40  ;;  %v1547_v40 = vld [vmem:[#allocation8 + $0x18b8] sm:$0xff] }
 0x494   :  { %8154 = vmatpush1.bf16.msra.mxu1 %v9752_v12  ;;  %7827 = vmatprep.subr.bf16.mxu0 %v9759_v9  ;;  %v9798_v12 = vcombine.low %v1534_v55, %v1538_v62  ;;  %v9800_v9 = vcombine.low %v1535_v21, %v1539_v29  ;;  %v9809_v2 = vcombine.high %v1543_v61, %v1547_v40  ;;  %v1586_v55 = vld [vmem:[#allocation8 + $0x19f0] sm:$0xff]  ;;  %v1583_v62 = vld [vmem:[#allocation8 + $0x19d8] sm:$0xff] }
 0x495   :  { %8155 = vmatprep.subr.bf16.mxu1 %v9761_v45  ;;  %v9807_v45 = vcombine.high %v1542_v60, %v1546_v32  ;;  %v9840_v29 = vcombine.low %v1575_v43, %v1579_v52 }
 0x497   :  { %7828 = vmatpush1.bf16.msra.mxu0 %v9758_v51  ;;  %v1555_v51 = vld [vmem:[#allocation8 + $0x18f8] sm:$0xff] }
 0x498   :  { %8156 = vmatpush1.bf16.msra.mxu1 %v9760_v11  ;;  %7829 = vmatprep.subr.bf16.mxu0 %v9767_v17  ;;  %v9806_v11 = vcombine.low %v1542_v60, %v1546_v32  ;;  %v9815_v17 = vcombine.high %v1550_v3, %v1554_v4  ;;  %v1590_v60 = vld [vmem:[#allocation8 + $0x1a10] sm:$0xff] }
 0x499   :  { %8157 = vmatprep.subr.bf16.mxu1 %v9769_v20  ;;  %v9817_v20 = vcombine.high %v1551_v5, %v1555_v51  ;;  %v1594_v32 = vld [vmem:[#allocation8 + $0x1a30] sm:$0xff] }
 0x49b   :  { %7830 = vmatpush1.bf16.msra.mxu0 %v9766_v10  ;;  %v9816_v10 = vcombine.low %v1551_v5, %v1555_v51  ;;  %v1603_v5 = vld [vmem:[#allocation8 + $0x1a78] sm:$0xff]  ;;  %v9854_v51 = vcombine.low %v1590_v60, %v1594_v32 }
 0x49c   :  { %8158 = vmatpush1.bf16.msra.mxu1 %v9768_v30  ;;  %7831 = vmatprep.subr.bf16.mxu0 %v9775_v47  ;;  %v9823_v30 = vcombine.high %v1558_v19, %v1562_v22  ;;  %v9825_v47 = vcombine.high %v1559_v23, %v1563_v28  ;;  %v1610_v19 = vld [vmem:[#allocation8 + $0x1ab0] sm:$0xff]  ;;  %v1607_v22 = vld [vmem:[#allocation8 + $0x1a98] sm:$0xff] }
 0x49d   :  { %8159 = vmatprep.subr.bf16.mxu1 %v9777_v7  ;;  %v1566_v7 = vld [vmem:[#allocation8 + $0x1950] sm:$0xff] }
 0x49e   :  { %v9830_v44 = vcombine.low %v1566_v7, %v1570_v31 }
 0x49f   :  { %7832 = vmatpush1.bf16.msra.mxu0 %v9774_v25  ;;  %v9824_v25 = vcombine.low %v1559_v23, %v1563_v28  ;;  %v1611_v23 = vld [vmem:[#allocation8 + $0x1ab8] sm:$0xff] }
 0x4a0   :  { %8160 = vmatpush1.bf16.msra.mxu1 %v9776_v37  ;;  %7833 = vmatprep.subr.bf16.mxu0 %v9783_v41  ;;  %v9831_v37 = vcombine.high %v1566_v7, %v1570_v31  ;;  %v9833_v41 = vcombine.high %v1567_v34, %v1571_v35  ;;  %v1618_v7 = vld [vmem:[#allocation8 + $0x1af0] sm:$0xff]  ;;  %v1615_v31 = vld [vmem:[#allocation8 + $0x1ad8] sm:$0xff] }
 0x4a1   :  { %8161 = vmatprep.subr.bf16.mxu1 %v9785_v46  ;;  %v1574_v46 = vld [vmem:[#allocation8 + $0x1990] sm:$0xff] }
 0x4a2   :  { %v9838_v21 = vcombine.low %v1574_v46, %v1578_v57 }
 0x4a3   :  { %7834 = vmatpush1.bf16.msra.mxu0 %v9782_v0  ;;  %v9832_v0 = vcombine.low %v1567_v34, %v1571_v35  ;;  %v1619_v34 = vld [vmem:[#allocation8 + $0x1af8] sm:$0xff] }
 0x4a4   :  { %8162 = vmatpush1.bf16.msra.mxu1 %v9784_v33  ;;  %7844 = vmatprep.subr.bf16.mxu0 %v9791_v53  ;;  %v9839_v33 = vcombine.high %v1574_v46, %v1578_v57  ;;  %v9841_v53 = vcombine.high %v1575_v43, %v1579_v52  ;;  %v1626_v46 = vld [vmem:[#allocation8 + $0x1b30] sm:$0xff]  ;;  %v1623_v57 = vld [vmem:[#allocation8 + $0x1b18] sm:$0xff] }
 0x4a5   :  { %8172 = vmatprep.subr.bf16.mxu1 %v9793_v54  ;;  %v1582_v54 = vld [vmem:[#allocation8 + $0x19d0] sm:$0xff]  ;;  %v1627_v43 = vld [vmem:[#allocation8 + $0x1b38] sm:$0xff] }
 0x4a6   :  { %7836 = vmatmul.mubr.bf16.vlgmr.msra.gmra.mrb[20].mxu0 %v10887_v59 }
 0x4a7   :  { %8164 = vmatmul.mubr.bf16.vlgmr.msra.gmra.mrb[20].mxu1 %v10887_v59  ;;  %7845 = vmatpush1.bf16.msra.mxu0 %v9790_v58  ;;  %v9808_v59 = vcombine.low %v1543_v61, %v1547_v40  ;;  %v1587_v58 = vld [vmem:[#allocation8 + $0x19f8] sm:$0xff]  ;;  %v9846_v40 = vcombine.low %v1582_v54, %v1586_v55 }
 0x4a8   :  { %7876 = vmatprep.mubr.bf16.mxu0 %v10889_v63  ;;  %8173 = vmatpush1.bf16.msra.mxu1 %v9792_v56  ;;  %v9847_v56 = vcombine.high %v1582_v54, %v1586_v55  ;;  %v1595_v61 = vld [vmem:[#allocation8 + $0x1a38] sm:$0xff]  ;;  %v1634_v54 = vld [vmem:[#allocation8 + $0x1b70] sm:$0xff] }
 0x4a9   :  { %8204 = vmatprep.mubr.bf16.mxu1 %v10889_v63  ;;  %7846 = vmatprep.subr.bf16.mxu0 %v9799_v38  ;;  %v9814_v63 = vcombine.low %v1550_v3, %v1554_v4  ;;  %v9849_v38 = vcombine.high %v1583_v62, %v1587_v58  ;;  %v1602_v3 = vld [vmem:[#allocation8 + $0x1a70] sm:$0xff]  ;;  %v1599_v4 = vld [vmem:[#allocation8 + $0x1a58] sm:$0xff] }
 0x4aa   :  { %8174 = vmatprep.subr.bf16.mxu1 %v9801_v36  ;;  %v1591_v36 = vld [vmem:[#allocation8 + $0x1a18] sm:$0xff] }
 0x4ab   :  { %7847 = vmatpush1.bf16.msra.mxu0 %v9798_v12  ;;  %v9848_v12 = vcombine.low %v1583_v62, %v1587_v58  ;;  %v1631_v55 = vld [vmem:[#allocation8 + $0x1b58] sm:$0xff] }
 0x4ac   :  { %8175 = vmatpush1.bf16.msra.mxu1 %v9800_v9  ;;  %7848 = vmatprep.subr.bf16.mxu0 %v9807_v45  ;;  %v9855_v9 = vcombine.high %v1590_v60, %v1594_v32  ;;  %v9857_v45 = vcombine.high %v1591_v36, %v1595_v61  ;;  %v1635_v62 = vld [vmem:[#allocation8 + $0x1b78] sm:$0xff]  ;;  %v1642_v60 = vld [vmem:[#allocation8 + $0x1bb0] sm:$0xff] }
 0x4ad   :  { %8176 = vmatprep.subr.bf16.mxu1 %v9809_v2  ;;  %v1598_v2 = vld [vmem:[#allocation8 + $0x1a50] sm:$0xff]  ;;  %v1639_v32 = vld [vmem:[#allocation8 + $0x1b98] sm:$0xff] }
 0x4ae   :  { %v9862_v28 = vcombine.low %v1598_v2, %v1602_v3 }
 0x4af   :  { %7849 = vmatpush1.bf16.msra.mxu0 %v9806_v11  ;;  %v9856_v11 = vcombine.low %v1591_v36, %v1595_v61  ;;  %v1643_v36 = vld [vmem:[#allocation8 + $0x1bb8] sm:$0xff] }
 0x4b0   :  { %8177 = vmatpush1.bf16.msra.mxu1 %v9808_v59  ;;  %7850 = vmatprep.subr.bf16.mxu0 %v9815_v17  ;;  %v9863_v59 = vcombine.high %v1598_v2, %v1602_v3  ;;  %v9865_v17 = vcombine.high %v1599_v4, %v1603_v5  ;;  %v1650_v2 = vld [vmem:[#allocation8 + $0x1bf0] sm:$0xff]  ;;  %v1647_v3 = vld [vmem:[#allocation8 + $0x1bd8] sm:$0xff] }
 0x4b1   :  { %8178 = vmatprep.subr.bf16.mxu1 %v9817_v20  ;;  %v1606_v20 = vld [vmem:[#allocation8 + $0x1a90] sm:$0xff] }
 0x4b2   :  { %v9870_v35 = vcombine.low %v1606_v20, %v1610_v19 }
 0x4b3   :  { %7851 = vmatpush1.bf16.msra.mxu0 %v9814_v63  ;;  %v9864_v63 = vcombine.low %v1599_v4, %v1603_v5  ;;  %v1651_v4 = vld [vmem:[#allocation8 + $0x1bf8] sm:$0xff] }
 0x4b4   :  { %8179 = vmatpush1.bf16.msra.mxu1 %v9816_v10  ;;  %7852 = vmatprep.subr.bf16.mxu0 %v9823_v30  ;;  %v9871_v10 = vcombine.high %v1606_v20, %v1610_v19  ;;  %v9873_v30 = vcombine.high %v1607_v22, %v1611_v23  ;;  %v1658_v20 = vld [vmem:[#allocation8 + $0x1c30] sm:$0xff]  ;;  %v1655_v19 = vld [vmem:[#allocation8 + $0x1c18] sm:$0xff] }
 0x4b5   :  { %8180 = vmatprep.subr.bf16.mxu1 %v9825_v47  ;;  %v1614_v47 = vld [vmem:[#allocation8 + $0x1ad0] sm:$0xff] }
 0x4b6   :  { %v9878_v52 = vcombine.low %v1614_v47, %v1618_v7 }
 0x4b7   :  { %7853 = vmatpush1.bf16.msra.mxu0 %v9822_v39  ;;  %v9872_v39 = vcombine.low %v1607_v22, %v1611_v23  ;;  %v1659_v22 = vld [vmem:[#allocation8 + $0x1c38] sm:$0xff] }
 0x4b8   :  { %8181 = vmatpush1.bf16.msra.mxu1 %v9824_v25  ;;  %7854 = vmatprep.subr.bf16.mxu0 %v9831_v37  ;;  %v9879_v25 = vcombine.high %v1614_v47, %v1618_v7  ;;  %v9881_v37 = vcombine.high %v1615_v31, %v1619_v34  ;;  %v1666_v47 = vld [vmem:[#allocation8 + $0x1c70] sm:$0xff] }
 0x4b9   :  { %8182 = vmatprep.subr.bf16.mxu1 %v9833_v41  ;;  %v1622_v41 = vld [vmem:[#allocation8 + $0x1b10] sm:$0xff] }
 0x4ba   :  { %v9886_v58 = vcombine.low %v1622_v41, %v1626_v46 }
 0x4bb   :  { %7855 = vmatpush1.bf16.msra.mxu0 %v9830_v44  ;;  %v9880_v44 = vcombine.low %v1615_v31, %v1619_v34  ;;  %v1663_v31 = vld [vmem:[#allocation8 + $0x1c58] sm:$0xff] }
 0x4bc   :  { %8183 = vmatpush1.bf16.msra.mxu1 %v9832_v0  ;;  %7856 = vmatprep.subr.bf16.mxu0 %v9839_v33  ;;  %v9887_v0 = vcombine.high %v1622_v41, %v1626_v46  ;;  %v9889_v33 = vcombine.high %v1623_v57, %v1627_v43  ;;  %v1667_v34 = vld [vmem:[#allocation8 + $0x1c78] sm:$0xff] }
 0x4bd   :  { %8184 = vmatprep.subr.bf16.mxu1 %v9841_v53  ;;  %v1630_v53 = vld [vmem:[#allocation8 + $0x1b50] sm:$0xff]  ;;  %v9929_v41 = vcombine.high %v1663_v31, %v1667_v34  ;;  %v1671_v46 = vld [vmem:[#allocation8 + $0x1c98] sm:$0xff] }
 0x4be   :  { %v9894_v61 = vcombine.low %v1630_v53, %v1634_v54 }
 0x4bf   :  { %7857 = vmatpush1.bf16.msra.mxu0 %v9838_v21  ;;  %v9888_v21 = vcombine.low %v1623_v57, %v1627_v43  ;;  %v1675_v57 = vld [vmem:[#allocation8 + $0x1cb8] sm:$0xff] }
 0x4c0   :  { %8185 = vmatpush1.bf16.msra.mxu1 %v9840_v29  ;;  %7858 = vmatprep.subr.bf16.mxu0 %v9847_v56  ;;  %v9895_v29 = vcombine.high %v1630_v53, %v1634_v54  ;;  %v9897_v56 = vcombine.high %v1631_v55, %v1635_v62  ;;  %v1682_v53 = vld [vmem:[#allocation8 + $0x1cf0] sm:$0xff]  ;;  %v1679_v54 = vld [vmem:[#allocation8 + $0x1cd8] sm:$0xff] }
 0x4c1   :  { %8186 = vmatprep.subr.bf16.mxu1 %v9849_v38  ;;  %v1638_v38 = vld [vmem:[#allocation8 + $0x1b90] sm:$0xff] }
 0x4c2   :  { %v9902_v5 = vcombine.low %v1638_v38, %v1642_v60 }
 0x4c3   :  { %7859 = vmatpush1.bf16.msra.mxu0 %v9846_v40  ;;  %v9896_v40 = vcombine.low %v1631_v55, %v1635_v62  ;;  %v1683_v55 = vld [vmem:[#allocation8 + $0x1cf8] sm:$0xff] }
 0x4c4   :  { %8187 = vmatpush1.bf16.msra.mxu1 %v9848_v12  ;;  %7860 = vmatprep.subr.bf16.mxu0 %v9855_v9  ;;  %v9903_v12 = vcombine.high %v1638_v38, %v1642_v60  ;;  %v9905_v9 = vcombine.high %v1639_v32, %v1643_v36  ;;  %v1687_v38 = vld [vmem:[#allocation8 + $0x1d18] sm:$0xff] }
 0x4c5   :  { %8188 = vmatprep.subr.bf16.mxu1 %v9857_v45  ;;  %v1646_v45 = vld [vmem:[#allocation8 + $0x1bd0] sm:$0xff]  ;;  %v1691_v60 = vld [vmem:[#allocation8 + $0x1d38] sm:$0xff] }
 0x4c6   :  { %v9910_v23 = vcombine.low %v1646_v45, %v1650_v2 }
 0x4c7   :  { %7861 = vmatpush1.bf16.msra.mxu0 %v9854_v51  ;;  %v9904_v51 = vcombine.low %v1639_v32, %v1643_v36  ;;  %v9944_v32 = vcombine.low %v1679_v54, %v1683_v55 }
 0x4c8   :  { %8189 = vmatpush1.bf16.msra.mxu1 %v9856_v11  ;;  %7862 = vmatprep.subr.bf16.mxu0 %v9863_v59  ;;  %v9911_v11 = vcombine.high %v1646_v45, %v1650_v2  ;;  %v9913_v59 = vcombine.high %v1647_v3, %v1651_v4  ;;  %v1699_v45 = vld [vmem:[#allocation8 + $0x1d78] sm:$0xff] }
 0x4c9   :  { %8190 = vmatprep.subr.bf16.mxu1 %v9865_v17  ;;  %v1654_v17 = vld [vmem:[#allocation8 + $0x1c10] sm:$0xff] }
 0x4ca   :  { %v9918_v7 = vcombine.low %v1654_v17, %v1658_v20 }
 0x4cb   :  { %7863 = vmatpush1.bf16.msra.mxu0 %v9862_v28  ;;  %v9912_v28 = vcombine.low %v1647_v3, %v1651_v4  ;;  %v9952_v3 = vcombine.low %v1687_v38, %v1691_v60 }
 0x4cc   :  { %8191 = vmatpush1.bf16.msra.mxu1 %v9864_v63  ;;  %7864 = vmatprep.subr.bf16.mxu0 %v9871_v10  ;;  %v9919_v63 = vcombine.high %v1654_v17, %v1658_v20  ;;  %v9921_v10 = vcombine.high %v1655_v19, %v1659_v22  ;;  %v1707_v17 = vld [vmem:[#allocation8 + $0x1db8] sm:$0xff] }
 0x4cd   :  { %8192 = vmatprep.subr.bf16.mxu1 %v9873_v30  ;;  %v1662_v30 = vld [vmem:[#allocation8 + $0x1c50] sm:$0xff] }
 0x4ce   :  { %v9926_v43 = vcombine.low %v1662_v30, %v1666_v47 }
 0x4cf   :  { %7865 = vmatpush1.bf16.msra.mxu0 %v9870_v35  ;;  %v9920_v35 = vcombine.low %v1655_v19, %v1659_v22 }
 0x4d0   :  { %8193 = vmatpush1.bf16.msra.mxu1 %v9872_v39  ;;  %7866 = vmatprep.subr.bf16.mxu0 %v9879_v25  ;;  %v9927_v39 = vcombine.high %v1662_v30, %v1666_v47  ;;  %v1670_v25 = vld [vmem:[#allocation8 + $0x1c90] sm:$0xff]  ;;  %v1715_v30 = vld [vmem:[#allocation8 + $0x1df8] sm:$0xff] }
 0x4d1   :  { %8194 = vmatprep.subr.bf16.mxu1 %v9881_v37  ;;  %v1674_v37 = vld [vmem:[#allocation8 + $0x1cb0] sm:$0xff] }
 0x4d2   :  { %v9934_v62 = vcombine.low %v1670_v25, %v1674_v37 }
 0x4d3   :  { %7867 = vmatpush1.bf16.msra.mxu0 %v9878_v52  ;;  %v9928_v52 = vcombine.low %v1663_v31, %v1667_v34 }
 0x4d4   :  { %8195 = vmatpush1.bf16.msra.mxu1 %v9880_v44  ;;  %7868 = vmatprep.subr.bf16.mxu0 %v9887_v0  ;;  %v9935_v44 = vcombine.high %v1670_v25, %v1674_v37  ;;  %v9937_v0 = vcombine.high %v1671_v46, %v1675_v57  ;;  %v1719_v25 = vld [vmem:[#allocation8 + $0x1e18] sm:$0xff] }
 0x4d5   :  { %8196 = vmatprep.subr.bf16.mxu1 %v9889_v33  ;;  %v1678_v33 = vld [vmem:[#allocation8 + $0x1cd0] sm:$0xff]  ;;  %v1723_v37 = vld [vmem:[#allocation8 + $0x1e38] sm:$0xff] }
 0x4d7   :  { %7869 = vmatpush1.bf16.msra.mxu0 %v9886_v58  ;;  %v9943_v58 = vcombine.high %v1678_v33, %v1682_v53 }
 0x4d8   :  { %8197 = vmatpush1.bf16.msra.mxu1 %v9888_v21  ;;  %7870 = vmatprep.subr.bf16.mxu0 %v9895_v29  ;;  %v9945_v21 = vcombine.high %v1679_v54, %v1683_v55  ;;  %v1686_v29 = vld [vmem:[#allocation8 + $0x1d10] sm:$0xff]  ;;  %v9984_v54 = vcombine.low %v1719_v25, %v1723_v37 }
 0x4d9   :  { %8198 = vmatprep.subr.bf16.mxu1 %v9897_v56  ;;  %v1690_v56 = vld [vmem:[#allocation8 + $0x1d30] sm:$0xff] }
 0x4da   :  { %v9951_v36 = vcombine.high %v1686_v29, %v1690_v56  ;;  %v9950_v2 = vcombine.low %v1686_v29, %v1690_v56  ;;  %v1739_v29 = vld [vmem:[#allocation8 + $0x1eb8] sm:$0xff] }
 0x4db   :  { %7871 = vmatpush1.bf16.msra.mxu0 %v9894_v61  ;;  %v9953_v61 = vcombine.high %v1687_v38, %v1691_v60 }
 0x4dc   :  { %8199 = vmatpush1.bf16.msra.mxu1 %v9896_v40  ;;  %7872 = vmatprep.subr.bf16.mxu0 %v9903_v12  ;;  %v1694_v40 = vld [vmem:[#allocation8 + $0x1d50] sm:$0xff] }
 0x4dd   :  { %8200 = vmatprep.subr.bf16.mxu1 %v9905_v9  ;;  %v1698_v12 = vld [vmem:[#allocation8 + $0x1d70] sm:$0xff]  ;;  %v1695_v9 = vld [vmem:[#allocation8 + $0x1d58] sm:$0xff] }
 0x4de   :  { %v9959_v4 = vcombine.high %v1694_v40, %v1698_v12  ;;  %v9958_v20 = vcombine.low %v1694_v40, %v1698_v12  ;;  %v9960_v19 = vcombine.low %v1695_v9, %v1699_v45  ;;  %v1747_v40 = vld [vmem:[#allocation8 + $0x1ef8] sm:$0xff] }
 0x4df   :  { %7873 = vmatpush1.bf16.msra.mxu0 %v9902_v5  ;;  %v9961_v5 = vcombine.high %v1695_v9, %v1699_v45 }
 0x4e0   :  { %8201 = vmatpush1.bf16.msra.mxu1 %v9904_v51  ;;  %7874 = vmatprep.subr.bf16.mxu0 %v9911_v11  ;;  %v1702_v51 = vld [vmem:[#allocation8 + $0x1d90] sm:$0xff] }
 0x4e1   :  { %8202 = vmatprep.subr.bf16.mxu1 %v9913_v59  ;;  %v1706_v11 = vld [vmem:[#allocation8 + $0x1db0] sm:$0xff]  ;;  %v1703_v59 = vld [vmem:[#allocation8 + $0x1d98] sm:$0xff] }
 0x4e2   :  { %v9967_v22 = vcombine.high %v1702_v51, %v1706_v11  ;;  %v9966_v47 = vcombine.low %v1702_v51, %v1706_v11  ;;  %v1755_v51 = vld [vmem:[#allocation8 + $0x1f38] sm:$0xff] }
 0x4e3   :  { %7875 = vmatpush1.bf16.msra.mxu0 %v9910_v23  ;;  %v9969_v23 = vcombine.high %v1703_v59, %v1707_v17 }
 0x4e4   :  { %8203 = vmatpush1.bf16.msra.mxu1 %v9912_v28  ;;  %7885 = vmatprep.subr.bf16.mxu0 %v9919_v63  ;;  %v1710_v28 = vld [vmem:[#allocation8 + $0x1dd0] sm:$0xff] }
 0x4e5   :  { %8213 = vmatprep.subr.bf16.mxu1 %v9921_v10  ;;  %v1714_v63 = vld [vmem:[#allocation8 + $0x1df0] sm:$0xff]  ;;  %v1711_v10 = vld [vmem:[#allocation8 + $0x1dd8] sm:$0xff] }
 0x4e6   :  { %7877 = vmatmul.mubr.bf16.vlgmr.msra.gmra.mrb[20].mxu0 %v10897_v6  ;;  %v9975_v31 = vcombine.high %v1710_v28, %v1714_v63  ;;  %v9977_v34 = vcombine.high %v1711_v10, %v1715_v30 }
 0x4e7   :  { %8205 = vmatmul.mubr.bf16.vlgmr.msra.gmra.mrb[20].mxu1 %v10897_v6  ;;  %7886 = vmatpush1.bf16.msra.mxu0 %v9918_v7  ;;  %v9936_v6 = vcombine.low %v1671_v46, %v1675_v57  ;;  %v9968_v7 = vcombine.low %v1703_v59, %v1707_v17  ;;  %v9976_v46 = vcombine.low %v1711_v10, %v1715_v30 }
 0x4e8   :  { %7917 = vmatprep.mubr.bf16.mxu0 %v10899_v14  ;;  %8214 = vmatpush1.bf16.msra.mxu1 %v9920_v35  ;;  %v1718_v35 = vld [vmem:[#allocation8 + $0x1e10] sm:$0xff] }
 0x4e9   :  { %8245 = vmatprep.mubr.bf16.mxu1 %v10899_v14  ;;  %7887 = vmatprep.subr.bf16.mxu0 %v9927_v39  ;;  %v9942_v14 = vcombine.low %v1678_v33, %v1682_v53  ;;  %v1722_v39 = vld [vmem:[#allocation8 + $0x1e30] sm:$0xff]  ;;  %v1731_v33 = vld [vmem:[#allocation8 + $0x1e78] sm:$0xff] }
 0x4ea   :  { %8215 = vmatprep.subr.bf16.mxu1 %v9929_v41  ;;  %v9974_v41 = vcombine.low %v1710_v28, %v1714_v63  ;;  %v9983_v57 = vcombine.high %v1718_v35, %v1722_v39  ;;  %v9982_v53 = vcombine.low %v1718_v35, %v1722_v39  ;;  %v1763_v28 = vld [vmem:[#allocation8 + $0x1f78] sm:$0xff]  ;;  %v10948_v39 = vld [vmem:[#allocation10] sm:$0xff] }
 0x4eb   :  { %7888 = vmatpush1.bf16.msra.mxu0 %v9926_v43  ;;  %v9985_v43 = vcombine.high %v1719_v25, %v1723_v37  ;;  %v1771_v35 = vld [vmem:[#allocation8 + $0x1fb8] sm:$0xff] }
 0x4ec   :  { %8216 = vmatpush1.bf16.msra.mxu1 %v9928_v52  ;;  %7889 = vmatprep.subr.bf16.mxu0 %v9935_v44  ;;  %v1726_v52 = vld [vmem:[#allocation8 + $0x1e50] sm:$0xff] }
 0x4ed   :  { %8217 = vmatprep.subr.bf16.mxu1 %v9937_v0  ;;  %v1730_v44 = vld [vmem:[#allocation8 + $0x1e70] sm:$0xff]  ;;  %v1727_v0 = vld [vmem:[#allocation8 + $0x1e58] sm:$0xff] }
 0x4ee   :  { %v9991_v55 = vcombine.high %v1726_v52, %v1730_v44  ;;  %v9990_v56 = vcombine.low %v1726_v52, %v1730_v44  ;;  %v9992_v38 = vcombine.low %v1727_v0, %v1731_v33  ;;  %v1789_v52 = vrot.slane %v10948_v39, %v10760_v15  ;;  %v1775_v44 = vld [vmem:[#allocation8 + $0x1fd8] sm:$0xff] }
 0x4ef   :  { %7890 = vmatpush1.bf16.msra.mxu0 %v9934_v62  ;;  %v9993_v62 = vcombine.high %v1727_v0, %v1731_v33  ;;  %v1779_v0 = vld [vmem:[#allocation8 + $0x1ff8] sm:$0xff]  ;;  %v1797_v33 = vrot.slane %v10948_v39, %v10763_v16  ;;  %v10330_v16 = vld [vmem:[#allocation11 + $0xc0] sm:$0xff]  }
 0x4f0   :  { %8218 = vmatpush1.bf16.msra.mxu1 %v9936_v6  ;;  %7891 = vmatprep.subr.bf16.mxu0 %v9943_v58  ;;  %v1734_v6 = vld [vmem:[#allocation8 + $0x1e90] sm:$0xff]  ;;  %v10040_v15 = vcombine.low %v1775_v44, %v1779_v0 }
 0x4f1   :  { %8219 = vmatprep.subr.bf16.mxu1 %v9945_v21  ;;  %v1738_v58 = vld [vmem:[#allocation8 + $0x1eb0] sm:$0xff]  ;;  %v1735_v21 = vld [vmem:[#allocation8 + $0x1e98] sm:$0xff] }
 0x4f2   :  { %v9999_v60 = vcombine.high %v1734_v6, %v1738_v58  ;;  %v9998_v12 = vcombine.low %v1734_v6, %v1738_v58  ;;  %v10000_v9 = vcombine.low %v1735_v21, %v1739_v29  ;;  %v10196_v6 = vadd.f32 %v10928_v24, %v1789_v52  ;;  %v10364_v52 = vld [vmem:[#allocation11 + $0x180] sm:$0xff]  }
 0x4f3   :  { %7892 = vmatpush1.bf16.msra.mxu0 %v9942_v14  ;;  %v10001_v14 = vcombine.high %v1735_v21, %v1739_v29  ;;  %v10198_v58 = vadd.f32 %v10930_v27, %v1797_v33  ;;  %v10329_v29 = vld [vmem:[#allocation11 + $0x40] sm:$0xff]   ;;  %v10334_v27 = vld [vmem:[#allocation11 + $0xc8] sm:$0xff]  }
 0x4f4   :  { %8220 = vmatpush1.bf16.msra.mxu1 %v9944_v32  ;;  %7893 = vmatprep.subr.bf16.mxu0 %v9951_v36  ;;  %v1742_v32 = vld [vmem:[#allocation8 + $0x1ed0] sm:$0xff] }
 0x4f5   :  { %8221 = vmatprep.subr.bf16.mxu1 %v9953_v61  ;;  %v1746_v36 = vld [vmem:[#allocation8 + $0x1ef0] sm:$0xff]  ;;  %v1743_v61 = vld [vmem:[#allocation8 + $0x1ed8] sm:$0xff] }
 0x4f6   :  { %v10007_v45 = vcombine.high %v1742_v32, %v1746_v36  ;;  %v10006_v11 = vcombine.low %v1742_v32, %v1746_v36  ;;  %v10008_v59 = vcombine.low %v1743_v61, %v1747_v40  ;;  %v10333_v32 = vld [vmem:[#allocation11 + $0x48] sm:$0xff]  }
 0x4f7   :  { %7894 = vmatpush1.bf16.msra.mxu0 %v9950_v2  ;;  %v10009_v2 = vcombine.high %v1743_v61, %v1747_v40  ;;  %v10335_v61 = vld [vmem:[#allocation11 + $0x8] sm:$0xff]  }
 0x4f8   :  { %8222 = vmatpush1.bf16.msra.mxu1 %v9952_v3  ;;  %7895 = vmatprep.subr.bf16.mxu0 %v9959_v4  ;;  %v1750_v3 = vld [vmem:[#allocation8 + $0x1f10] sm:$0xff] }
 0x4f9   :  { %8223 = vmatprep.subr.bf16.mxu1 %v9961_v5  ;;  %v1754_v4 = vld [vmem:[#allocation8 + $0x1f30] sm:$0xff]  ;;  %v1751_v5 = vld [vmem:[#allocation8 + $0x1f18] sm:$0xff] }
 0x4fa   :  { %v10015_v17 = vcombine.high %v1750_v3, %v1754_v4  ;;  %v10014_v63 = vcombine.low %v1750_v3, %v1754_v4  ;;  %v10016_v10 = vcombine.low %v1751_v5, %v1755_v51  ;;  %v10336_v40 = vld [vmem:[#allocation11 + $0x88] sm:$0xff]   ;;  %v10341_v3 = vld [vmem:[#allocation11 + $0x58] sm:$0xff]  }
 0x4fb   :  { %7896 = vmatpush1.bf16.msra.mxu0 %v9958_v20  ;;  %v10017_v20 = vcombine.high %v1751_v5, %v1755_v51  ;;  %v10342_v4 = vld [vmem:[#allocation11 + $0xd8] sm:$0xff]   ;;  %v10345_v51 = vld [vmem:[#allocation11 + $0x60] sm:$0xff]   ;;  %v10367_v33 = vld [vmem:[#allocation11 + $0x108] sm:$0xff]  }
 0x4fc   :  { %8224 = vmatpush1.bf16.msra.mxu1 %v9960_v19  ;;  %7897 = vmatprep.subr.bf16.mxu0 %v9967_v22  ;;  %v1758_v19 = vld [vmem:[#allocation8 + $0x1f50] sm:$0xff]  ;;  %v10344_v5 = vld [vmem:[#allocation11 + $0x98] sm:$0xff]  }
 0x4fd   :  { %8225 = vmatprep.subr.bf16.mxu1 %v9969_v23  ;;  %v1762_v22 = vld [vmem:[#allocation8 + $0x1f70] sm:$0xff]  ;;  %v1759_v23 = vld [vmem:[#allocation8 + $0x1f58] sm:$0xff] }
 0x4fe   :  { %v10023_v30 = vcombine.high %v1758_v19, %v1762_v22  ;;  %v10022_v25 = vcombine.low %v1758_v19, %v1762_v22  ;;  %v10024_v37 = vcombine.low %v1759_v23, %v1763_v28  ;;  %v10350_v19 = vld [vmem:[#allocation11 + $0xe8] sm:$0xff]  }
 0x4ff   :  { %7898 = vmatpush1.bf16.msra.mxu0 %v9966_v47  ;;  %v10025_v47 = vcombine.high %v1759_v23, %v1763_v28  ;;  %v10351_v22 = vld [vmem:[#allocation11 + $0x28] sm:$0xff]   ;;  %v1785_v23 = vrot.slane %v10948_v39, %v10755_v13  ;;  %v10358_v13 = vld [vmem:[#allocation11 + $0xf8] sm:$0xff]  }
 0x500   :  { %8226 = vmatpush1.bf16.msra.mxu1 %v9968_v7  ;;  %7899 = vmatprep.subr.bf16.mxu0 %v9975_v31  ;;  %v1766_v7 = vld [vmem:[#allocation8 + $0x1f90] sm:$0xff] }
 0x501   :  { %8227 = vmatprep.subr.bf16.mxu1 %v9977_v34  ;;  %v1770_v31 = vld [vmem:[#allocation8 + $0x1fb0] sm:$0xff]  ;;  %v1767_v34 = vld [vmem:[#allocation8 + $0x1f98] sm:$0xff] }
 0x502   :  { %v10352_v28 = vld [vmem:[#allocation11 + $0xa8] sm:$0xff]  }
 0x503   :  { %7900 = vmatpush1.bf16.msra.mxu0 %v9974_v41  ;;  %v10031_v41 = vcombine.high %v1766_v7, %v1770_v31 }
 0x504   :  { %8228 = vmatpush1.bf16.msra.mxu1 %v9976_v46  ;;  %7901 = vmatprep.subr.bf16.mxu0 %v9983_v57  ;;  %v10033_v46 = vcombine.high %v1767_v34, %v1771_v35  ;;  %v1774_v57 = vld [vmem:[#allocation8 + $0x1fd0] sm:$0xff] }
 0x505   :  { %8229 = vmatprep.subr.bf16.mxu1 %v9985_v43  ;;  %v1778_v43 = vld [vmem:[#allocation8 + $0x1ff0] sm:$0xff] }
 0x506   :  { %v10038_v21 = vcombine.low %v1774_v57, %v1778_v43 }
 0x507   :  { %7902 = vmatpush1.bf16.msra.mxu0 %v9982_v53  ;;  %v10030_v53 = vcombine.low %v1766_v7, %v1770_v31  ;;  %v10195_v7 = vadd.f32 %v10924_v1, %v1785_v23  ;;  %v10356_v31 = vld [vmem:[#allocation11 + $0xb0] sm:$0xff]   ;;  %v10363_v1 = vld [vmem:[#allocation11 + $0x100] sm:$0xff]  }
 0x508   :  { %8230 = vmatpush1.bf16.msra.mxu1 %v9984_v54  ;;  %7903 = vmatprep.subr.bf16.mxu0 %v9991_v55  ;;  %v10032_v54 = vcombine.low %v1767_v34, %v1771_v35  ;;  %v10039_v55 = vcombine.high %v1774_v57, %v1778_v43  ;;  %v10357_v34 = vld [vmem:[#allocation11 + $0x78] sm:$0xff]   ;;  %v10362_v57 = vld [vmem:[#allocation11 + $0x1c0] sm:$0xff]  }
 0x509   :  { %8231 = vmatprep.subr.bf16.mxu1 %v9993_v62  ;;  %v10041_v62 = vcombine.high %v1775_v44, %v1779_v0  ;;  %v10365_v44 = vld [vmem:[#allocation11 + $0x148] sm:$0xff]  }
 0x50a   :  { %v10366_v0 = vld [vmem:[#allocation11 + $0x1c8] sm:$0xff]  }
 0x50b   :  { %7904 = vmatpush1.bf16.msra.mxu0 %v9990_v56  ;;  %v8255_v56 = vmax.f32 %v10196_v6, 0.0  ;;  %v10372_v6 = vld [vmem:[#allocation11 + $0x190] sm:$0xff]  }
 0x50c   :  { %8232 = vmatpush1.bf16.msra.mxu1 %v9992_v38  ;;  %7905 = vmatprep.subr.bf16.mxu0 %v9999_v60  ;;  %v8257_v38 = vmax.f32 %v10198_v58, 0.0  ;;  %v10331_v60 = vld [vmem:[#allocation11] sm:$0xff]   ;;  %v10373_v58 = vld [vmem:[#allocation11 + $0x158] sm:$0xff]  }
 0x50d   :  { %8233 = vmatprep.subr.bf16.mxu1 %v10001_v14  ;;  %v10332_v14 = vld [vmem:[#allocation11 + $0x80] sm:$0xff]   ;;  %v8263_v24 = vpack.c.bf16 %v8255_v56, %v8255_v56 }
 0x50e   :  { %v8265_v36 = vpack.c.bf16 %v8257_v38, %v8257_v38  ;;  %v10378_v56 = vld [vmem:[#allocation11 + $0x1e0] sm:$0xff]  }
 0x50f   :  { %7906 = vmatpush1.bf16.msra.mxu0 %v9998_v12  ;;  %v10337_v12 = vld [vmem:[#allocation11 + $0x50] sm:$0xff]   ;;  %v10379_v38 = vld [vmem:[#allocation11 + $0x120] sm:$0xff]  }
 0x510   :  { %8234 = vmatpush1.bf16.msra.mxu1 %v10000_v9  ;;  %7907 = vmatprep.subr.bf16.mxu0 %v10007_v45  ;;  %v10338_v9 = vld [vmem:[#allocation11 + $0xd0] sm:$0xff]  }
 0x511   :  { %8235 = vmatprep.subr.bf16.mxu1 %v10009_v2  ;;  %v10339_v45 = vld [vmem:[#allocation11 + $0x10] sm:$0xff]  }
 0x512   :  { %v10340_v2 = vld [vmem:[#allocation11 + $0x90] sm:$0xff]  }
 0x513   :  { %7908 = vmatpush1.bf16.msra.mxu0 %v10006_v11  ;;  %v10346_v11 = vld [vmem:[#allocation11 + $0xe0] sm:$0xff]  }
 0x514   :  { %8236 = vmatpush1.bf16.msra.mxu1 %v10008_v59  ;;  %7909 = vmatprep.subr.bf16.mxu0 %v10015_v17  ;;  %v10347_v59 = vld [vmem:[#allocation11 + $0x20] sm:$0xff]  }
 0x515   :  { %8237 = vmatprep.subr.bf16.mxu1 %v10017_v20  ;;  %v10348_v17 = vld [vmem:[#allocation11 + $0xa0] sm:$0xff]   ;;  %v10349_v20 = vld [vmem:[#allocation11 + $0x68] sm:$0xff]  }
 0x517   :  { %7910 = vmatpush1.bf16.msra.mxu0 %v10014_v63  ;;  %v10353_v63 = vld [vmem:[#allocation11 + $0x70] sm:$0xff]  }
 0x518   :  { %8238 = vmatpush1.bf16.msra.mxu1 %v10016_v10  ;;  %7911 = vmatprep.subr.bf16.mxu0 %v10023_v30  ;;  %v1793_v10 = vrot.slane %v10948_v39, %v10796_v8  ;;  %v10354_v30 = vld [vmem:[#allocation11 + $0xf0] sm:$0xff]   ;;  %v10360_v8 = vld [vmem:[#allocation11 + $0xb8] sm:$0xff]  }
 0x519   :  { %8239 = vmatprep.subr.bf16.mxu1 %v10025_v47  ;;  %v10355_v47 = vld [vmem:[#allocation11 + $0x30] sm:$0xff]  }
 0x51a   :  { %v10197_v35 = vadd.f32 %v10926_v18, %v1793_v10 }
 0x51b   :  { %7912 = vmatpush1.bf16.msra.mxu0 %v10022_v25  ;;  %v10359_v25 = vld [vmem:[#allocation11 + $0x38] sm:$0xff]  }
 0x51c   :  { %8240 = vmatpush1.bf16.msra.mxu1 %v10024_v37  ;;  %7913 = vmatprep.subr.bf16.mxu0 %v10031_v41  ;;  %v8254_v37 = vmax.f32 %v10195_v7, 0.0  ;;  %v10361_v41 = vld [vmem:[#allocation11 + $0x140] sm:$0xff]  }
 0x51d   :  { %8241 = vmatprep.subr.bf16.mxu1 %v10033_v46  ;;  %v8256_v46 = vmax.f32 %v10197_v35, 0.0 }
 0x51e   :  { %v8262_v43 = vpack.c.bf16 %v8254_v37, %v8254_v37 }
 0x51f   :  { %7914 = vmatpush1.bf16.msra.mxu0 %v10030_v53  ;;  %v8264_v18 = vpack.c.bf16 %v8256_v46, %v8256_v46  ;;  %v10368_v53 = vld [vmem:[#allocation11 + $0x188] sm:$0xff]  }
 0x520   :  { %8242 = vmatpush1.bf16.msra.mxu1 %v10032_v54  ;;  %7915 = vmatprep.subr.bf16.mxu0 %v10039_v55  ;;  %v10369_v54 = vld [vmem:[#allocation11 + $0x150] sm:$0xff]  }
 0x521   :  { %8243 = vmatprep.subr.bf16.mxu1 %v10041_v62  ;;  %v10370_v55 = vld [vmem:[#allocation11 + $0x1d0] sm:$0xff]  }
 0x522   :  { %v10371_v62 = vld [vmem:[#allocation11 + $0x110] sm:$0xff]  }
 0x523   :  { %7916 = vmatpush1.bf16.msra.mxu0 %v10038_v21  ;;  %v10374_v21 = vld [vmem:[#allocation11 + $0x1d8] sm:$0xff]  }
 0x524   :  { %8244 = vmatpush1.bf16.msra.mxu1 %v10040_v15  ;;  %10107 = vmatprep.subr.bf16.mxu0 %v10329_v29  ;;  %v10375_v15 = vld [vmem:[#allocation11 + $0x118] sm:$0xff]  }
 0x525   :  { %10129 = vmatprep.subr.bf16.mxu1 %v10330_v16  ;;  %v10376_v29 = vld [vmem:[#allocation11 + $0x198] sm:$0xff]   ;;  %v10377_v16 = vld [vmem:[#allocation11 + $0x160] sm:$0xff]  }
 0x526   :  { %7918 = vmatmul.mubr.bf16.vlgmr.msra.gmra.mrb[20].mxu0 %v10906_v26 }
 0x527   :  { %8246 = vmatmul.mubr.bf16.vlgmr.msra.gmra.mrb[20].mxu1 %v10906_v26  ;;  %10108 = vmatpush3.bf16.msra.mxu0 %v10331_v60  ;;  %v10343_v26 = vld [vmem:[#allocation11 + $0x18] sm:$0xff]   ;;  %v10380_v60 = vld [vmem:[#allocation11 + $0x1a0] sm:$0xff]  }
 0x528   :  { %8821 = vmatprep.mubr.bf16.mxu0 %v8263_v24  ;;  %10130 = vmatpush3.bf16.msra.mxu1 %v10332_v14  ;;  %v10381_v14 = vld [vmem:[#allocation11 + $0x168] sm:$0xff]  }
 0x529   :  { %8861 = vmatprep.mubr.bf16.mxu1 %v8265_v36  ;;  %10109 = vmatprep.subr.bf16.mxu0 %v10333_v32  ;;  %v10382_v32 = vld [vmem:[#allocation11 + $0x1e8] sm:$0xff]   ;;  %v10385_v36 = vld [vmem:[#allocation11 + $0x170] sm:$0xff]  }
 0x52a   :  { %10131 = vmatprep.subr.bf16.mxu1 %v10334_v27  ;;  %v10383_v24 = vld [vmem:[#allocation11 + $0x128] sm:$0xff]  }
 0x52b   :  { %10110 = vmatpush3.bf16.msra.mxu0 %v10335_v61  ;;  %v10384_v27 = vld [vmem:[#allocation11 + $0x1a8] sm:$0xff]   ;;  %v10386_v61 = vld [vmem:[#allocation11 + $0x1f0] sm:$0xff]  }
 0x52c   :  { %10132 = vmatpush3.bf16.msra.mxu1 %v10336_v40  ;;  %10111 = vmatprep.subr.bf16.mxu0 %v10337_v12  ;;  %v10387_v40 = vld [vmem:[#allocation11 + $0x130] sm:$0xff]  }
 0x52d   :  { %10133 = vmatprep.subr.bf16.mxu1 %v10338_v9  ;;  %v10388_v12 = vld [vmem:[#allocation11 + $0x1b0] sm:$0xff]   ;;  %v10389_v9 = vld [vmem:[#allocation11 + $0x178] sm:$0xff]  }
 0x52f   :  { %10112 = vmatpush3.bf16.msra.mxu0 %v10339_v45  ;;  %v10390_v45 = vld [vmem:[#allocation11 + $0x1f8] sm:$0xff]  }
 0x530   :  { %10134 = vmatpush3.bf16.msra.mxu1 %v10340_v2  ;;  %10113 = vmatprep.subr.bf16.mxu0 %v10341_v3  ;;  %v10391_v2 = vld [vmem:[#allocation11 + $0x138] sm:$0xff]  }
 0x531   :  { %10135 = vmatprep.subr.bf16.mxu1 %v10342_v4  ;;  %v10392_v3 = vld [vmem:[#allocation11 + $0x1b8] sm:$0xff]   ;;  %v1801_v4 = vrot.slane %v10948_v39, %v10807_v42 }
 0x533   :  { %10114 = vmatpush3.bf16.msra.mxu0 %v10343_v26  ;;  %v1809_v26 = vrot.slane %v10948_v39, %v10813_v49 }
 0x534   :  { %10136 = vmatpush3.bf16.msra.mxu1 %v10344_v5  ;;  %10115 = vmatprep.subr.bf16.mxu0 %v10345_v51  ;;  %v1805_v5 = vrot.slane %v10948_v39, %v10810_v48  ;;  %v1813_v51 = vrot.slane %v10948_v39, %v10816_v50 }
 0x535   :  { %10137 = vmatprep.subr.bf16.mxu1 %v10346_v11 }
 0x537   :  { %10116 = vmatpush3.bf16.msra.mxu0 %v10347_v59 }
 0x538   :  { %10138 = vmatpush3.bf16.msra.mxu1 %v10348_v17  ;;  %10117 = vmatprep.subr.bf16.mxu0 %v10349_v20 }
 0x539   :  { %10139 = vmatprep.subr.bf16.mxu1 %v10350_v19 }
 0x53b   :  { %10118 = vmatpush3.bf16.msra.mxu0 %v10351_v22 }
 0x53c   :  { %10140 = vmatpush3.bf16.msra.mxu1 %v10352_v28  ;;  %10119 = vmatprep.subr.bf16.mxu0 %v10353_v63 }
 0x53d   :  { %10141 = vmatprep.subr.bf16.mxu1 %v10354_v30 }
 0x53f   :  { %10120 = vmatpush3.bf16.msra.mxu0 %v10355_v47 }
 0x540   :  { %10142 = vmatpush3.bf16.msra.mxu1 %v10356_v31  ;;  %10121 = vmatprep.subr.bf16.mxu0 %v10357_v34 }
 0x541   :  { %10143 = vmatprep.subr.bf16.mxu1 %v10358_v13 }
 0x543   :  { %10122 = vmatpush3.bf16.msra.mxu0 %v10359_v25  ;;  %v10042_v25 = vld [vmem:[#allocation13] ss:$0 sm:$0xff] }
 0x544   :  { %10144 = vmatpush3.bf16.msra.mxu1 %v10360_v8  ;;  %10151 = vmatprep.subr.bf16.mxu0 %v10361_v41 }
 0x545   :  { %10173 = vmatprep.subr.bf16.mxu1 %v10362_v57 }
 0x546   :  { %8822 = vmatmul.mubr.bf16.vlgmr.msra.gmra.mrb[24].mxu0 %v8262_v43 }
 0x547   :  { %8862 = vmatmul.mubr.bf16.vlgmr.msra.gmra.mrb[24].mxu1 %v8264_v18  ;;  %10152 = vmatpush3.bf16.msra.mxu0 %v10363_v1 }
 0x548   :  { %10174 = vmatpush3.bf16.msra.mxu1 %v10364_v52  ;;  %10153 = vmatprep.subr.bf16.mxu0 %v10365_v44 }
 0x549   :  { %10175 = vmatprep.subr.bf16.mxu1 %v10366_v0 }
 0x54b   :  { %10154 = vmatpush3.bf16.msra.mxu0 %v10367_v33 }
 0x54c   :  { %10176 = vmatpush3.bf16.msra.mxu1 %v10368_v53  ;;  %10155 = vmatprep.subr.bf16.mxu0 %v10369_v54 }
 0x54d   :  { %10177 = vmatprep.subr.bf16.mxu1 %v10370_v55 }
 0x54f   :  { %10156 = vmatpush3.bf16.msra.mxu0 %v10371_v62 }
 0x550   :  { %10178 = vmatpush3.bf16.msra.mxu1 %v10372_v6  ;;  %10157 = vmatprep.subr.bf16.mxu0 %v10373_v58 }
 0x551   :  { %10179 = vmatprep.subr.bf16.mxu1 %v10374_v21 }
 0x553   :  { %10158 = vmatpush3.bf16.msra.mxu0 %v10375_v15 }
 0x554   :  { %10180 = vmatpush3.bf16.msra.mxu1 %v10376_v29  ;;  %10159 = vmatprep.subr.bf16.mxu0 %v10377_v16 }
 0x555   :  { %10181 = vmatprep.subr.bf16.mxu1 %v10378_v56 }
 0x557   :  { %10160 = vmatpush3.bf16.msra.mxu0 %v10379_v38 }
 0x558   :  { %10182 = vmatpush3.bf16.msra.mxu1 %v10380_v60  ;;  %10161 = vmatprep.subr.bf16.mxu0 %v10381_v14 }
 0x559   :  { %10183 = vmatprep.subr.bf16.mxu1 %v10382_v32 }
 0x55b   :  { %10162 = vmatpush3.bf16.msra.mxu0 %v10383_v24 }
 0x55c   :  { %10184 = vmatpush3.bf16.msra.mxu1 %v10384_v27  ;;  %10163 = vmatprep.subr.bf16.mxu0 %v10385_v36 }
 0x55d   :  { %10185 = vmatprep.subr.bf16.mxu1 %v10386_v61 }
 0x55f   :  { %10164 = vmatpush3.bf16.msra.mxu0 %v10387_v40 }
 0x560   :  { %10186 = vmatpush3.bf16.msra.mxu1 %v10388_v12  ;;  %10165 = vmatprep.subr.bf16.mxu0 %v10389_v9 }
 0x561   :  { %10187 = vmatprep.subr.bf16.mxu1 %v10390_v45 }
 0x563   :  { %10166 = vmatpush3.bf16.msra.mxu0 %v10391_v2 }
 0x564   :  { %10188 = vmatpush3.bf16.msra.mxu1 %v10392_v3 }
 0x5f9   :  { %v7919_v11 = vpop.f32.mrb[20].mxu0 }
 0x5fa   :  { %v10199_v59 = vadd.f32 %v7919_v11, %v1801_v4  ;;  %v8247_v17 = vpop.f32.mrb[20].mxu1  ;;  %v7921_v20 = vpop.f32.mrb[21].mxu0 }
 0x5fb   :  { %v10201_v19 = vadd.f32 %v8247_v17, %v1809_v26  ;;  %v10200_v22 = vadd.f32 %v7921_v20, %v1805_v5  ;;  %v8249_v23 = vpop.f32.mrb[21].mxu1  ;;  %v7923_v28 = vpop.f32.mrb[22].mxu0 }
 0x5fc   :  { %v8258_v63 = vmax.f32 %v10199_v59, 0.0  ;;  %v10202_v10 = vadd.f32 %v8249_v23, %v1813_v51  ;;  %v8251_v42 = vpop.f32.mrb[22].mxu1  ;;  %v7924_v30 = vpop.f32.mrb[23].mxu0 }
 0x5fd   :  { %v8260_v47 = vmax.f32 %v10201_v19, 0.0  ;;  %v8259_v49 = vmax.f32 %v10200_v22, 0.0  ;;  %v8252_v7 = vpop.f32.mrb[23].mxu1 }
 0x5fe   :  { %v8261_v31 = vmax.f32 %v10202_v10, 0.0  ;;  %v8266_v34 = vpack.c.bf16 %v8258_v63, %v8258_v63 }
 0x5ff   :  { %v8267_v48 = vpack.c.bf16 %v8259_v49, %v8259_v49  ;;  %v8268_v50 = vpack.c.bf16 %v8260_v47, %v8260_v47 }
 0x600   :  { %v8269_v35 = vpack.c.bf16 %v8261_v31, %v8261_v31 }
 0x601   :  { %8901 = vmatprep.mubr.bf16.mxu0 %v8267_v48 }
 0x602   :  { %8941 = vmatprep.mubr.bf16.mxu1 %v8269_v35  ;;  %8902 = vmatmul.mubr.bf16.vlgmr.msra.gmra.mrb[28].mxu0 %v8266_v34 }
 0x603   :  { %8942 = vmatmul.mubr.bf16.vlgmr.msra.gmra.mrb[28].mxu1 %v8268_v50 }
 0x619   :  { %v10123_v39 = vpop.f32.mrb[24].mxu0 }
 0x61a   :  { %v10145_v13 = vpop.f32.mrb[24].mxu1  ;;  %v10124_v37 = vpop.f32.mrb[25].mxu0 }
 0x61b   :  { %v10125_v8 = vadd.f32 %v10124_v37, %v10123_v39  ;;  %v10146_v41 = vpop.f32.mrb[25].mxu1  ;;  %v10126_v46 = vpop.f32.mrb[26].mxu0 }
 0x61c   :  { %v10147_v57 = vadd.f32 %v10146_v41, %v10145_v13  ;;  %v10148_v1 = vpop.f32.mrb[26].mxu1  ;;  %v10127_v43 = vpop.f32.mrb[27].mxu0 }
 0x61d   :  { %v8824_v52 = vadd.f32 %v10125_v8, %v10042_v25  ;;  %v10149_v44 = vpop.f32.mrb[27].mxu1 }
 0x61f   :  { %v8864_v18 = vadd.f32 %v10147_v57, %v8824_v52 }
 0x6d5   :  { %v10167_v0 = vpop.f32.mrb[28].mxu0 }
 0x6d6   :  { %v10189_v33 = vpop.f32.mrb[28].mxu1  ;;  %v10168_v53 = vpop.f32.mrb[29].mxu0 }
 0x6d7   :  { %v10169_v54 = vadd.f32 %v10168_v53, %v10167_v0  ;;  %v10190_v55 = vpop.f32.mrb[29].mxu1  ;;  %v10170_v62 = vpop.f32.mrb[30].mxu0 }
 0x6d8   :  { %v10191_v6 = vadd.f32 %v10190_v55, %v10189_v33  ;;  %v10192_v58 = vpop.f32.mrb[30].mxu1  ;;  %v10171_v21 = vpop.f32.mrb[31].mxu0 }
 0x6d9   :  { %v8904_v15 = vadd.f32 %v10169_v54, %v8864_v18  ;;  %v10193_v29 = vpop.f32.mrb[31].mxu1 }
 0x6db   :  { %v8944_v16 = vadd.f32 %v10191_v6, %v8904_v15 }
 0x6dd   :  { %8949 = vmax.xlane.f32.xlu0 %v8944_v16 }
 0x76a   :  { %v8950_v56 = vpop.xlane.xlu0 %8949 }
 0x76b   :  { %v8951_v38 = vsub.f32 %v8944_v16, %v8950_v56 }
 0x76d   :  { %v8952_v60 = vmul.f32 1.442695, %v8951_v38 }
 0x76f   :  { %10393 = vpow2.f32 %v8952_v60 }
 0x779   :  { %v10394_v14 = vpop.eup %10393 }
 0x77a   :  { %8954 = vadd.xlane.f32.xlu0 %v10394_v14 }
 0x807   :  { %v8955_v32 = vpop.xlane.xlu0 %8954 }
 0x808   :  { %10395 = vlog2.f32 %v8955_v32 }
 0x812   :  { %v10396_v24 = vpop.eup %10395 }
 0x813   :  { %v8957_v27 = vmul.f32 0.6931472, %v10396_v24 }
 0x815   :  { %v8958_v36 = vsub.f32 %v8951_v38, %v8957_v27 }
 0x817   :  { %8959 = vst [vmem:[#allocation14] sm:$0xff] %v8958_v36 }
 0x818   :  { %10564 = shalt.err (!%p10561_p4)
}
 0x819   :  { %s10565_s8 = scalar_lea.hbm %s10991_s7, 128 }
 0x81a   :  { %p10566_p5 = scmp.ne.s32.totalorder %s10991_s7, %s10565_s8  ;;  %p10569_p6 = scmp.lt.u32.totalorder %s10565_s8, %s10991_s7 }
 0x81c   :  { %p10571_p7 = pnand %p10569_p6, %p10566_p5 }
 0x81e   :  { %10574 = shalt.err (!%p10571_p7)
}
 0x81f   :  { %8969 = dma.vmem_to_hbm [thread:$0]  %s8967_s14, 128, %s10991_s7, [#allocation4]  }
 0x820   :  { %10583 = dma.done.wait [#allocation4], 128  }
 0x821   :  { %10584 = vsyncadd [#allocation4], 4294967168 }
 0x822   :  { %8973 = vsyncpa [#allocation3], 1 }
 0x823   :  { %8974 = vsyncpa [#allocation6], 1 }
 0x824   :  { %8975 = vsyncpa [#allocation9], 1 }
 0x825   :  { %8976 = vsyncpa [#allocation12], 1 }
 0x826   :  { %8977 = vsyncpa [#allocation4], 1 }

</bundles_post_ra>
